<compile_context>
chip_gen: v7x
topology: tpu7x:2x2x1
jax: 0.10.0
libtpu: 0.0.40
codegen_flags: <defaults>
</compile_context>

<pallas_src>
import functools

import jax
import jax.numpy as jnp
from jax.experimental import pallas as pl
from jax.experimental.pallas import tpu as pltpu

# Small synthetic sizes consistent with the module (CNN_EMB_DIM -> GPT_EMB_DIM).
CNN_EMB_DIM = 4     # in_channels (P)
GPT_EMB_DIM = 32    # out_channels
SPATIAL = 15        # module is designed for P x 15 x 15 maps
LEAKY_SLOPE = 0.01
IN_EPS = 1e-5


# ----------------------------- Pallas kernel -------------------------------
def _fused_kernel(x_ref,
                  w1_ref, b1_ref, p1_ref, q1_ref,
                  w2_ref, b2_ref, p2_ref, q2_ref,
                  w3_ref, b3_ref,
                  o_ref):
    """Fused 3-layer HexConv CNN for a block of TILE_N samples.

    x_ref : (TILE_N, Cin*15*15) f32, NCHW-flattened samples
    wK    : (F_in, F_out) bf16 hex-masked Toeplitz conv matrix
    bK    : (1, F_out) f32 bias, already broadcast over spatial
    pK    : (C*S, C) bf16 0/1 per-channel spatial-sum matrix
    qK    : (C, C*S) bf16 0/1 per-channel spatial-broadcast matrix
    o_ref : (TILE_N, F_out3_padded) f32
    """

    def conv(h_bf16, w_ref, b_ref):
        # bf16 x bf16 -> f32 accumulate: single MXU pass.
        y = jnp.dot(h_bf16, w_ref[...], preferred_element_type=jnp.float32)
        y = y + b_ref[...]
        return jnp.maximum(y, LEAKY_SLOPE * y)          # LeakyReLU(0.01)

    def inst_norm(y, p_ref, q_ref):
        # InstanceNorm2d: per-sample, per-channel over the S spatial positions,
        # biased variance, eps=1e-5, no affine.  Two stacked bf16 matmuls with
        # f32 accumulation:
        #   [y ; y*y]         @ p -> per-channel mean, E[y^2]     (reduction)
        #   [inv ; -mean*inv] @ q -> per-channel scale / shift    (broadcast)
        t = y.shape[0]
        s = p_ref.shape[0] // p_ref.shape[1]            # static spatial size
        inv_s = 1.0 / float(s)

        stacked = jnp.concatenate([y, y * y], axis=0).astype(jnp.bfloat16)
        stats = jnp.dot(stacked, p_ref[...],
                        preferred_element_type=jnp.float32) * inv_s
        mean = stats[:t]
        var = stats[t:] - mean * mean                    # biased variance
        inv = jax.lax.rsqrt(var + IN_EPS)

        aff = jnp.concatenate([inv, -mean * inv], axis=0).astype(jnp.bfloat16)
        sb = jnp.dot(aff, q_ref[...], preferred_element_type=jnp.float32)
        return y * sb[:t] + sb[t:]

    x = x_ref[...].astype(jnp.bfloat16)
    y = conv(x, w1_ref, b1_ref)                          # (T, 2P*81)
    y = inst_norm(y, p1_ref, q1_ref)
    y = conv(y.astype(jnp.bfloat16), w2_ref, b2_ref)     # (T, 4P*25)
    y = inst_norm(y, p2_ref, q2_ref)
    y = conv(y.astype(jnp.bfloat16), w3_ref, b3_ref)     # (T, OutPad)
    o_ref[...] = y.astype(o_ref.dtype)


# --------------------------- constant precompute -----------------------------
def hex_mask(k):
    r = (k - 1) // 2
    ii = jnp.arange(k) - r
    return (jnp.abs(ii[:, None] + ii[None, :]) <= r).astype(jnp.float32)


def conv_toeplitz(w_oihw, h_in, w_in):
    """Hex-masked VALID conv as a dense (Cin*H*W, Cout*Ho*Wo) matmul matrix.

    Input / output flatten order is NCHW per-sample: c*(H*W) + h*W + w, so
    consecutive layers chain without any in-kernel relayout.
    """
    cout, cin, k, _ = w_oihw.shape
    ho, wo = h_in - k + 1, w_in - k + 1
    wm = (w_oihw * hex_mask(k)[None, None, :, :]).astype(jnp.float32)

    dy = jnp.arange(h_in)[:, None] - jnp.arange(ho)[None, :]   # (H, Ho)
    dx = jnp.arange(w_in)[:, None] - jnp.arange(wo)[None, :]   # (W, Wo)
    vy = (dy >= 0) & (dy < k)
    vx = (dx >= 0) & (dx < k)
    dyc = jnp.clip(dy, 0, k - 1)
    dxc = jnp.clip(dx, 0, k - 1)

    t = wm[:, :, dyc, :][:, :, :, :, dxc]          # (Cout, Cin, H, Ho, W, Wo)
    valid = (vy[None, None, :, :, None, None]
             & vx[None, None, None, None, :, :]).astype(jnp.float32)
    t = t * valid
    t = jnp.transpose(t, (1, 2, 4, 0, 3, 5))       # (Cin, H, W, Cout, Ho, Wo)
    return t.reshape(cin * h_in * w_in, cout * ho * wo), ho, wo


def _norm_mats(c, s):
    """Per-channel spatial sum (C*S, C) and broadcast (C, C*S) 0/1 matrices."""
    p = jnp.repeat(jnp.eye(c, dtype=jnp.float32), s, axis=0)   # p[c*S+j, c] = 1
    return p, p.T


def precompute_constants(params):
    """Hex-mask + Toeplitz-ify the conv weights once, outside the forward."""
    w1, ho1, wo1 = conv_toeplitz(params["w1"], SPATIAL, SPATIAL)
    c1, s1 = params["w1"].shape[0], ho1 * wo1                  # 2P, 81
    w2, ho2, wo2 = conv_toeplitz(params["w2"], ho1, wo1)
    c2, s2 = params["w2"].shape[0], ho2 * wo2                  # 4P, 25
    w3, ho3, wo3 = conv_toeplitz(params["w3"], ho2, wo2)
    out_ch, s3 = params["w3"].shape[0], ho3 * wo3              # Out, 1

    p1, q1 = _norm_mats(c1, s1)
    p2, q2 = _norm_mats(c2, s2)

    # Lane-dense output: pad layer-3 F_out up to a 128-multiple (zero weights /
    # zero bias -> zero padded columns) for unmasked vector stores.
    f3 = out_ch * s3
    f3_pad = ((f3 + 127) // 128) * 128
    w3p = jnp.pad(w3, ((0, 0), (0, f3_pad - f3)))
    b3 = jnp.repeat(params["b3"].astype(jnp.float32), s3)
    b3p = jnp.pad(b3, (0, f3_pad - f3))[None, :]

    return {
        "w1": w1.astype(jnp.bfloat16),
        "b1": jnp.repeat(params["b1"].astype(jnp.float32), s1)[None, :],
        "p1": p1.astype(jnp.bfloat16), "q1": q1.astype(jnp.bfloat16),
        "w2": w2.astype(jnp.bfloat16),
        "b2": jnp.repeat(params["b2"].astype(jnp.float32), s2)[None, :],
        "p2": p2.astype(jnp.bfloat16), "q2": q2.astype(jnp.bfloat16),
        "w3": w3p.astype(jnp.bfloat16),
        "b3": b3p,
    }


# ------------------------------- forward ------------------------------------
def _pick_tile(n):
    """Rows per grid step.

    Small problems: a single grid step (grid is a serial loop on single-TC
    v5e/v6e, so splitting tiny batches only adds ~0.35us/step overhead and
    halves M on the MXU).  Large batches: M=256 fills the 256-wide MXU on
    v6e/v7x and amortizes per-step overhead; VMEM stays well under limits.
    """
    if n <= 256:
        return max(8, ((n + 7) // 8) * 8)
    return 256


def shallow_follower_state_cnn(x_btphw, consts, *, out_ch):
    """Forward pass; x: (B, T, P, 15, 15) -> (B, T, out_ch)."""
    B, T, P, H, W = x_btphw.shape
    n = B * T
    x = x_btphw.reshape(n, P * H * W).astype(jnp.float32)      # NCHW flatten

    tile = _pick_tile(n)
    out_pad = consts["b3"].shape[1]                            # 128-multiple
    const_names = ("w1", "b1", "p1", "q1", "w2", "b2", "p2", "q2", "w3", "b3")

    out = pl.pallas_call(
        _fused_kernel,
        out_shape=jax.ShapeDtypeStruct((n, out_pad), jnp.float32),
        grid=(pl.cdiv(n, tile),),                              # no wrapper-side pad
        in_specs=[pl.BlockSpec((tile, x.shape[1]), lambda i: (i, 0))]
        + [pl.BlockSpec(consts[name].shape, lambda i: (0, 0))
           for name in const_names],
        out_specs=pl.BlockSpec((tile, out_pad), lambda i: (i, 0)),
        compiler_params=pltpu.CompilerParams(
            dimension_semantics=("parallel",),
            vmem_limit_bytes=32 * 1024 * 1024,
        ),
    )(x, *[consts[name] for name in const_names])

    return out[:, :out_ch].reshape(B, T, out_ch)


# ------------------------------ parameters -----------------------------------
def init_params(key, in_ch=CNN_EMB_DIM, out_ch=GPT_EMB_DIM):
    ks = jax.random.split(key, 6)

    def w(k_, cout, cin, ksz):
        scale = 1.0 / jnp.sqrt(cin * ksz * ksz)
        return scale * jax.random.normal(k_, (cout, cin, ksz, ksz), jnp.float32)

    return {
        "w1": w(ks[0], 2 * in_ch, in_ch, 7),
        "b1": 0.01 * jax.random.normal(ks[1], (2 * in_ch,), jnp.float32),
        "w2": w(ks[2], 4 * in_ch, 2 * in_ch, 5),
        "b2": 0.01 * jax.random.normal(ks[3], (4 * in_ch,), jnp.float32),
        "w3": w(ks[4], out_ch, 4 * in_ch, 5),
        "b3": 0.01 * jax.random.normal(ks[5], (out_ch,), jnp.float32),
    }


# ------------------------- pure-JAX reference check --------------------------
def ref_forward(x_btphw, params):
    B, T, P, H, W = x_btphw.shape
    x = x_btphw.reshape(B * T, P, H, W).astype(jnp.float32)

    def layer(x, w, b, k, norm):
        wm = w * hex_mask(k)[None, None, :, :]
        y = jax.lax.conv_general_dilated(
            x, wm, (1, 1), "VALID",
            dimension_numbers=("NCHW", "OIHW", "NCHW"),
            precision=jax.lax.Precision.HIGHEST)
        y = y + b[None, :, None, None]
        y = jnp.where(y >= 0, y, LEAKY_SLOPE * y)
        if norm:
            mean = jnp.mean(y, axis=(2, 3), keepdims=True)
            var = jnp.mean((y - mean) ** 2, axis=(2, 3), keepdims=True)
            y = (y - mean) * jax.lax.rsqrt(var + IN_EPS)
        return y

    y = layer(x, params["w1"], params["b1"], 7, True)
    y = layer(y, params["w2"], params["b2"], 5, True)
    y = layer(y, params["w3"], params["b3"], 5, False)
    return y.reshape(B, T, -1)


if __name__ == "__main__":
    key = jax.random.PRNGKey(0)
    kx, kp = jax.random.split(key)

    B, T = 2, 8
    x = jax.random.normal(kx, (B, T, CNN_EMB_DIM, SPATIAL, SPATIAL), jnp.float32)
    params = init_params(kp)

    consts = precompute_constants(params)                     # once, outside forward
    fwd = jax.jit(functools.partial(shallow_follower_state_cnn, out_ch=GPT_EMB_DIM))
    out = jax.block_until_ready(fwd(x, consts))
    assert out.shape == (B, T, GPT_EMB_DIM), out.shape

    ref = jax.block_until_ready(ref_forward(x, params))
    # bf16 MXU operands (f32 accumulation) for convs and norm reductions vs the
    # f32-HIGHEST reference: expected max discrepancy well under 3e-2; any
    # structural error (mask / Toeplitz / norm) would be O(1).
    max_err = float(jnp.max(jnp.abs(out - ref)))
    assert bool(jnp.allclose(out, ref, rtol=3e-2, atol=3e-2)), max_err

    print("KERNEL_OK")
</pallas_src>

<mosaic_0001>
module attributes {stable_mosaic.version = 11 : i64} {
  func.func @_fused_kernel(%arg0: i32, %arg1: memref<16x900xf32, #tpu.memory_space<vmem>>, %arg2: memref<900x648xbf16, #tpu.memory_space<vmem>>, %arg3: memref<1x648xf32, #tpu.memory_space<vmem>>, %arg4: memref<648x8xbf16, #tpu.memory_space<vmem>>, %arg5: memref<8x648xbf16, #tpu.memory_space<vmem>>, %arg6: memref<648x400xbf16, #tpu.memory_space<vmem>>, %arg7: memref<1x400xf32, #tpu.memory_space<vmem>>, %arg8: memref<400x16xbf16, #tpu.memory_space<vmem>>, %arg9: memref<16x400xbf16, #tpu.memory_space<vmem>>, %arg10: memref<400x128xbf16, #tpu.memory_space<vmem>>, %arg11: memref<1x128xf32, #tpu.memory_space<vmem>>, %arg12: memref<16x128xf32, #tpu.memory_space<vmem>>) attributes {dimension_semantics = [#tpu.dimension_semantics<parallel>], iteration_bounds = array<i64: 1>, scalar_prefetch = 0 : i64, scratch_operands = 0 : i64, tpu.core_type = #tpu.core_type<tc>, window_params = [{transform_indices = @transform_0, window_bounds = array<i64: 16, 900>}, {pipeline_mode = #tpu.pipeline_mode<synchronous>, transform_indices = @transform_1, window_bounds = array<i64: 900, 648>}, {pipeline_mode = #tpu.pipeline_mode<synchronous>, transform_indices = @transform_2, window_bounds = array<i64: 1, 648>}, {pipeline_mode = #tpu.pipeline_mode<synchronous>, transform_indices = @transform_3, window_bounds = array<i64: 648, 8>}, {pipeline_mode = #tpu.pipeline_mode<synchronous>, transform_indices = @transform_4, window_bounds = array<i64: 8, 648>}, {pipeline_mode = #tpu.pipeline_mode<synchronous>, transform_indices = @transform_5, window_bounds = array<i64: 648, 400>}, {pipeline_mode = #tpu.pipeline_mode<synchronous>, transform_indices = @transform_6, window_bounds = array<i64: 1, 400>}, {pipeline_mode = #tpu.pipeline_mode<synchronous>, transform_indices = @transform_7, window_bounds = array<i64: 400, 16>}, {pipeline_mode = #tpu.pipeline_mode<synchronous>, transform_indices = @transform_8, window_bounds = array<i64: 16, 400>}, {pipeline_mode = #tpu.pipeline_mode<synchronous>, transform_indices = @transform_9, window_bounds = array<i64: 400, 128>}, {pipeline_mode = #tpu.pipeline_mode<synchronous>, transform_indices = @transform_10, window_bounds = array<i64: 1, 128>}, {transform_indices = @transform_11, window_bounds = array<i64: 16, 128>}]} {
    %c0 = arith.constant 0 : index
    %c0_0 = arith.constant 0 : index
    %0 = vector.load %arg1[%c0, %c0_0] : memref<16x900xf32, #tpu.memory_space<vmem>>, vector<16x900xf32>
    %1 = arith.truncf %0 : vector<16x900xf32> to vector<16x900xbf16>
    %c0_1 = arith.constant 0 : index
    %c0_2 = arith.constant 0 : index
    %2 = vector.load %arg2[%c0_1, %c0_2] : memref<900x648xbf16, #tpu.memory_space<vmem>>, vector<900x648xbf16>
    %cst = arith.constant dense<0.000000e+00> : vector<16x648xf32>
    %3 = tpu.matmul %1, %2, %cst {dimension_numbers = #tpu.dot_dimension_numbers<[1], [0], [0], [1], [0, 0, 1, 1], [], []>} : vector<16x900xbf16>, vector<900x648xbf16>, vector<16x648xf32> -> vector<16x648xf32>
    %c0_3 = arith.constant 0 : index
    %c0_4 = arith.constant 0 : index
    %4 = vector.load %arg3[%c0_3, %c0_4] : memref<1x648xf32, #tpu.memory_space<vmem>>, vector<1x648xf32>
    %5 = vector.broadcast %4 : vector<1x648xf32> to vector<16x648xf32>
    %6 = arith.addf %3, %5 : vector<16x648xf32>
    %cst_5 = arith.constant 0.00999999977 : f32
    %7 = vector.broadcast %cst_5 : f32 to vector<16x648xf32>
    %8 = arith.mulf %7, %6 : vector<16x648xf32>
    %9 = arith.maximumf %6, %8 : vector<16x648xf32>
    %10 = arith.mulf %9, %9 : vector<16x648xf32>
    %11 = tpu.concatenate %9, %10 in 0 : vector<16x648xf32>, vector<16x648xf32> -> vector<32x648xf32>
    %12 = arith.truncf %11 : vector<32x648xf32> to vector<32x648xbf16>
    %c0_6 = arith.constant 0 : index
    %c0_7 = arith.constant 0 : index
    %13 = vector.load %arg4[%c0_6, %c0_7] : memref<648x8xbf16, #tpu.memory_space<vmem>>, vector<648x8xbf16>
    %cst_8 = arith.constant dense<0.000000e+00> : vector<32x8xf32>
    %14 = tpu.matmul %12, %13, %cst_8 {dimension_numbers = #tpu.dot_dimension_numbers<[1], [0], [0], [1], [0, 0, 1, 1], [], []>} : vector<32x648xbf16>, vector<648x8xbf16>, vector<32x8xf32> -> vector<32x8xf32>
    %cst_9 = arith.constant 0.0123456791 : f32
    %15 = vector.broadcast %cst_9 : f32 to vector<32x8xf32>
    %16 = arith.mulf %14, %15 : vector<32x8xf32>
    %17 = vector.extract_strided_slice %16 {offsets = [0, 0], sizes = [16, 8], strides = [1, 1]} : vector<32x8xf32> to vector<16x8xf32>
    %18 = vector.extract_strided_slice %16 {offsets = [16, 0], sizes = [16, 8], strides = [1, 1]} : vector<32x8xf32> to vector<16x8xf32>
    %19 = arith.mulf %17, %17 : vector<16x8xf32>
    %20 = arith.subf %18, %19 : vector<16x8xf32>
    %cst_10 = arith.constant 9.99999974E-6 : f32
    %21 = vector.broadcast %cst_10 : f32 to vector<16x8xf32>
    %22 = arith.addf %20, %21 : vector<16x8xf32>
    %23 = math.rsqrt %22 : vector<16x8xf32>
    %cst_11 = arith.constant 0.000000e+00 : f32
    %24 = vector.broadcast %cst_11 : f32 to vector<16x8xf32>
    %25 = arith.subf %24, %17 : vector<16x8xf32>
    %26 = arith.mulf %25, %23 : vector<16x8xf32>
    %27 = tpu.concatenate %23, %26 in 0 : vector<16x8xf32>, vector<16x8xf32> -> vector<32x8xf32>
    %28 = arith.truncf %27 : vector<32x8xf32> to vector<32x8xbf16>
    %c0_12 = arith.constant 0 : index
    %c0_13 = arith.constant 0 : index
    %29 = vector.load %arg5[%c0_12, %c0_13] : memref<8x648xbf16, #tpu.memory_space<vmem>>, vector<8x648xbf16>
    %cst_14 = arith.constant dense<0.000000e+00> : vector<32x648xf32>
    %30 = tpu.matmul %28, %29, %cst_14 {dimension_numbers = #tpu.dot_dimension_numbers<[1], [0], [0], [1], [0, 0, 1, 1], [], []>} : vector<32x8xbf16>, vector<8x648xbf16>, vector<32x648xf32> -> vector<32x648xf32>
    %31 = vector.extract_strided_slice %30 {offsets = [0, 0], sizes = [16, 648], strides = [1, 1]} : vector<32x648xf32> to vector<16x648xf32>
    %32 = arith.mulf %9, %31 : vector<16x648xf32>
    %33 = vector.extract_strided_slice %30 {offsets = [16, 0], sizes = [16, 648], strides = [1, 1]} : vector<32x648xf32> to vector<16x648xf32>
    %34 = arith.addf %32, %33 : vector<16x648xf32>
    %35 = arith.truncf %34 : vector<16x648xf32> to vector<16x648xbf16>
    %c0_15 = arith.constant 0 : index
    %c0_16 = arith.constant 0 : index
    %36 = vector.load %arg6[%c0_15, %c0_16] : memref<648x400xbf16, #tpu.memory_space<vmem>>, vector<648x400xbf16>
    %cst_17 = arith.constant dense<0.000000e+00> : vector<16x400xf32>
    %37 = tpu.matmul %35, %36, %cst_17 {dimension_numbers = #tpu.dot_dimension_numbers<[1], [0], [0], [1], [0, 0, 1, 1], [], []>} : vector<16x648xbf16>, vector<648x400xbf16>, vector<16x400xf32> -> vector<16x400xf32>
    %c0_18 = arith.constant 0 : index
    %c0_19 = arith.constant 0 : index
    %38 = vector.load %arg7[%c0_18, %c0_19] : memref<1x400xf32, #tpu.memory_space<vmem>>, vector<1x400xf32>
    %39 = vector.broadcast %38 : vector<1x400xf32> to vector<16x400xf32>
    %40 = arith.addf %37, %39 : vector<16x400xf32>
    %cst_20 = arith.constant 0.00999999977 : f32
    %41 = vector.broadcast %cst_20 : f32 to vector<16x400xf32>
    %42 = arith.mulf %41, %40 : vector<16x400xf32>
    %43 = arith.maximumf %40, %42 : vector<16x400xf32>
    %44 = arith.mulf %43, %43 : vector<16x400xf32>
    %45 = tpu.concatenate %43, %44 in 0 : vector<16x400xf32>, vector<16x400xf32> -> vector<32x400xf32>
    %46 = arith.truncf %45 : vector<32x400xf32> to vector<32x400xbf16>
    %c0_21 = arith.constant 0 : index
    %c0_22 = arith.constant 0 : index
    %47 = vector.load %arg8[%c0_21, %c0_22] : memref<400x16xbf16, #tpu.memory_space<vmem>>, vector<400x16xbf16>
    %cst_23 = arith.constant dense<0.000000e+00> : vector<32x16xf32>
    %48 = tpu.matmul %46, %47, %cst_23 {dimension_numbers = #tpu.dot_dimension_numbers<[1], [0], [0], [1], [0, 0, 1, 1], [], []>} : vector<32x400xbf16>, vector<400x16xbf16>, vector<32x16xf32> -> vector<32x16xf32>
    %cst_24 = arith.constant 4.000000e-02 : f32
    %49 = vector.broadcast %cst_24 : f32 to vector<32x16xf32>
    %50 = arith.mulf %48, %49 : vector<32x16xf32>
    %51 = vector.extract_strided_slice %50 {offsets = [0, 0], sizes = [16, 16], strides = [1, 1]} : vector<32x16xf32> to vector<16x16xf32>
    %52 = vector.extract_strided_slice %50 {offsets = [16, 0], sizes = [16, 16], strides = [1, 1]} : vector<32x16xf32> to vector<16x16xf32>
    %53 = arith.mulf %51, %51 : vector<16x16xf32>
    %54 = arith.subf %52, %53 : vector<16x16xf32>
    %cst_25 = arith.constant 9.99999974E-6 : f32
    %55 = vector.broadcast %cst_25 : f32 to vector<16x16xf32>
    %56 = arith.addf %54, %55 : vector<16x16xf32>
    %57 = math.rsqrt %56 : vector<16x16xf32>
    %cst_26 = arith.constant 0.000000e+00 : f32
    %58 = vector.broadcast %cst_26 : f32 to vector<16x16xf32>
    %59 = arith.subf %58, %51 : vector<16x16xf32>
    %60 = arith.mulf %59, %57 : vector<16x16xf32>
    %61 = tpu.concatenate %57, %60 in 0 : vector<16x16xf32>, vector<16x16xf32> -> vector<32x16xf32>
    %62 = arith.truncf %61 : vector<32x16xf32> to vector<32x16xbf16>
    %c0_27 = arith.constant 0 : index
    %c0_28 = arith.constant 0 : index
    %63 = vector.load %arg9[%c0_27, %c0_28] : memref<16x400xbf16, #tpu.memory_space<vmem>>, vector<16x400xbf16>
    %cst_29 = arith.constant dense<0.000000e+00> : vector<32x400xf32>
    %64 = tpu.matmul %62, %63, %cst_29 {dimension_numbers = #tpu.dot_dimension_numbers<[1], [0], [0], [1], [0, 0, 1, 1], [], []>} : vector<32x16xbf16>, vector<16x400xbf16>, vector<32x400xf32> -> vector<32x400xf32>
    %65 = vector.extract_strided_slice %64 {offsets = [0, 0], sizes = [16, 400], strides = [1, 1]} : vector<32x400xf32> to vector<16x400xf32>
    %66 = arith.mulf %43, %65 : vector<16x400xf32>
    %67 = vector.extract_strided_slice %64 {offsets = [16, 0], sizes = [16, 400], strides = [1, 1]} : vector<32x400xf32> to vector<16x400xf32>
    %68 = arith.addf %66, %67 : vector<16x400xf32>
    %69 = arith.truncf %68 : vector<16x400xf32> to vector<16x400xbf16>
    %c0_30 = arith.constant 0 : index
    %c0_31 = arith.constant 0 : index
    %70 = vector.load %arg10[%c0_30, %c0_31] : memref<400x128xbf16, #tpu.memory_space<vmem>>, vector<400x128xbf16>
    %cst_32 = arith.constant dense<0.000000e+00> : vector<16x128xf32>
    %71 = tpu.matmul %69, %70, %cst_32 {dimension_numbers = #tpu.dot_dimension_numbers<[1], [0], [0], [1], [0, 0, 1, 1], [], []>} : vector<16x400xbf16>, vector<400x128xbf16>, vector<16x128xf32> -> vector<16x128xf32>
    %c0_33 = arith.constant 0 : index
    %c0_34 = arith.constant 0 : index
    %72 = vector.load %arg11[%c0_33, %c0_34] : memref<1x128xf32, #tpu.memory_space<vmem>>, vector<1x128xf32>
    %73 = vector.broadcast %72 : vector<1x128xf32> to vector<16x128xf32>
    %74 = arith.addf %71, %73 : vector<16x128xf32>
    %cst_35 = arith.constant 0.00999999977 : f32
    %75 = vector.broadcast %cst_35 : f32 to vector<16x128xf32>
    %76 = arith.mulf %75, %74 : vector<16x128xf32>
    %77 = arith.maximumf %74, %76 : vector<16x128xf32>
    %c0_36 = arith.constant 0 : index
    %c0_37 = arith.constant 0 : index
    %78 = vector.load %arg12[%c0_36, %c0_37] : memref<16x128xf32, #tpu.memory_space<vmem>>, vector<16x128xf32>
    tpu.vector_store %arg12[%c0_36, %c0_37], %77 {strides = array<i32>} : memref<16x128xf32, #tpu.memory_space<vmem>>, vector<16x128xf32>,
    return
  }
  func.func @transform_0(%arg0: i32) -> (i32, i32) {
    %c0_i32 = arith.constant 0 : i32
    %c0_i32_0 = arith.constant 0 : i32
    return %arg0, %c0_i32 : i32, i32
  }
  func.func @transform_1(%arg0: i32) -> (i32, i32) {
    %c0_i32 = arith.constant 0 : i32
    %c0_i32_0 = arith.constant 0 : i32
    %c0_i32_1 = arith.constant 0 : i32
    return %c0_i32, %c0_i32_0 : i32, i32
  }
  func.func @transform_2(%arg0: i32) -> (i32, i32) {
    %c0_i32 = arith.constant 0 : i32
    %c0_i32_0 = arith.constant 0 : i32
    %c0_i32_1 = arith.constant 0 : i32
    return %c0_i32, %c0_i32_0 : i32, i32
  }
  func.func @transform_3(%arg0: i32) -> (i32, i32) {
    %c0_i32 = arith.constant 0 : i32
    %c0_i32_0 = arith.constant 0 : i32
    %c0_i32_1 = arith.constant 0 : i32
    return %c0_i32, %c0_i32_0 : i32, i32
  }
  func.func @transform_4(%arg0: i32) -> (i32, i32) {
    %c0_i32 = arith.constant 0 : i32
    %c0_i32_0 = arith.constant 0 : i32
    %c0_i32_1 = arith.constant 0 : i32
    return %c0_i32, %c0_i32_0 : i32, i32
  }
  func.func @transform_5(%arg0: i32) -> (i32, i32) {
    %c0_i32 = arith.constant 0 : i32
    %c0_i32_0 = arith.constant 0 : i32
    %c0_i32_1 = arith.constant 0 : i32
    return %c0_i32, %c0_i32_0 : i32, i32
  }
  func.func @transform_6(%arg0: i32) -> (i32, i32) {
    %c0_i32 = arith.constant 0 : i32
    %c0_i32_0 = arith.constant 0 : i32
    %c0_i32_1 = arith.constant 0 : i32
    return %c0_i32, %c0_i32_0 : i32, i32
  }
  func.func @transform_7(%arg0: i32) -> (i32, i32) {
    %c0_i32 = arith.constant 0 : i32
    %c0_i32_0 = arith.constant 0 : i32
    %c0_i32_1 = arith.constant 0 : i32
    return %c0_i32, %c0_i32_0 : i32, i32
  }
  func.func @transform_8(%arg0: i32) -> (i32, i32) {
    %c0_i32 = arith.constant 0 : i32
    %c0_i32_0 = arith.constant 0 : i32
    %c0_i32_1 = arith.constant 0 : i32
    return %c0_i32, %c0_i32_0 : i32, i32
  }
  func.func @transform_9(%arg0: i32) -> (i32, i32) {
    %c0_i32 = arith.constant 0 : i32
    %c0_i32_0 = arith.constant 0 : i32
    %c0_i32_1 = arith.constant 0 : i32
    return %c0_i32, %c0_i32_0 : i32, i32
  }
  func.func @transform_10(%arg0: i32) -> (i32, i32) {
    %c0_i32 = arith.constant 0 : i32
    %c0_i32_0 = arith.constant 0 : i32
    %c0_i32_1 = arith.constant 0 : i32
    return %c0_i32, %c0_i32_0 : i32, i32
  }
  func.func @transform_11(%arg0: i32) -> (i32, i32) {
    %c0_i32 = arith.constant 0 : i32
    %c0_i32_0 = arith.constant 0 : i32
    return %arg0, %c0_i32 : i32, i32
  }
}

</mosaic_0001>

<bundles_post_ra>
// kernel: shallow_follower_state_cnn.1
= control target key start
LH: loop header
LB: loop body
LE: loop exit
PB: predicated region body
PF: predicated region fallthrough
CT: control target
= control target key end

     0   :  { %vm2129_vm0 = vcmask 31744   ;;  %vm2133_vm1 = vcmask 1041408   ;;  %vm3047_vm2 = vcmask 1043456   ;;  %vm3040_vm3 = vcmask 64512   ;;  %s9424_s1 = inlined_call_operand.vmem [shape: bf16[900,648], index: 1, kind: input, shape index: {}]   ;;  %s9425_s0 = inlined_call_operand.vmem [shape: f32[16,900], index: 0, kind: input, shape index: {}]   ;;  %s9426_s3 = inlined_call_operand.vmem [shape: bf16[648,8], index: 3, kind: input, shape index: {}]   ;;  %s9427_s2 = inlined_call_operand.vmem [shape: f32[1,648], index: 2, kind: input, shape index: {}]   ;;  %s9428_s4 = inlined_call_operand.vmem [shape: bf16[8,648], index: 4, kind: input, shape index: {}]   ;;  %s9429_s5 = inlined_call_operand.vmem [shape: bf16[648,400], index: 5, kind: input, shape index: {}]   ;;  %s9430_s7 = inlined_call_operand.vmem [shape: bf16[400,16], index: 7, kind: input, shape index: {}]   ;;  %s9431_s6 = inlined_call_operand.vmem [shape: f32[1,400], index: 6, kind: input, shape index: {}]   ;;  %s9432_s8 = inlined_call_operand.vmem [shape: bf16[16,400], index: 8, kind: input, shape index: {}]   ;;  %s9433_s9 = inlined_call_operand.vmem [shape: bf16[400,128], index: 9, kind: input, shape index: {}]   ;;  %s9434_s10 = inlined_call_operand.vmem [shape: f32[1,128], index: 10, kind: input, shape index: {}]   ;;  %s9435_s11 = inlined_call_operand.vmem [shape: f32[16,128], index: 11, kind: output, shape index: {}]  }
   0x1   :  { %v6342_v0 = vld [vmem:[%s9424_s1 + $0x4] ss:$24 sps:$4 sm:$0xff]   ;;  %v6344_v1 = vld [vmem:[%s9424_s1] ss:$24 sps:$4 sm:$0xff]   ;;  %v6345_v2 = vld [vmem:[%s9424_s1 + $0x34] ss:$24 sps:$4 sm:$0xff]  }
   0x2   :  { %2152 = vmatprep.subr.bf16.mxu0 %v6342_v0  ;;  %v6347_v3 = vld [vmem:[%s9424_s1 + $0x30] ss:$24 sps:$4 sm:$0xff]   ;;  %v6348_v4 = vld [vmem:[%s9424_s1 + $0x64] ss:$24 sps:$4 sm:$0xff]   ;;  %v6350_v5 = vld [vmem:[%s9424_s1 + $0x60] ss:$24 sps:$4 sm:$0xff]  }
   0x3   :  { %2153 = vmatpush1.bf16.msra.mxu0 %v6344_v1  ;;  %v6351_v6 = vld [vmem:[%s9424_s1 + $0x94] ss:$24 sps:$4 sm:$0xff]   ;;  %v6365_v8 = vld [vmem:[%s9424_s1 + $0x8] ss:$24 sps:$4 sm:$0xff]   ;;  %v6354_v10 = vld [vmem:[%s9424_s1 + $0xc4] ss:$24 sps:$4 sm:$0xff]  }
   0x4   :  { %2154 = vmatprep.subr.bf16.mxu0 %v6345_v2  ;;  %v6363_v7 = vld [vmem:[%s9424_s1 + $0xc] ss:$24 sps:$4 sm:$0xff]   ;;  %v6353_v9 = vld [vmem:[%s9424_s1 + $0x90] ss:$24 sps:$4 sm:$0xff]   ;;  %v6369_v11 = vld [vmem:[%s9424_s1 + $0x3c] ss:$24 sps:$4 sm:$0xff]  }
   0x5   :  { %2324 = vmatprep.subr.bf16.mxu1 %v6363_v7  ;;  %v6371_v12 = vld [vmem:[%s9424_s1 + $0x38] ss:$24 sps:$4 sm:$0xff]   ;;  %v6375_v14 = vld [vmem:[%s9424_s1 + $0x6c] ss:$24 sps:$4 sm:$0xff]   ;;  %v6377_v16 = vld [vmem:[%s9424_s1 + $0x68] ss:$24 sps:$4 sm:$0xff]  }
   0x6   :  { %2325 = vmatpush1.bf16.msra.mxu1 %v6365_v8  ;;  %v6356_v13 = vld [vmem:[%s9424_s1 + $0xc0] ss:$24 sps:$4 sm:$0xff]   ;;  %v6357_v15 = vld [vmem:[%s9424_s1 + $0xf4] ss:$24 sps:$4 sm:$0xff]   ;;  %v6359_v18 = vld [vmem:[%s9424_s1 + $0xf0] ss:$24 sps:$4 sm:$0xff]  }
   0x7   :  { %2155 = vmatpush1.bf16.msra.mxu0 %v6347_v3  ;;  %2326 = vmatprep.subr.bf16.mxu1 %v6369_v11  ;;  %v6381_v17 = vld [vmem:[%s9424_s1 + $0x9c] ss:$24 sps:$4 sm:$0xff]   ;;  %v6383_v20 = vld [vmem:[%s9424_s1 + $0x98] ss:$24 sps:$4 sm:$0xff]   ;;  %v6387_v21 = vld [vmem:[%s9424_s1 + $0xcc] ss:$24 sps:$4 sm:$0xff]  }
   0x8   :  { %2156 = vmatprep.subr.bf16.mxu0 %v6348_v4  ;;  %v6360_v19 = vld [vmem:[%s9424_s1 + $0x124] ss:$24 sps:$4 sm:$0xff]   ;;  %v6362_v22 = vld [vmem:[%s9424_s1 + $0x120] ss:$24 sps:$4 sm:$0xff]   ;;  %v6366_v23 = vld [vmem:[%s9424_s1 + $0x154] ss:$24 sps:$4 sm:$0xff]  }
   0x9   :  { %v6389_v24 = vld [vmem:[%s9424_s1 + $0xc8] ss:$24 sps:$4 sm:$0xff]   ;;  %v6393_v25 = vld [vmem:[%s9424_s1 + $0xfc] ss:$24 sps:$4 sm:$0xff]   ;;  %v6395_v28 = vld [vmem:[%s9424_s1 + $0xf8] ss:$24 sps:$4 sm:$0xff]  }
   0xa   :  { %2327 = vmatpush1.bf16.msra.mxu1 %v6371_v12  ;;  %v6368_v26 = vld [vmem:[%s9424_s1 + $0x150] ss:$24 sps:$4 sm:$0xff]   ;;  %v6372_v27 = vld [vmem:[%s9424_s1 + $0x184] ss:$24 sps:$4 sm:$0xff]   ;;  %v6374_v30 = vld [vmem:[%s9424_s1 + $0x180] ss:$24 sps:$4 sm:$0xff]  }
   0xb   :  { %2157 = vmatpush1.bf16.msra.mxu0 %v6350_v5  ;;  %2328 = vmatprep.subr.bf16.mxu1 %v6375_v14  ;;  %v6399_v29 = vld [vmem:[%s9424_s1 + $0x12c] ss:$24 sps:$4 sm:$0xff]   ;;  %v6401_v32 = vld [vmem:[%s9424_s1 + $0x128] ss:$24 sps:$4 sm:$0xff]   ;;  %v6405_v34 = vld [vmem:[%s9424_s1 + $0x15c] ss:$24 sps:$4 sm:$0xff]  }
   0xc   :  { %2158 = vmatprep.subr.bf16.mxu0 %v6351_v6  ;;  %v6378_v31 = vld [vmem:[%s9424_s1 + $0x1b4] ss:$24 sps:$4 sm:$0xff]   ;;  %v6380_v33 = vld [vmem:[%s9424_s1 + $0x1b0] ss:$24 sps:$4 sm:$0xff]   ;;  %v6384_v37 = vld [vmem:[%s9424_s1 + $0x1e4] ss:$24 sps:$4 sm:$0xff]  }
   0xd   :  { %v40_v35 = vld [vmem:[%s9425_s0 + $0x8] sm:$0xff]  ;;  %v6407_v39 = vld [vmem:[%s9424_s1 + $0x158] ss:$24 sps:$4 sm:$0xff]   ;;  %v6417_v44 = vld [vmem:[%s9424_s1 + $0x1bc] ss:$24 sps:$4 sm:$0xff]   ;;  %vm4946_vm4 = vcmask 130048  }
   0xe   :  { %2329 = vmatpush1.bf16.msra.mxu1 %v6377_v16  ;;  %v48_v36 = vld [vmem:[%s9425_s0 + $0x48] sm:$0xff]  ;;  %v6386_v41 = vld [vmem:[%s9424_s1 + $0x1e0] ss:$24 sps:$4 sm:$0xff]   ;;  %v6396_v46 = vld [vmem:[%s9424_s1 + $0x244] ss:$24 sps:$4 sm:$0xff]  }
   0xf   :  { %2159 = vmatpush1.bf16.msra.mxu0 %v6353_v9  ;;  %2330 = vmatprep.subr.bf16.mxu1 %v6381_v17  ;;  %v7382_v38 = vpack.c.bf16 %v48_v36, %v40_v35  ;;  %v6411_v40 = vld [vmem:[%s9424_s1 + $0x18c] ss:$24 sps:$4 sm:$0xff]   ;;  %v6413_v43 = vld [vmem:[%s9424_s1 + $0x188] ss:$24 sps:$4 sm:$0xff]   ;;  %v6419_v47 = vld [vmem:[%s9424_s1 + $0x1b8] ss:$24 sps:$4 sm:$0xff]  }
  0x10   :  { %2160 = vmatprep.subr.bf16.mxu0 %v6354_v10  ;;  %v6390_v42 = vld [vmem:[%s9424_s1 + $0x214] ss:$24 sps:$4 sm:$0xff]   ;;  %v6392_v45 = vld [vmem:[%s9424_s1 + $0x210] ss:$24 sps:$4 sm:$0xff]   ;;  %v6398_v49 = vld [vmem:[%s9424_s1 + $0x240] ss:$24 sps:$4 sm:$0xff]  }
  0x11   :  { %2184 = vmatprep.mubr.bf16.mxu0 %v7382_v38  ;;  %2356 = vmatprep.mubr.bf16.mxu1 %v7382_v38  ;;  %v6423_v48 = vld [vmem:[%s9424_s1 + $0x1ec] ss:$24 sps:$4 sm:$0xff]   ;;  %v6425_v51 = vld [vmem:[%s9424_s1 + $0x1e8] ss:$24 sps:$4 sm:$0xff]   ;;  %v6429_v52 = vld [vmem:[%s9424_s1 + $0x21c] ss:$24 sps:$4 sm:$0xff]  }
  0x12   :  { %2331 = vmatpush1.bf16.msra.mxu1 %v6383_v20  ;;  %v6402_v50 = vld [vmem:[%s9424_s1 + $0x274] ss:$24 sps:$4 sm:$0xff]   ;;  %v6404_v53 = vld [vmem:[%s9424_s1 + $0x270] ss:$24 sps:$4 sm:$0xff]   ;;  %v6408_v54 = vld [vmem:[%s9424_s1 + $0x2a4] ss:$24 sps:$4 sm:$0xff]  }
  0x13   :  { %2161 = vmatpush1.bf16.msra.mxu0 %v6356_v13  ;;  %2332 = vmatprep.subr.bf16.mxu1 %v6387_v21  ;;  %v6431_v55 = vld [vmem:[%s9424_s1 + $0x218] ss:$24 sps:$4 sm:$0xff]   ;;  %v6435_v56 = vld [vmem:[%s9424_s1 + $0x24c] ss:$24 sps:$4 sm:$0xff]   ;;  %v6437_v59 = vld [vmem:[%s9424_s1 + $0x248] ss:$24 sps:$4 sm:$0xff]  }
  0x14   :  { %2162 = vmatprep.subr.bf16.mxu0 %v6357_v15  ;;  %v6410_v57 = vld [vmem:[%s9424_s1 + $0x2a0] ss:$24 sps:$4 sm:$0xff]   ;;  %v6414_v58 = vld [vmem:[%s9424_s1 + $0x2d4] ss:$24 sps:$4 sm:$0xff]   ;;  %v6416_v60 = vld [vmem:[%s9424_s1 + $0x2d0] ss:$24 sps:$4 sm:$0xff]  }
  0x15   :  { %v6441_v61 = vld [vmem:[%s9424_s1 + $0x27c] ss:$24 sps:$4 sm:$0xff]   ;;  %v39_v62 = vld [vmem:[%s9425_s0] sm:$0xff]  ;;  %v6443_v1 = vld [vmem:[%s9424_s1 + $0x278] ss:$24 sps:$4 sm:$0xff]  }
  0x16   :  { %2333 = vmatpush1.bf16.msra.mxu1 %v6389_v24  ;;  %v47_v63 = vld [vmem:[%s9425_s0 + $0x40] sm:$0xff]  ;;  %v6428_v5 = vld [vmem:[%s9424_s1 + $0x334] ss:$24 sps:$4 sm:$0xff]   ;;  %v6426_v8 = vld [vmem:[%s9424_s1 + $0x330] ss:$24 sps:$4 sm:$0xff]  }
  0x17   :  { %2163 = vmatpush1.bf16.msra.mxu0 %v6359_v18  ;;  %2334 = vmatprep.subr.bf16.mxu1 %v6393_v25  ;;  %v6422_v0 = vld [vmem:[%s9424_s1 + $0x304] ss:$24 sps:$4 sm:$0xff]   ;;  %v7467_v2 = vpack.c.bf16 %v47_v63, %v39_v62  ;;  %v6420_v4 = vld [vmem:[%s9424_s1 + $0x300] ss:$24 sps:$4 sm:$0xff]   ;;  %v6440_v13 = vld [vmem:[%s9424_s1 + $0x394] ss:$24 sps:$4 sm:$0xff]  }
  0x18   :  { %2164 = vmatprep.subr.bf16.mxu0 %v6360_v19  ;;  %v6447_v3 = vld [vmem:[%s9424_s1 + $0x2ac] ss:$24 sps:$4 sm:$0xff]   ;;  %v6449_v6 = vld [vmem:[%s9424_s1 + $0x2a8] ss:$24 sps:$4 sm:$0xff]   ;;  %v6453_v7 = vld [vmem:[%s9424_s1 + $0x2dc] ss:$24 sps:$4 sm:$0xff]  }
  0x19   :  { %v6434_v9 = vld [vmem:[%s9424_s1 + $0x364] ss:$24 sps:$4 sm:$0xff]   ;;  %v6455_v10 = vld [vmem:[%s9424_s1 + $0x2d8] ss:$24 sps:$4 sm:$0xff]   ;;  %v6459_v14 = vld [vmem:[%s9424_s1 + $0x308] ss:$24 sps:$4 sm:$0xff]  }
  0x1a   :  { %2335 = vmatpush1.bf16.msra.mxu1 %v6395_v28  ;;  %v6461_v11 = vld [vmem:[%s9424_s1 + $0x30c] ss:$24 sps:$4 sm:$0xff]   ;;  %v6432_v12 = vld [vmem:[%s9424_s1 + $0x360] ss:$24 sps:$4 sm:$0xff]   ;;  %v6467_v15 = vld [vmem:[%s9424_s1 + $0x33c] ss:$24 sps:$4 sm:$0xff]  }
  0x1b   :  { %2165 = vmatpush1.bf16.msra.mxu0 %v6362_v22  ;;  %2336 = vmatprep.subr.bf16.mxu1 %v6399_v29  ;;  %v6438_v16 = vld [vmem:[%s9424_s1 + $0x390] ss:$24 sps:$4 sm:$0xff]   ;;  %v6446_v17 = vld [vmem:[%s9424_s1 + $0x3c4] ss:$24 sps:$4 sm:$0xff]   ;;  %v6444_v19 = vld [vmem:[%s9424_s1 + $0x3c0] ss:$24 sps:$4 sm:$0xff]  }
  0x1c   :  { %2166 = vmatprep.subr.bf16.mxu0 %v6366_v23  ;;  %v6465_v18 = vld [vmem:[%s9424_s1 + $0x338] ss:$24 sps:$4 sm:$0xff]   ;;  %v6473_v20 = vld [vmem:[%s9424_s1 + $0x36c] ss:$24 sps:$4 sm:$0xff]   ;;  %v6471_v25 = vld [vmem:[%s9424_s1 + $0x368] ss:$24 sps:$4 sm:$0xff]  }
  0x1d   :  { %v42_v21 = vld [vmem:[%s9425_s0 + $0x18] sm:$0xff]  ;;  %v6452_v23 = vld [vmem:[%s9424_s1 + $0x3f4] ss:$24 sps:$4 sm:$0xff]   ;;  %v6462_v35 = vld [vmem:[%s9424_s1 + $0x450] ss:$24 sps:$4 sm:$0xff]  }
  0x1e   :  { %2337 = vmatpush1.bf16.msra.mxu1 %v6401_v32  ;;  %v50_v22 = vld [vmem:[%s9425_s0 + $0x58] sm:$0xff]  ;;  %v6464_v32 = vld [vmem:[%s9424_s1 + $0x454] ss:$24 sps:$4 sm:$0xff]  }
  0x1f   :  { %2167 = vmatpush1.bf16.msra.mxu0 %v6368_v26  ;;  %2338 = vmatprep.subr.bf16.mxu1 %v6405_v34  ;;  %v7534_v24 = vpack.c.bf16 %v50_v22, %v42_v21  ;;  %v6479_v26 = vld [vmem:[%s9424_s1 + $0x39c] ss:$24 sps:$4 sm:$0xff]   ;;  %v6477_v29 = vld [vmem:[%s9424_s1 + $0x398] ss:$24 sps:$4 sm:$0xff]   ;;  %v6533_v63 = vld [vmem:[%s9424_s1 + $0x54c] ss:$24 sps:$4 sm:$0xff]  }
  0x20   :  { %2168 = vmatprep.subr.bf16.mxu0 %v6372_v27  ;;  %v6450_v27 = vld [vmem:[%s9424_s1 + $0x3f0] ss:$24 sps:$4 sm:$0xff]   ;;  %v6458_v28 = vld [vmem:[%s9424_s1 + $0x424] ss:$24 sps:$4 sm:$0xff]  }
  0x21   :  { %v6491_v34 = vld [vmem:[%s9424_s1 + $0x3fc] ss:$24 sps:$4 sm:$0xff]   ;;  %v6525_v62 = vld [vmem:[%s9424_s1 + $0x518] ss:$24 sps:$4 sm:$0xff]   ;;  %v6557_v22 = vld [vmem:[%s9424_s1 + $0x60c] ss:$24 sps:$4 sm:$0xff]  }
  0x22   :  { %2339 = vmatpush1.bf16.msra.mxu1 %v6407_v39  ;;  %v6470_v36 = vld [vmem:[%s9424_s1 + $0x484] ss:$24 sps:$4 sm:$0xff]   ;;  %v6549_v21 = vld [vmem:[%s9424_s1 + $0x5d8] ss:$24 sps:$4 sm:$0xff]  }
  0x23   :  { %2169 = vmatpush1.bf16.msra.mxu0 %v6374_v30  ;;  %2340 = vmatprep.subr.bf16.mxu1 %v6411_v40  ;;  %v6485_v30 = vld [vmem:[%s9424_s1 + $0x3cc] ss:$24 sps:$4 sm:$0xff]   ;;  %v6468_v40 = vld [vmem:[%s9424_s1 + $0x480] ss:$24 sps:$4 sm:$0xff]  }
  0x24   :  { %2170 = vmatprep.subr.bf16.mxu0 %v6378_v31  ;;  %v6456_v31 = vld [vmem:[%s9424_s1 + $0x420] ss:$24 sps:$4 sm:$0xff]   ;;  %v6497_v39 = vld [vmem:[%s9424_s1 + $0x42c] ss:$24 sps:$4 sm:$0xff]  }
  0x26   :  { %2341 = vmatpush1.bf16.msra.mxu1 %v6413_v43  ;;  %v6503_v43 = vld [vmem:[%s9424_s1 + $0x45c] ss:$24 sps:$4 sm:$0xff]  }
  0x27   :  { %2171 = vmatpush1.bf16.msra.mxu0 %v6380_v33  ;;  %2342 = vmatprep.subr.bf16.mxu1 %v6417_v44  ;;  %v6483_v33 = vld [vmem:[%s9424_s1 + $0x3c8] ss:$24 sps:$4 sm:$0xff]  }
  0x28   :  { %2172 = vmatprep.subr.bf16.mxu0 %v6384_v37  ;;  %v6489_v37 = vld [vmem:[%s9424_s1 + $0x3f8] ss:$24 sps:$4 sm:$0xff]  }
  0x29   :  { %v6474_v44 = vld [vmem:[%s9424_s1 + $0x4b0] ss:$24 sps:$4 sm:$0xff]  }
  0x2a   :  { %2343 = vmatpush1.bf16.msra.mxu1 %v6419_v47  ;;  %v6509_v47 = vld [vmem:[%s9424_s1 + $0x48c] ss:$24 sps:$4 sm:$0xff]  }
  0x2b   :  { %2173 = vmatpush1.bf16.msra.mxu0 %v6386_v41  ;;  %2344 = vmatprep.subr.bf16.mxu1 %v6423_v48  ;;  %v6476_v41 = vld [vmem:[%s9424_s1 + $0x4b4] ss:$24 sps:$4 sm:$0xff]   ;;  %v6480_v48 = vld [vmem:[%s9424_s1 + $0x4e0] ss:$24 sps:$4 sm:$0xff]  }
  0x2c   :  { %2174 = vmatprep.subr.bf16.mxu0 %v6390_v42  ;;  %v6495_v42 = vld [vmem:[%s9424_s1 + $0x428] ss:$24 sps:$4 sm:$0xff]  }
  0x2e   :  { %2345 = vmatpush1.bf16.msra.mxu1 %v6425_v51  ;;  %v6515_v51 = vld [vmem:[%s9424_s1 + $0x4bc] ss:$24 sps:$4 sm:$0xff]  }
  0x2f   :  { %2175 = vmatpush1.bf16.msra.mxu0 %v6392_v45  ;;  %2346 = vmatprep.subr.bf16.mxu1 %v6429_v52  ;;  %v6482_v45 = vld [vmem:[%s9424_s1 + $0x4e4] ss:$24 sps:$4 sm:$0xff]   ;;  %v6486_v52 = vld [vmem:[%s9424_s1 + $0x510] ss:$24 sps:$4 sm:$0xff]  }
  0x30   :  { %2176 = vmatprep.subr.bf16.mxu0 %v6396_v46  ;;  %v6501_v46 = vld [vmem:[%s9424_s1 + $0x458] ss:$24 sps:$4 sm:$0xff]  }
  0x32   :  { %2347 = vmatpush1.bf16.msra.mxu1 %v6431_v55  ;;  %v6521_v55 = vld [vmem:[%s9424_s1 + $0x4ec] ss:$24 sps:$4 sm:$0xff]  }
  0x33   :  { %2177 = vmatpush1.bf16.msra.mxu0 %v6398_v49  ;;  %2348 = vmatprep.subr.bf16.mxu1 %v6435_v56  ;;  %v6488_v49 = vld [vmem:[%s9424_s1 + $0x514] ss:$24 sps:$4 sm:$0xff]   ;;  %v6492_v56 = vld [vmem:[%s9424_s1 + $0x540] ss:$24 sps:$4 sm:$0xff]  }
  0x34   :  { %2178 = vmatprep.subr.bf16.mxu0 %v6402_v50  ;;  %v6507_v50 = vld [vmem:[%s9424_s1 + $0x488] ss:$24 sps:$4 sm:$0xff]  }
  0x36   :  { %2349 = vmatpush1.bf16.msra.mxu1 %v6437_v59  ;;  %v6527_v59 = vld [vmem:[%s9424_s1 + $0x51c] ss:$24 sps:$4 sm:$0xff]  }
  0x37   :  { %2179 = vmatpush1.bf16.msra.mxu0 %v6404_v53  ;;  %2350 = vmatprep.subr.bf16.mxu1 %v6441_v61  ;;  %v6494_v53 = vld [vmem:[%s9424_s1 + $0x544] ss:$24 sps:$4 sm:$0xff]  }
  0x38   :  { %2180 = vmatprep.subr.bf16.mxu0 %v6408_v54  ;;  %v6513_v54 = vld [vmem:[%s9424_s1 + $0x4b8] ss:$24 sps:$4 sm:$0xff]   ;;  %v6506_v61 = vld [vmem:[%s9424_s1 + $0x5a4] ss:$24 sps:$4 sm:$0xff]  }
  0x3a   :  { %2351 = vmatpush1.bf16.msra.mxu1 %v6443_v1  ;;  %v6512_v1 = vld [vmem:[%s9424_s1 + $0x5d4] ss:$24 sps:$4 sm:$0xff]  }
  0x3b   :  { %2181 = vmatpush1.bf16.msra.mxu0 %v6410_v57  ;;  %2352 = vmatprep.subr.bf16.mxu1 %v6447_v3  ;;  %v6500_v57 = vld [vmem:[%s9424_s1 + $0x574] ss:$24 sps:$4 sm:$0xff]   ;;  %v6531_v3 = vld [vmem:[%s9424_s1 + $0x548] ss:$24 sps:$4 sm:$0xff]  }
  0x3c   :  { %2182 = vmatprep.subr.bf16.mxu0 %v6414_v58  ;;  %v6519_v58 = vld [vmem:[%s9424_s1 + $0x4e8] ss:$24 sps:$4 sm:$0xff]  }
  0x3e   :  { %2353 = vmatpush1.bf16.msra.mxu1 %v6449_v6  ;;  %v6539_v6 = vld [vmem:[%s9424_s1 + $0x57c] ss:$24 sps:$4 sm:$0xff]  }
  0x3f   :  { %2183 = vmatpush1.bf16.msra.mxu0 %v6416_v60  ;;  %2354 = vmatprep.subr.bf16.mxu1 %v6453_v7  ;;  %v6498_v60 = vld [vmem:[%s9424_s1 + $0x570] ss:$24 sps:$4 sm:$0xff]  }
  0x40   :  { %2195 = vmatprep.subr.bf16.mxu0 %v6422_v0  ;;  %v6504_v0 = vld [vmem:[%s9424_s1 + $0x5a0] ss:$24 sps:$4 sm:$0xff]   ;;  %v49_v7 = vld [vmem:[%s9425_s0 + $0x50] sm:$0xff] }
  0x42   :  { %2185 = vmatmul.mubr.bf16.vlgmr.msra.gmra.mrb[0].mxu0 %v7467_v2  ;;  %2355 = vmatpush1.bf16.msra.mxu1 %v6455_v10  ;;  %v52_v10 = vld [vmem:[%s9425_s0 + $0x68] sm:$0xff] }
  0x43   :  { %2196 = vmatpush1.bf16.msra.mxu0 %v6420_v4  ;;  %2367 = vmatprep.subr.bf16.mxu1 %v6461_v11  ;;  %v6510_v4 = vld [vmem:[%s9424_s1 + $0x5d0] ss:$24 sps:$4 sm:$0xff]  }
  0x44   :  { %2197 = vmatprep.subr.bf16.mxu0 %v6428_v5  ;;  %2227 = vmatprep.mubr.bf16.mxu0 %v7534_v24  ;;  %v41_v5 = vld [vmem:[%s9425_s0 + $0x10] sm:$0xff] }
  0x45   :  { %2357 = vmatmul.mubr.bf16.vlgmr.msra.gmra.mrb[0].mxu1 %v7467_v2  ;;  %v6537_v11 = vld [vmem:[%s9424_s1 + $0x578] ss:$24 sps:$4 sm:$0xff]  }
  0x46   :  { %2368 = vmatpush1.bf16.msra.mxu1 %v6459_v14  ;;  %2399 = vmatprep.mubr.bf16.mxu1 %v7534_v24  ;;  %v6516_v14 = vld [vmem:[%s9424_s1 + $0x600] ss:$24 sps:$4 sm:$0xff]  }
  0x47   :  { %2198 = vmatpush1.bf16.msra.mxu0 %v6426_v8  ;;  %2369 = vmatprep.subr.bf16.mxu1 %v6467_v15  ;;  %v6518_v8 = vld [vmem:[%s9424_s1 + $0x604] ss:$24 sps:$4 sm:$0xff]  }
  0x48   :  { %2199 = vmatprep.subr.bf16.mxu0 %v6434_v9  ;;  %v44_v9 = vld [vmem:[%s9425_s0 + $0x28] sm:$0xff] }
  0x49   :  { %v7693_v15 = vpack.c.bf16 %v52_v10, %v44_v9  ;;  %v6621_v9 = vld [vmem:[%s9424_s1 + $0x818] ss:$24 sps:$4 sm:$0xff]   ;;  %v6629_v10 = vld [vmem:[%s9424_s1 + $0x84c] ss:$24 sps:$4 sm:$0xff]  }
  0x4a   :  { %2370 = vmatpush1.bf16.msra.mxu1 %v6465_v18  ;;  %v6551_v18 = vld [vmem:[%s9424_s1 + $0x5dc] ss:$24 sps:$4 sm:$0xff]  }
  0x4b   :  { %2200 = vmatpush1.bf16.msra.mxu0 %v6432_v12  ;;  %2371 = vmatprep.subr.bf16.mxu1 %v6473_v20  ;;  %v7685_v12 = vpack.c.bf16 %v49_v7, %v41_v5  ;;  %v6530_v20 = vld [vmem:[%s9424_s1 + $0x664] ss:$24 sps:$4 sm:$0xff]  }
  0x4c   :  { %2201 = vmatprep.subr.bf16.mxu0 %v6440_v13  ;;  %v6545_v13 = vld [vmem:[%s9424_s1 + $0x5ac] ss:$24 sps:$4 sm:$0xff]   ;;  %v6623_v5 = vld [vmem:[%s9424_s1 + $0x81c] ss:$24 sps:$4 sm:$0xff]  }
  0x4d   :  { %v6602_v7 = vld [vmem:[%s9424_s1 + $0x8a4] ss:$24 sps:$4 sm:$0xff]  }
  0x4e   :  { %2372 = vmatpush1.bf16.msra.mxu1 %v6471_v25  ;;  %v6536_v25 = vld [vmem:[%s9424_s1 + $0x694] ss:$24 sps:$4 sm:$0xff]  }
  0x4f   :  { %2202 = vmatpush1.bf16.msra.mxu0 %v6438_v16  ;;  %2373 = vmatprep.subr.bf16.mxu1 %v6479_v26  ;;  %v6524_v16 = vld [vmem:[%s9424_s1 + $0x634] ss:$24 sps:$4 sm:$0xff]   ;;  %v6555_v26 = vld [vmem:[%s9424_s1 + $0x608] ss:$24 sps:$4 sm:$0xff]  }
  0x50   :  { %2203 = vmatprep.subr.bf16.mxu0 %v6446_v17  ;;  %v6543_v17 = vld [vmem:[%s9424_s1 + $0x5a8] ss:$24 sps:$4 sm:$0xff]  }
  0x52   :  { %2374 = vmatpush1.bf16.msra.mxu1 %v6477_v29  ;;  %v6542_v29 = vld [vmem:[%s9424_s1 + $0x6c4] ss:$24 sps:$4 sm:$0xff]  }
  0x53   :  { %2204 = vmatpush1.bf16.msra.mxu0 %v6444_v19  ;;  %2375 = vmatprep.subr.bf16.mxu1 %v6485_v30  ;;  %v6522_v19 = vld [vmem:[%s9424_s1 + $0x630] ss:$24 sps:$4 sm:$0xff]  }
  0x54   :  { %2205 = vmatprep.subr.bf16.mxu0 %v6452_v23  ;;  %v6528_v23 = vld [vmem:[%s9424_s1 + $0x660] ss:$24 sps:$4 sm:$0xff]  }
  0x55   :  { %v6561_v30 = vld [vmem:[%s9424_s1 + $0x638] ss:$24 sps:$4 sm:$0xff]  }
  0x56   :  { %2376 = vmatpush1.bf16.msra.mxu1 %v6483_v33  ;;  %v6548_v33 = vld [vmem:[%s9424_s1 + $0x6f4] ss:$24 sps:$4 sm:$0xff]  }
  0x57   :  { %2206 = vmatpush1.bf16.msra.mxu0 %v6450_v27  ;;  %2377 = vmatprep.subr.bf16.mxu1 %v6491_v34  ;;  %v6563_v27 = vld [vmem:[%s9424_s1 + $0x63c] ss:$24 sps:$4 sm:$0xff]   ;;  %v6567_v34 = vld [vmem:[%s9424_s1 + $0x668] ss:$24 sps:$4 sm:$0xff]  }
  0x58   :  { %2207 = vmatprep.subr.bf16.mxu0 %v6458_v28  ;;  %v6534_v28 = vld [vmem:[%s9424_s1 + $0x690] ss:$24 sps:$4 sm:$0xff]  }
  0x5a   :  { %2378 = vmatpush1.bf16.msra.mxu1 %v6489_v37  ;;  %v6554_v37 = vld [vmem:[%s9424_s1 + $0x724] ss:$24 sps:$4 sm:$0xff]  }
  0x5b   :  { %2208 = vmatpush1.bf16.msra.mxu0 %v6456_v31  ;;  %2379 = vmatprep.subr.bf16.mxu1 %v6497_v39  ;;  %v6569_v31 = vld [vmem:[%s9424_s1 + $0x66c] ss:$24 sps:$4 sm:$0xff]   ;;  %v6573_v39 = vld [vmem:[%s9424_s1 + $0x698] ss:$24 sps:$4 sm:$0xff]  }
  0x5c   :  { %2209 = vmatprep.subr.bf16.mxu0 %v6464_v32  ;;  %v6540_v32 = vld [vmem:[%s9424_s1 + $0x6c0] ss:$24 sps:$4 sm:$0xff]  }
  0x5e   :  { %2380 = vmatpush1.bf16.msra.mxu1 %v6495_v42  ;;  %v6560_v42 = vld [vmem:[%s9424_s1 + $0x754] ss:$24 sps:$4 sm:$0xff]  }
  0x5f   :  { %2210 = vmatpush1.bf16.msra.mxu0 %v6462_v35  ;;  %2381 = vmatprep.subr.bf16.mxu1 %v6503_v43  ;;  %v6575_v35 = vld [vmem:[%s9424_s1 + $0x69c] ss:$24 sps:$4 sm:$0xff]   ;;  %v6579_v43 = vld [vmem:[%s9424_s1 + $0x6c8] ss:$24 sps:$4 sm:$0xff]  }
  0x60   :  { %2211 = vmatprep.subr.bf16.mxu0 %v6470_v36  ;;  %v6546_v36 = vld [vmem:[%s9424_s1 + $0x6f0] ss:$24 sps:$4 sm:$0xff]  }
  0x62   :  { %2382 = vmatpush1.bf16.msra.mxu1 %v6501_v46  ;;  %v6566_v46 = vld [vmem:[%s9424_s1 + $0x784] ss:$24 sps:$4 sm:$0xff]  }
  0x63   :  { %2212 = vmatpush1.bf16.msra.mxu0 %v6468_v40  ;;  %2383 = vmatprep.subr.bf16.mxu1 %v6509_v47  ;;  %v6581_v40 = vld [vmem:[%s9424_s1 + $0x6cc] ss:$24 sps:$4 sm:$0xff]   ;;  %v6585_v47 = vld [vmem:[%s9424_s1 + $0x6f8] ss:$24 sps:$4 sm:$0xff]  }
  0x64   :  { %2213 = vmatprep.subr.bf16.mxu0 %v6476_v41  ;;  %v6552_v41 = vld [vmem:[%s9424_s1 + $0x720] ss:$24 sps:$4 sm:$0xff]  }
  0x66   :  { %2384 = vmatpush1.bf16.msra.mxu1 %v6507_v50  ;;  %v6572_v50 = vld [vmem:[%s9424_s1 + $0x7b4] ss:$24 sps:$4 sm:$0xff]  }
  0x67   :  { %2214 = vmatpush1.bf16.msra.mxu0 %v6474_v44  ;;  %2385 = vmatprep.subr.bf16.mxu1 %v6515_v51  ;;  %v6587_v44 = vld [vmem:[%s9424_s1 + $0x6fc] ss:$24 sps:$4 sm:$0xff]   ;;  %v6591_v51 = vld [vmem:[%s9424_s1 + $0x728] ss:$24 sps:$4 sm:$0xff]  }
  0x68   :  { %2215 = vmatprep.subr.bf16.mxu0 %v6482_v45  ;;  %v6558_v45 = vld [vmem:[%s9424_s1 + $0x750] ss:$24 sps:$4 sm:$0xff]  }
  0x6a   :  { %2386 = vmatpush1.bf16.msra.mxu1 %v6513_v54  ;;  %v6578_v54 = vld [vmem:[%s9424_s1 + $0x7e4] ss:$24 sps:$4 sm:$0xff]  }
  0x6b   :  { %2216 = vmatpush1.bf16.msra.mxu0 %v6480_v48  ;;  %2387 = vmatprep.subr.bf16.mxu1 %v6521_v55  ;;  %v6593_v48 = vld [vmem:[%s9424_s1 + $0x72c] ss:$24 sps:$4 sm:$0xff]   ;;  %v6597_v55 = vld [vmem:[%s9424_s1 + $0x758] ss:$24 sps:$4 sm:$0xff]  }
  0x6c   :  { %2217 = vmatprep.subr.bf16.mxu0 %v6488_v49  ;;  %v6564_v49 = vld [vmem:[%s9424_s1 + $0x780] ss:$24 sps:$4 sm:$0xff]  }
  0x6e   :  { %2388 = vmatpush1.bf16.msra.mxu1 %v6519_v58  ;;  %v6584_v58 = vld [vmem:[%s9424_s1 + $0x814] ss:$24 sps:$4 sm:$0xff]  }
  0x6f   :  { %2218 = vmatpush1.bf16.msra.mxu0 %v6486_v52  ;;  %2389 = vmatprep.subr.bf16.mxu1 %v6527_v59  ;;  %v6599_v52 = vld [vmem:[%s9424_s1 + $0x75c] ss:$24 sps:$4 sm:$0xff]   ;;  %v6603_v59 = vld [vmem:[%s9424_s1 + $0x788] ss:$24 sps:$4 sm:$0xff]  }
  0x70   :  { %2219 = vmatprep.subr.bf16.mxu0 %v6494_v53  ;;  %v6570_v53 = vld [vmem:[%s9424_s1 + $0x7b0] ss:$24 sps:$4 sm:$0xff]  }
  0x72   :  { %2390 = vmatpush1.bf16.msra.mxu1 %v6525_v62  ;;  %v6590_v62 = vld [vmem:[%s9424_s1 + $0x844] ss:$24 sps:$4 sm:$0xff]  }
  0x73   :  { %2220 = vmatpush1.bf16.msra.mxu0 %v6492_v56  ;;  %2391 = vmatprep.subr.bf16.mxu1 %v6533_v63  ;;  %v6605_v56 = vld [vmem:[%s9424_s1 + $0x78c] ss:$24 sps:$4 sm:$0xff]   ;;  %v6609_v63 = vld [vmem:[%s9424_s1 + $0x7b8] ss:$24 sps:$4 sm:$0xff]  }
  0x74   :  { %2221 = vmatprep.subr.bf16.mxu0 %v6500_v57  ;;  %v6576_v57 = vld [vmem:[%s9424_s1 + $0x7e0] ss:$24 sps:$4 sm:$0xff]  }
  0x76   :  { %2392 = vmatpush1.bf16.msra.mxu1 %v6531_v3  ;;  %v6596_v3 = vld [vmem:[%s9424_s1 + $0x874] ss:$24 sps:$4 sm:$0xff]  }
  0x77   :  { %2222 = vmatpush1.bf16.msra.mxu0 %v6498_v60  ;;  %2393 = vmatprep.subr.bf16.mxu1 %v6539_v6  ;;  %v6611_v60 = vld [vmem:[%s9424_s1 + $0x7bc] ss:$24 sps:$4 sm:$0xff]   ;;  %v6594_v6 = vld [vmem:[%s9424_s1 + $0x870] ss:$24 sps:$4 sm:$0xff]  }
  0x78   :  { %2223 = vmatprep.subr.bf16.mxu0 %v6506_v61  ;;  %v6582_v61 = vld [vmem:[%s9424_s1 + $0x810] ss:$24 sps:$4 sm:$0xff]  }
  0x7a   :  { %2394 = vmatpush1.bf16.msra.mxu1 %v6537_v11  ;;  %v6608_v11 = vld [vmem:[%s9424_s1 + $0x8d4] ss:$24 sps:$4 sm:$0xff]  }
  0x7b   :  { %2224 = vmatpush1.bf16.msra.mxu0 %v6504_v0  ;;  %2395 = vmatprep.subr.bf16.mxu1 %v6545_v13  ;;  %v6617_v0 = vld [vmem:[%s9424_s1 + $0x7ec] ss:$24 sps:$4 sm:$0xff]   ;;  %v6627_v13 = vld [vmem:[%s9424_s1 + $0x848] ss:$24 sps:$4 sm:$0xff]  }
  0x7c   :  { %2225 = vmatprep.subr.bf16.mxu0 %v6512_v1  ;;  %v6588_v1 = vld [vmem:[%s9424_s1 + $0x840] ss:$24 sps:$4 sm:$0xff]  }
  0x7e   :  { %2396 = vmatpush1.bf16.msra.mxu1 %v6543_v17  ;;  %v43_v17 = vld [vmem:[%s9425_s0 + $0x20] sm:$0xff] }
  0x7f   :  { %2226 = vmatpush1.bf16.msra.mxu0 %v6510_v4  ;;  %2397 = vmatprep.subr.bf16.mxu1 %v6551_v18  ;;  %v6615_v4 = vld [vmem:[%s9424_s1 + $0x7e8] ss:$24 sps:$4 sm:$0xff]  }
  0x80   :  { %2238 = vmatprep.subr.bf16.mxu0 %v6518_v8  ;;  %v6600_v8 = vld [vmem:[%s9424_s1 + $0x8a0] ss:$24 sps:$4 sm:$0xff]  }
  0x81   :  { %v51_v18 = vld [vmem:[%s9425_s0 + $0x60] sm:$0xff] }
  0x82   :  { %2228 = vmatmul.mubr.bf16.vlgmr.msra.gmra.mrb[0].mxu0 %v7685_v12  ;;  %2398 = vmatpush1.bf16.msra.mxu1 %v6549_v21  ;;  %v46_v21 = vld [vmem:[%s9425_s0 + $0x38] sm:$0xff] }
  0x83   :  { %2239 = vmatpush1.bf16.msra.mxu0 %v6516_v14  ;;  %2270 = vmatprep.mubr.bf16.mxu0 %v7693_v15  ;;  %v6635_v14 = vld [vmem:[%s9424_s1 + $0x87c] ss:$24 sps:$4 sm:$0xff]  }
  0x84   :  { %2240 = vmatprep.subr.bf16.mxu0 %v6524_v16  ;;  %2410 = vmatprep.subr.bf16.mxu1 %v6557_v22  ;;  %v6606_v16 = vld [vmem:[%s9424_s1 + $0x8d0] ss:$24 sps:$4 sm:$0xff]   ;;  %v54_v22 = vld [vmem:[%s9425_s0 + $0x78] sm:$0xff] }
  0x85   :  { %2400 = vmatmul.mubr.bf16.vlgmr.msra.gmra.mrb[0].mxu1 %v7685_v12 }
  0x86   :  { %2411 = vmatpush1.bf16.msra.mxu1 %v6555_v26  ;;  %2442 = vmatprep.mubr.bf16.mxu1 %v7693_v15  ;;  %v7903_v26 = vpack.c.bf16 %v51_v18, %v43_v17  ;;  %v6677_v17 = vld [vmem:[%s9424_s1 + $0x70] ss:$24 sps:$4 sm:$0xff]   ;;  %v6683_v18 = vld [vmem:[%s9424_s1 + $0xa0] ss:$24 sps:$4 sm:$0xff]  }
  0x87   :  { %2241 = vmatpush1.bf16.msra.mxu0 %v6522_v19  ;;  %2412 = vmatprep.subr.bf16.mxu1 %v6563_v27  ;;  %v6614_v19 = vld [vmem:[%s9424_s1 + $0x904] ss:$24 sps:$4 sm:$0xff]   ;;  %v6620_v27 = vld [vmem:[%s9424_s1 + $0x934] ss:$24 sps:$4 sm:$0xff]  }
  0x88   :  { %2242 = vmatprep.subr.bf16.mxu0 %v6530_v20  ;;  %v6633_v20 = vld [vmem:[%s9424_s1 + $0x878] ss:$24 sps:$4 sm:$0xff]  }
  0x8a   :  { %2413 = vmatpush1.bf16.msra.mxu1 %v6561_v30  ;;  %v6647_v30 = vld [vmem:[%s9424_s1 + $0x8dc] ss:$24 sps:$4 sm:$0xff]  }
  0x8b   :  { %2243 = vmatpush1.bf16.msra.mxu0 %v6528_v23  ;;  %2414 = vmatprep.subr.bf16.mxu1 %v6569_v31  ;;  %v6641_v23 = vld [vmem:[%s9424_s1 + $0x8ac] ss:$24 sps:$4 sm:$0xff]   ;;  %v6618_v31 = vld [vmem:[%s9424_s1 + $0x930] ss:$24 sps:$4 sm:$0xff]  }
  0x8c   :  { %2244 = vmatprep.subr.bf16.mxu0 %v6536_v25  ;;  %v6612_v25 = vld [vmem:[%s9424_s1 + $0x900] ss:$24 sps:$4 sm:$0xff]  }
  0x8e   :  { %2415 = vmatpush1.bf16.msra.mxu1 %v6567_v34  ;;  %v6653_v34 = vld [vmem:[%s9424_s1 + $0x90c] ss:$24 sps:$4 sm:$0xff]  }
  0x8f   :  { %2245 = vmatpush1.bf16.msra.mxu0 %v6534_v28  ;;  %2416 = vmatprep.subr.bf16.mxu1 %v6575_v35  ;;  %v6639_v28 = vld [vmem:[%s9424_s1 + $0x8a8] ss:$24 sps:$4 sm:$0xff]  }
  0x90   :  { %2246 = vmatprep.subr.bf16.mxu0 %v6542_v29  ;;  %v7911_v29 = vpack.c.bf16 %v54_v22, %v46_v21  ;;  %v6624_v35 = vld [vmem:[%s9424_s1 + $0x960] ss:$24 sps:$4 sm:$0xff]   ;;  %v6697_v21 = vld [vmem:[%s9424_s1 + $0x104] ss:$24 sps:$4 sm:$0xff]  }
  0x91   :  { %v6695_v22 = vld [vmem:[%s9424_s1 + $0x100] ss:$24 sps:$4 sm:$0xff]  }
  0x92   :  { %2417 = vmatpush1.bf16.msra.mxu1 %v6573_v39  ;;  %v6659_v39 = vld [vmem:[%s9424_s1 + $0x93c] ss:$24 sps:$4 sm:$0xff]  }
  0x93   :  { %2247 = vmatpush1.bf16.msra.mxu0 %v6540_v32  ;;  %2418 = vmatprep.subr.bf16.mxu1 %v6581_v40  ;;  %v6626_v32 = vld [vmem:[%s9424_s1 + $0x964] ss:$24 sps:$4 sm:$0xff]   ;;  %v6630_v40 = vld [vmem:[%s9424_s1 + $0x990] ss:$24 sps:$4 sm:$0xff]  }
  0x94   :  { %2248 = vmatprep.subr.bf16.mxu0 %v6548_v33  ;;  %v6645_v33 = vld [vmem:[%s9424_s1 + $0x8d8] ss:$24 sps:$4 sm:$0xff]  }
  0x96   :  { %2419 = vmatpush1.bf16.msra.mxu1 %v6579_v43  ;;  %v6664_v43 = vld [vmem:[%s9424_s1 + $0x96c] ss:$24 sps:$4 sm:$0xff]  }
  0x97   :  { %2249 = vmatpush1.bf16.msra.mxu0 %v6546_v36  ;;  %2420 = vmatprep.subr.bf16.mxu1 %v6587_v44  ;;  %v6632_v36 = vld [vmem:[%s9424_s1 + $0x994] ss:$24 sps:$4 sm:$0xff]   ;;  %v6636_v44 = vld [vmem:[%s9424_s1 + $0x9c0] ss:$24 sps:$4 sm:$0xff]  }
  0x98   :  { %2250 = vmatprep.subr.bf16.mxu0 %v6554_v37  ;;  %v6651_v37 = vld [vmem:[%s9424_s1 + $0x908] ss:$24 sps:$4 sm:$0xff]  }
  0x9a   :  { %2421 = vmatpush1.bf16.msra.mxu1 %v6585_v47  ;;  %v6670_v47 = vld [vmem:[%s9424_s1 + $0x99c] ss:$24 sps:$4 sm:$0xff]  }
  0x9b   :  { %2251 = vmatpush1.bf16.msra.mxu0 %v6552_v41  ;;  %2422 = vmatprep.subr.bf16.mxu1 %v6593_v48  ;;  %v6638_v41 = vld [vmem:[%s9424_s1 + $0x9c4] ss:$24 sps:$4 sm:$0xff]   ;;  %v6642_v48 = vld [vmem:[%s9424_s1 + $0x9f0] ss:$24 sps:$4 sm:$0xff]  }
  0x9c   :  { %2252 = vmatprep.subr.bf16.mxu0 %v6560_v42  ;;  %v6657_v42 = vld [vmem:[%s9424_s1 + $0x938] ss:$24 sps:$4 sm:$0xff]  }
  0x9e   :  { %2423 = vmatpush1.bf16.msra.mxu1 %v6591_v51  ;;  %v6676_v51 = vld [vmem:[%s9424_s1 + $0x9cc] ss:$24 sps:$4 sm:$0xff]  }
  0x9f   :  { %2253 = vmatpush1.bf16.msra.mxu0 %v6558_v45  ;;  %2424 = vmatprep.subr.bf16.mxu1 %v6599_v52  ;;  %v6644_v45 = vld [vmem:[%s9424_s1 + $0x9f4] ss:$24 sps:$4 sm:$0xff]   ;;  %v6648_v52 = vld [vmem:[%s9424_s1 + $0xa20] ss:$24 sps:$4 sm:$0xff]  }
  0xa0   :  { %2254 = vmatprep.subr.bf16.mxu0 %v6566_v46  ;;  %v6662_v46 = vld [vmem:[%s9424_s1 + $0x968] ss:$24 sps:$4 sm:$0xff]  }
  0xa2   :  { %2425 = vmatpush1.bf16.msra.mxu1 %v6597_v55  ;;  %v6674_v55 = vld [vmem:[%s9424_s1 + $0x9c8] ss:$24 sps:$4 sm:$0xff]  }
  0xa3   :  { %2255 = vmatpush1.bf16.msra.mxu0 %v6564_v49  ;;  %2426 = vmatprep.subr.bf16.mxu1 %v6605_v56  ;;  %v6650_v49 = vld [vmem:[%s9424_s1 + $0xa24] ss:$24 sps:$4 sm:$0xff]  }
  0xa4   :  { %2256 = vmatprep.subr.bf16.mxu0 %v6572_v50  ;;  %v6668_v50 = vld [vmem:[%s9424_s1 + $0x998] ss:$24 sps:$4 sm:$0xff]   ;;  %v6682_v56 = vld [vmem:[%s9424_s1 + $0x9fc] ss:$24 sps:$4 sm:$0xff]  }
  0xa6   :  { %2427 = vmatpush1.bf16.msra.mxu1 %v6603_v59 }
  0xa7   :  { %2257 = vmatpush1.bf16.msra.mxu0 %v6570_v53  ;;  %2428 = vmatprep.subr.bf16.mxu1 %v6611_v60  ;;  %v6656_v53 = vld [vmem:[%s9424_s1 + $0xa54] ss:$24 sps:$4 sm:$0xff]   ;;  %v6680_v60 = vld [vmem:[%s9424_s1 + $0x9f8] ss:$24 sps:$4 sm:$0xff]  }
  0xa8   :  { %2258 = vmatprep.subr.bf16.mxu0 %v6578_v54  ;;  %v399_v54 = vld [vmem:[%s9424_s1 + $0xa80] sm:$0x33] }
  0xa9   :  { %v5863_v59 = vcombine.low %v399_v54, %v399_v54 }
  0xaa   :  { %2429 = vmatpush1.bf16.msra.mxu1 %v6609_v63  ;;  %v53_v63 = vld [vmem:[%s9425_s0 + $0x70] sm:$0xff] }
  0xab   :  { %2259 = vmatpush1.bf16.msra.mxu0 %v6576_v57  ;;  %2430 = vmatprep.subr.bf16.mxu1 %v6617_v0  ;;  %v6654_v57 = vld [vmem:[%s9424_s1 + $0xa50] ss:$24 sps:$4 sm:$0xff]   ;;  %v2135_v0 = vsel %vm2133_vm1, %v5863_v59, 0  ;;  %v6744_v59 = vld [vmem:[%s9424_s1 + $0x3d4] ss:$24 sps:$4 sm:$0xff]  }
  0xac   :  { %2260 = vmatprep.subr.bf16.mxu0 %v6584_v58  ;;  %v5864_v58 = vcombine.high %v399_v54, %v399_v54  ;;  %v6831_v54 = vld [vmem:[%s9426_s3 + $0x48] sm:$0xff]  }
  0xae   :  { %2431 = vmatpush1.bf16.msra.mxu1 %v6615_v4 }
  0xaf   :  { %2261 = vmatpush1.bf16.msra.mxu0 %v6582_v61  ;;  %2432 = vmatprep.subr.bf16.mxu1 %v6623_v5  ;;  %v6688_v61 = vld [vmem:[%s9424_s1 + $0xa2c] ss:$24 sps:$4 sm:$0xff]   ;;  %v6694_v5 = vld [vmem:[%s9424_s1 + $0xa5c] ss:$24 sps:$4 sm:$0xff]  }
  0xb0   :  { %2262 = vmatprep.subr.bf16.mxu0 %v6590_v62  ;;  %v45_v62 = vld [vmem:[%s9425_s0 + $0x30] sm:$0xff] }
  0xb1   :  { %v8020_v4 = vpack.c.bf16 %v53_v63, %v45_v62  ;;  %v6742_v62 = vld [vmem:[%s9424_s1 + $0x3d0] ss:$24 sps:$4 sm:$0xff]   ;;  %v6747_v63 = vld [vmem:[%s9424_s1 + $0x404] ss:$24 sps:$4 sm:$0xff]  }
  0xb2   :  { %2433 = vmatpush1.bf16.msra.mxu1 %v6621_v9  ;;  %v6692_v9 = vld [vmem:[%s9424_s1 + $0xa58] ss:$24 sps:$4 sm:$0xff]  }
  0xb3   :  { %2263 = vmatpush1.bf16.msra.mxu0 %v6588_v1  ;;  %2434 = vmatprep.subr.bf16.mxu1 %v6629_v10  ;;  %v6667_v1 = vld [vmem:[%s9424_s1 + $0x14] ss:$24 sps:$4 sm:$0xff]  }
  0xb4   :  { %2264 = vmatprep.subr.bf16.mxu0 %v6596_v3  ;;  %v6686_v3 = vld [vmem:[%s9424_s1 + $0xa28] ss:$24 sps:$4 sm:$0xff]  }
  0xb6   :  { %2435 = vmatpush1.bf16.msra.mxu1 %v6627_v13  ;;  %v6671_v13 = vld [vmem:[%s9424_s1 + $0x40] ss:$24 sps:$4 sm:$0xff]  }
  0xb7   :  { %2265 = vmatpush1.bf16.msra.mxu0 %v6594_v6  ;;  %2436 = vmatprep.subr.bf16.mxu1 %v6635_v14  ;;  %v6665_v6 = vld [vmem:[%s9424_s1 + $0x10] ss:$24 sps:$4 sm:$0xff]   ;;  %v6679_v14 = vld [vmem:[%s9424_s1 + $0x74] ss:$24 sps:$4 sm:$0xff]  }
  0xb8   :  { %2266 = vmatprep.subr.bf16.mxu0 %v6602_v7  ;;  %v400_v7 = vld [vmem:[%s9424_s1 + $0xa88] sm:$0x33] }
  0xb9   :  { %v5866_v10 = vcombine.high %v400_v7, %v400_v7 }
  0xba   :  { %2437 = vmatpush1.bf16.msra.mxu1 %v6633_v20  ;;  %v6689_v20 = vld [vmem:[%s9424_s1 + $0xd0] ss:$24 sps:$4 sm:$0xff]  }
  0xbb   :  { %2267 = vmatpush1.bf16.msra.mxu0 %v6600_v8  ;;  %2438 = vmatprep.subr.bf16.mxu1 %v6641_v23  ;;  %v6673_v8 = vld [vmem:[%s9424_s1 + $0x44] ss:$24 sps:$4 sm:$0xff]   ;;  %v6702_v23 = vld [vmem:[%s9424_s1 + $0x134] ss:$24 sps:$4 sm:$0xff]  }
  0xbc   :  { %2268 = vmatprep.subr.bf16.mxu0 %v6608_v11  ;;  %v5865_v11 = vcombine.low %v400_v7, %v400_v7  ;;  %v6855_v7 = vld [vmem:[%s9426_s3 + $0x28] sm:$0xff]  }
  0xbe   :  { %2439 = vmatpush1.bf16.msra.mxu1 %v6639_v28  ;;  %v6703_v28 = vld [vmem:[%s9424_s1 + $0x160] ss:$24 sps:$4 sm:$0xff]  }
  0xbf   :  { %2269 = vmatpush1.bf16.msra.mxu0 %v6606_v16  ;;  %2440 = vmatprep.subr.bf16.mxu1 %v6647_v30  ;;  %v2141_v16 = vsel %vm2133_vm1, %v5865_v11, 0  ;;  %v6708_v30 = vld [vmem:[%s9424_s1 + $0x194] ss:$24 sps:$4 sm:$0xff]  }
  0xc0   :  { %2281 = vmatprep.subr.bf16.mxu0 %v6614_v19  ;;  %v6691_v19 = vld [vmem:[%s9424_s1 + $0xd4] ss:$24 sps:$4 sm:$0xff]  }
  0xc1   :  { %v6860_v11 = vld [vmem:[%s9426_s3 + $0x30] sm:$0xff]  }
  0xc2   :  { %2271 = vmatmul.mubr.bf16.vlgmr.msra.gmra.mrb[0].mxu0 %v7903_v26  ;;  %2441 = vmatpush1.bf16.msra.mxu1 %v6645_v33  ;;  %v6709_v33 = vld [vmem:[%s9424_s1 + $0x1c0] ss:$24 sps:$4 sm:$0xff]  }
  0xc3   :  { %2282 = vmatpush1.bf16.msra.mxu0 %v6612_v25  ;;  %5870 = vmatprep.mubr.msk.bf16.mxu0 %vm2129_vm0, %v7911_v29  ;;  %v6700_v25 = vld [vmem:[%s9424_s1 + $0x130] ss:$24 sps:$4 sm:$0xff]  }
  0xc4   :  { %2283 = vmatprep.subr.bf16.mxu0 %v6620_v27  ;;  %2453 = vmatprep.subr.bf16.mxu1 %v6653_v34  ;;  %v6705_v27 = vld [vmem:[%s9424_s1 + $0x164] ss:$24 sps:$4 sm:$0xff]   ;;  %v6714_v34 = vld [vmem:[%s9424_s1 + $0x1f4] ss:$24 sps:$4 sm:$0xff]  }
  0xc5   :  { %2443 = vmatmul.mubr.bf16.vlgmr.msra.gmra.mrb[0].mxu1 %v7903_v26 }
  0xc6   :  { %2454 = vmatpush1.bf16.msra.mxu1 %v6651_v37  ;;  %5872 = vmatprep.mubr.msk.bf16.mxu1 %vm2129_vm0, %v7911_v29  ;;  %v6715_v37 = vld [vmem:[%s9424_s1 + $0x220] ss:$24 sps:$4 sm:$0xff]  }
  0xc7   :  { %2284 = vmatpush1.bf16.msra.mxu0 %v6618_v31  ;;  %2455 = vmatprep.subr.bf16.mxu1 %v6659_v39  ;;  %v6706_v31 = vld [vmem:[%s9424_s1 + $0x190] ss:$24 sps:$4 sm:$0xff]   ;;  %v6720_v39 = vld [vmem:[%s9424_s1 + $0x254] ss:$24 sps:$4 sm:$0xff]  }
  0xc8   :  { %2285 = vmatprep.subr.bf16.mxu0 %v6626_v32  ;;  %v6711_v32 = vld [vmem:[%s9424_s1 + $0x1c4] ss:$24 sps:$4 sm:$0xff]  }
  0xca   :  { %2456 = vmatpush1.bf16.msra.mxu1 %v6657_v42  ;;  %v6721_v42 = vld [vmem:[%s9424_s1 + $0x280] ss:$24 sps:$4 sm:$0xff]  }
  0xcb   :  { %2286 = vmatpush1.bf16.msra.mxu0 %v6624_v35  ;;  %2457 = vmatprep.subr.bf16.mxu1 %v6664_v43  ;;  %v6712_v35 = vld [vmem:[%s9424_s1 + $0x1f0] ss:$24 sps:$4 sm:$0xff]   ;;  %v6726_v43 = vld [vmem:[%s9424_s1 + $0x2b4] ss:$24 sps:$4 sm:$0xff]  }
  0xcc   :  { %2287 = vmatprep.subr.bf16.mxu0 %v6632_v36  ;;  %v6717_v36 = vld [vmem:[%s9424_s1 + $0x224] ss:$24 sps:$4 sm:$0xff]  }
  0xce   :  { %2458 = vmatpush1.bf16.msra.mxu1 %v6662_v46  ;;  %v6727_v46 = vld [vmem:[%s9424_s1 + $0x2e0] ss:$24 sps:$4 sm:$0xff]  }
  0xcf   :  { %2288 = vmatpush1.bf16.msra.mxu0 %v6630_v40  ;;  %2459 = vmatprep.subr.bf16.mxu1 %v6670_v47  ;;  %v6718_v40 = vld [vmem:[%s9424_s1 + $0x250] ss:$24 sps:$4 sm:$0xff]   ;;  %v6732_v47 = vld [vmem:[%s9424_s1 + $0x314] ss:$24 sps:$4 sm:$0xff]  }
  0xd0   :  { %2289 = vmatprep.subr.bf16.mxu0 %v6638_v41  ;;  %v6723_v41 = vld [vmem:[%s9424_s1 + $0x284] ss:$24 sps:$4 sm:$0xff]  }
  0xd2   :  { %2460 = vmatpush1.bf16.msra.mxu1 %v6668_v50  ;;  %v6735_v50 = vld [vmem:[%s9424_s1 + $0x344] ss:$24 sps:$4 sm:$0xff]  }
  0xd3   :  { %2290 = vmatpush1.bf16.msra.mxu0 %v6636_v44  ;;  %2461 = vmatprep.subr.bf16.mxu1 %v6676_v51  ;;  %v6724_v44 = vld [vmem:[%s9424_s1 + $0x2b0] ss:$24 sps:$4 sm:$0xff]   ;;  %v6830_v51 = vld [vmem:[%s9426_s3] sm:$0xff]  }
  0xd4   :  { %2291 = vmatprep.subr.bf16.mxu0 %v6644_v45  ;;  %v6729_v45 = vld [vmem:[%s9424_s1 + $0x2e4] ss:$24 sps:$4 sm:$0xff]  }
  0xd6   :  { %2462 = vmatpush1.bf16.msra.mxu1 %v6674_v55  ;;  %v6736_v55 = vld [vmem:[%s9424_s1 + $0x370] ss:$24 sps:$4 sm:$0xff]  }
  0xd7   :  { %2292 = vmatpush1.bf16.msra.mxu0 %v6642_v48  ;;  %2463 = vmatprep.subr.bf16.mxu1 %v6682_v56  ;;  %v6730_v48 = vld [vmem:[%s9424_s1 + $0x310] ss:$24 sps:$4 sm:$0xff]  }
  0xd8   :  { %2293 = vmatprep.subr.bf16.mxu0 %v6650_v49  ;;  %v6826_v49 = vld [vmem:[%s9426_s3 + $0x40] sm:$0xff]   ;;  %v6836_v56 = vld [vmem:[%s9426_s3 + $0x50] sm:$0xff]  }
  0xda   :  { %2464 = vmatpush1.bf16.msra.mxu1 %v6680_v60  ;;  %v6841_v60 = vld [vmem:[%s9426_s3 + $0x58] sm:$0xff]  }
  0xdb   :  { %2294 = vmatpush1.bf16.msra.mxu0 %v6648_v52  ;;  %2465 = vmatprep.subr.bf16.mxu1 %v6688_v61  ;;  %v6733_v52 = vld [vmem:[%s9424_s1 + $0x340] ss:$24 sps:$4 sm:$0xff]  }
  0xdc   :  { %2295 = vmatprep.subr.bf16.mxu0 %v6656_v53  ;;  %v6738_v53 = vld [vmem:[%s9424_s1 + $0x374] ss:$24 sps:$4 sm:$0xff]   ;;  %v6845_v61 = vld [vmem:[%s9426_s3 + $0x18] sm:$0xff]  }
  0xde   :  { %2466 = vmatpush1.bf16.msra.mxu1 %v6686_v3  ;;  %v6745_v3 = vld [vmem:[%s9424_s1 + $0x400] ss:$24 sps:$4 sm:$0xff]  }
  0xdf   :  { %2296 = vmatpush1.bf16.msra.mxu0 %v6654_v57  ;;  %2467 = vmatprep.subr.bf16.mxu1 %v6694_v5  ;;  %v6840_v57 = vld [vmem:[%s9426_s3 + $0x10] sm:$0xff]   ;;  %v6851_v5 = vld [vmem:[%s9426_s3 + $0x68] sm:$0xff]  }
  0xe0   :  { %5869 = vmatprep.subr.msk.bf16.mxu0 %vm2133_vm1, %v5864_v58  ;;  %v6739_v58 = vld [vmem:[%s9424_s1 + $0x3a0] ss:$24 sps:$4 sm:$0xff]  }
  0xe2   :  { %2468 = vmatpush1.bf16.msra.mxu1 %v6692_v9  ;;  %v6856_v9 = vld [vmem:[%s9426_s3 + $0x70] sm:$0xff]  }
  0xe3   :  { %2298 = vmatpush1.bf16.msra.mxu0 %v2135_v0  ;;  %5871 = vmatprep.subr.msk.bf16.mxu1 %vm2133_vm1, %v5866_v10  ;;  %v6846_v0 = vld [vmem:[%s9426_s3 + $0x60] sm:$0xff]  }
  0xe4   :  { %2496 = vmatprep.subr.bf16.mxu0 %v6667_v1  ;;  %v6850_v1 = vld [vmem:[%s9426_s3 + $0x20] sm:$0xff]  }
  0xe5   :  { %v6753_v10 = vld [vmem:[%s9424_s1 + $0x464] ss:$24 sps:$4 sm:$0xff]  }
  0xe6   :  { %2314 = vmatmul.mubr.bf16.vlgmr.msra.gmra.mrb[0].mxu0 %v8020_v4  ;;  %2470 = vmatpush1.bf16.msra.mxu1 %v2141_v16  ;;  %v6756_v16 = vld [vmem:[%s9424_s1 + $0x494] ss:$24 sps:$4 sm:$0xff]  }
  0xe7   :  { %2497 = vmatpush1.bf16.msra.mxu0 %v6665_v6  ;;  %2528 = vmatprep.mubr.bf16.mxu0 %v7382_v38  ;;  %v6685_v38 = vld [vmem:[%s9424_s1 + $0xa4] ss:$24 sps:$4 sm:$0xff]   ;;  %v6750_v6 = vld [vmem:[%s9424_s1 + $0x434] ss:$24 sps:$4 sm:$0xff]  }
  0xe8   :  { %2498 = vmatprep.subr.bf16.mxu0 %v6673_v8  ;;  %6163 = vmatprep.subr.bf16.mxu1 %v6826_v49  ;;  %v6748_v8 = vld [vmem:[%s9424_s1 + $0x430] ss:$24 sps:$4 sm:$0xff]   ;;  %v6801_v49 = vld [vmem:[%s9424_s1 + $0x764] ss:$24 sps:$4 sm:$0xff]  }
  0xe9   :  { %2486 = vmatmul.mubr.bf16.vlgmr.msra.gmra.mrb[0].mxu1 %v8020_v4 }
  0xea   :  { %6164 = vmatpush3.bf16.msra.mxu1 %v6830_v51  ;;  %v6804_v51 = vld [vmem:[%s9424_s1 + $0x794] ss:$24 sps:$4 sm:$0xff]  }
  0xeb   :  { %2499 = vmatpush1.bf16.msra.mxu0 %v6671_v13  ;;  %6165 = vmatprep.subr.bf16.mxu1 %v6831_v54  ;;  %v6751_v13 = vld [vmem:[%s9424_s1 + $0x460] ss:$24 sps:$4 sm:$0xff]  }
  0xec   :  { %2500 = vmatprep.subr.bf16.mxu0 %v6679_v14  ;;  %v6861_v14 = vld [vmem:[%s9426_s3 + $0x78] sm:$0xff]  }
  0xed   :  { %v6805_v54 = vld [vmem:[%s9424_s1 + $0x7c0] ss:$24 sps:$4 sm:$0xff]  }
  0xef   :  { %2501 = vmatpush1.bf16.msra.mxu0 %v6677_v17  ;;  %v6865_v17 = vld [vmem:[%s9426_s3 + $0x38] sm:$0xff]  }
  0xf0   :  { %2502 = vmatprep.subr.bf16.mxu0 %v6685_v38  ;;  %v6754_v38 = vld [vmem:[%s9424_s1 + $0x490] ss:$24 sps:$4 sm:$0xff]  }
  0xf3   :  { %2503 = vmatpush1.bf16.msra.mxu0 %v6683_v18  ;;  %v6866_v18 = vld [vmem:[%s9426_s3 + $0xc0] sm:$0xff]  }
  0xf4   :  { %2504 = vmatprep.subr.bf16.mxu0 %v6691_v19  ;;  %v6759_v19 = vld [vmem:[%s9424_s1 + $0x4c4] ss:$24 sps:$4 sm:$0xff]  }
  0xf7   :  { %2505 = vmatpush1.bf16.msra.mxu0 %v6689_v20  ;;  %v6757_v20 = vld [vmem:[%s9424_s1 + $0x4c0] ss:$24 sps:$4 sm:$0xff]  }
  0xf8   :  { %2506 = vmatprep.subr.bf16.mxu0 %v6697_v21  ;;  %v6762_v21 = vld [vmem:[%s9424_s1 + $0x4f4] ss:$24 sps:$4 sm:$0xff]  }
  0xfb   :  { %2507 = vmatpush1.bf16.msra.mxu0 %v6695_v22  ;;  %v6760_v22 = vld [vmem:[%s9424_s1 + $0x4f0] ss:$24 sps:$4 sm:$0xff]  }
  0xfc   :  { %2508 = vmatprep.subr.bf16.mxu0 %v6702_v23  ;;  %v6765_v23 = vld [vmem:[%s9424_s1 + $0x524] ss:$24 sps:$4 sm:$0xff]  }
  0xff   :  { %2509 = vmatpush1.bf16.msra.mxu0 %v6700_v25  ;;  %v6763_v25 = vld [vmem:[%s9424_s1 + $0x520] ss:$24 sps:$4 sm:$0xff]  }
 0x100   :  { %2510 = vmatprep.subr.bf16.mxu0 %v6705_v27  ;;  %v6768_v27 = vld [vmem:[%s9424_s1 + $0x554] ss:$24 sps:$4 sm:$0xff]  }
 0x103   :  { %2511 = vmatpush1.bf16.msra.mxu0 %v6703_v28  ;;  %v6766_v28 = vld [vmem:[%s9424_s1 + $0x550] ss:$24 sps:$4 sm:$0xff]  }
 0x104   :  { %2512 = vmatprep.subr.bf16.mxu0 %v6708_v30  ;;  %v6771_v30 = vld [vmem:[%s9424_s1 + $0x584] ss:$24 sps:$4 sm:$0xff]  }
 0x107   :  { %2513 = vmatpush1.bf16.msra.mxu0 %v6706_v31  ;;  %v6769_v31 = vld [vmem:[%s9424_s1 + $0x580] ss:$24 sps:$4 sm:$0xff]  }
 0x108   :  { %2514 = vmatprep.subr.bf16.mxu0 %v6711_v32  ;;  %v6774_v32 = vld [vmem:[%s9424_s1 + $0x5b4] ss:$24 sps:$4 sm:$0xff]  }
 0x10b   :  { %2515 = vmatpush1.bf16.msra.mxu0 %v6709_v33  ;;  %v6772_v33 = vld [vmem:[%s9424_s1 + $0x5b0] ss:$24 sps:$4 sm:$0xff]  }
 0x10c   :  { %2516 = vmatprep.subr.bf16.mxu0 %v6714_v34  ;;  %v6777_v34 = vld [vmem:[%s9424_s1 + $0x5e4] ss:$24 sps:$4 sm:$0xff]  }
 0x10f   :  { %2517 = vmatpush1.bf16.msra.mxu0 %v6712_v35  ;;  %v6775_v35 = vld [vmem:[%s9424_s1 + $0x5e0] ss:$24 sps:$4 sm:$0xff]  }
 0x110   :  { %2518 = vmatprep.subr.bf16.mxu0 %v6717_v36  ;;  %v6780_v36 = vld [vmem:[%s9424_s1 + $0x614] ss:$24 sps:$4 sm:$0xff]  }
 0x113   :  { %2519 = vmatpush1.bf16.msra.mxu0 %v6715_v37  ;;  %v6778_v37 = vld [vmem:[%s9424_s1 + $0x610] ss:$24 sps:$4 sm:$0xff]  }
 0x114   :  { %2520 = vmatprep.subr.bf16.mxu0 %v6720_v39  ;;  %v6783_v39 = vld [vmem:[%s9424_s1 + $0x644] ss:$24 sps:$4 sm:$0xff]  }
 0x117   :  { %2521 = vmatpush1.bf16.msra.mxu0 %v6718_v40  ;;  %v6781_v40 = vld [vmem:[%s9424_s1 + $0x640] ss:$24 sps:$4 sm:$0xff]  }
 0x118   :  { %2522 = vmatprep.subr.bf16.mxu0 %v6723_v41  ;;  %v6786_v41 = vld [vmem:[%s9424_s1 + $0x674] ss:$24 sps:$4 sm:$0xff]  }
 0x11b   :  { %2523 = vmatpush1.bf16.msra.mxu0 %v6721_v42  ;;  %v6784_v42 = vld [vmem:[%s9424_s1 + $0x670] ss:$24 sps:$4 sm:$0xff]  }
 0x11c   :  { %2524 = vmatprep.subr.bf16.mxu0 %v6726_v43  ;;  %v6792_v43 = vld [vmem:[%s9424_s1 + $0x6d4] ss:$24 sps:$4 sm:$0xff]  }
 0x11f   :  { %2525 = vmatpush1.bf16.msra.mxu0 %v6724_v44  ;;  %v6790_v44 = vld [vmem:[%s9424_s1 + $0x6d0] ss:$24 sps:$4 sm:$0xff]  }
 0x120   :  { %2526 = vmatprep.subr.bf16.mxu0 %v6729_v45  ;;  %v6795_v45 = vld [vmem:[%s9424_s1 + $0x704] ss:$24 sps:$4 sm:$0xff]  }
 0x123   :  { %2527 = vmatpush1.bf16.msra.mxu0 %v6727_v46  ;;  %v6793_v46 = vld [vmem:[%s9424_s1 + $0x700] ss:$24 sps:$4 sm:$0xff]  }
 0x124   :  { %2539 = vmatprep.subr.bf16.mxu0 %v6732_v47  ;;  %v6798_v47 = vld [vmem:[%s9424_s1 + $0x734] ss:$24 sps:$4 sm:$0xff]  }
 0x126   :  { %2529 = vmatmul.mubr.bf16.vlgmr.msra.gmra.mrb[4].mxu0 %v7467_v2  ;;  %v6835_v2 = vld [vmem:[%s9426_s3 + $0x8] sm:$0xff]  }
 0x127   :  { %2540 = vmatpush1.bf16.msra.mxu0 %v6730_v48  ;;  %2571 = vmatprep.mubr.bf16.mxu0 %v7534_v24  ;;  %v6741_v24 = vld [vmem:[%s9424_s1 + $0x3a4] ss:$24 sps:$4 sm:$0xff]   ;;  %v6796_v48 = vld [vmem:[%s9424_s1 + $0x730] ss:$24 sps:$4 sm:$0xff]  }
 0x128   :  { %2541 = vmatprep.subr.bf16.mxu0 %v6735_v50  ;;  %6166 = vmatpush3.bf16.msra.mxu1 %v6835_v2  ;;  %v6799_v50 = vld [vmem:[%s9424_s1 + $0x760] ss:$24 sps:$4 sm:$0xff]   ;;  %v6810_v2 = vld [vmem:[%s9424_s1 + $0x7f4] ss:$24 sps:$4 sm:$0xff]  }
 0x129   :  { %6167 = vmatprep.subr.bf16.mxu1 %v6836_v56  ;;  %v6811_v56 = vld [vmem:[%s9424_s1 + $0x820] ss:$24 sps:$4 sm:$0xff]  }
 0x12b   :  { %2542 = vmatpush1.bf16.msra.mxu0 %v6733_v52  ;;  %v6802_v52 = vld [vmem:[%s9424_s1 + $0x790] ss:$24 sps:$4 sm:$0xff]  }
 0x12c   :  { %2543 = vmatprep.subr.bf16.mxu0 %v6738_v53  ;;  %6168 = vmatpush3.bf16.msra.mxu1 %v6840_v57  ;;  %v6807_v53 = vld [vmem:[%s9424_s1 + $0x7c4] ss:$24 sps:$4 sm:$0xff]   ;;  %v6816_v57 = vld [vmem:[%s9424_s1 + $0x854] ss:$24 sps:$4 sm:$0xff]  }
 0x12d   :  { %6169 = vmatprep.subr.bf16.mxu1 %v6841_v60  ;;  %v6817_v60 = vld [vmem:[%s9424_s1 + $0x880] ss:$24 sps:$4 sm:$0xff]  }
 0x12f   :  { %2544 = vmatpush1.bf16.msra.mxu0 %v6736_v55  ;;  %v6808_v55 = vld [vmem:[%s9424_s1 + $0x7f0] ss:$24 sps:$4 sm:$0xff]  }
 0x130   :  { %2545 = vmatprep.subr.bf16.mxu0 %v6741_v24  ;;  %6170 = vmatpush3.bf16.msra.mxu1 %v6845_v61  ;;  %v6813_v24 = vld [vmem:[%s9424_s1 + $0x824] ss:$24 sps:$4 sm:$0xff]   ;;  %v6822_v61 = vld [vmem:[%s9424_s1 + $0x8b4] ss:$24 sps:$4 sm:$0xff]  }
 0x131   :  { %6171 = vmatprep.subr.bf16.mxu1 %v6846_v0  ;;  %v6823_v0 = vld [vmem:[%s9424_s1 + $0x8e0] ss:$24 sps:$4 sm:$0xff]  }
 0x133   :  { %2546 = vmatpush1.bf16.msra.mxu0 %v6739_v58  ;;  %v6814_v58 = vld [vmem:[%s9424_s1 + $0x850] ss:$24 sps:$4 sm:$0xff]  }
 0x134   :  { %2547 = vmatprep.subr.bf16.mxu0 %v6744_v59  ;;  %6172 = vmatpush3.bf16.msra.mxu1 %v6850_v1  ;;  %v6819_v59 = vld [vmem:[%s9424_s1 + $0x884] ss:$24 sps:$4 sm:$0xff]   ;;  %v6829_v1 = vld [vmem:[%s9424_s1 + $0x914] ss:$24 sps:$4 sm:$0xff]  }
 0x135   :  { %6173 = vmatprep.subr.bf16.mxu1 %v6851_v5  ;;  %v6834_v5 = vld [vmem:[%s9424_s1 + $0x944] ss:$24 sps:$4 sm:$0xff]  }
 0x137   :  { %2548 = vmatpush1.bf16.msra.mxu0 %v6742_v62  ;;  %v6820_v62 = vld [vmem:[%s9424_s1 + $0x8b0] ss:$24 sps:$4 sm:$0xff]  }
 0x138   :  { %2549 = vmatprep.subr.bf16.mxu0 %v6747_v63  ;;  %6174 = vmatpush3.bf16.msra.mxu1 %v6855_v7  ;;  %v6825_v63 = vld [vmem:[%s9424_s1 + $0x8e4] ss:$24 sps:$4 sm:$0xff]   ;;  %v6839_v7 = vld [vmem:[%s9424_s1 + $0x974] ss:$24 sps:$4 sm:$0xff]  }
 0x139   :  { %6175 = vmatprep.subr.bf16.mxu1 %v6856_v9  ;;  %v6837_v9 = vld [vmem:[%s9424_s1 + $0x970] ss:$24 sps:$4 sm:$0xff]  }
 0x13b   :  { %2550 = vmatpush1.bf16.msra.mxu0 %v6745_v3  ;;  %v6827_v3 = vld [vmem:[%s9424_s1 + $0x910] ss:$24 sps:$4 sm:$0xff]  }
 0x13c   :  { %2551 = vmatprep.subr.bf16.mxu0 %v6750_v6  ;;  %6176 = vmatpush3.bf16.msra.mxu1 %v6860_v11  ;;  %v6832_v6 = vld [vmem:[%s9424_s1 + $0x940] ss:$24 sps:$4 sm:$0xff]   ;;  %v6849_v11 = vld [vmem:[%s9424_s1 + $0x9d4] ss:$24 sps:$4 sm:$0xff]  }
 0x13d   :  { %6177 = vmatprep.subr.bf16.mxu1 %v6861_v14  ;;  %v6847_v14 = vld [vmem:[%s9424_s1 + $0x9d0] ss:$24 sps:$4 sm:$0xff]  }
 0x13f   :  { %2552 = vmatpush1.bf16.msra.mxu0 %v6748_v8  ;;  %v404_v8 = vlaneseq }
 0x140   :  { %2553 = vmatprep.subr.bf16.mxu0 %v6753_v10  ;;  %6178 = vmatpush3.bf16.msra.mxu1 %v6865_v17 }
 0x141   :  { %6191 = vmatprep.subr.bf16.mxu1 %v6866_v18  ;;  %v8400_v10 = vshrl.u32 %v404_v8, 7  ;;  %v6874_v8 = vld [vmem:[%s9426_s3 + $0xd8] sm:$0xff]  }
 0x143   :  { %2554 = vmatpush1.bf16.msra.mxu0 %v6751_v13  ;;  %v406_v13 = vsub.s32 0, %v8400_v10  ;;  %v410_v17 = vsub.s32 1, %v8400_v10 }
 0x144   :  { %2555 = vmatprep.subr.bf16.mxu0 %v6756_v16  ;;  %v8415_v16 = vld [vmem:[%s9427_s2] sm:$0x3f] }
 0x145   :  { %v407_v18 = vrot.slane %v8415_v16, %v406_v13 }
 0x147   :  { %2556 = vmatpush1.bf16.msra.mxu0 %v6754_v38  ;;  %v6854_v38 = vld [vmem:[%s9424_s1 + $0xa04] ss:$24 sps:$4 sm:$0xff]  }
 0x148   :  { %2557 = vmatprep.subr.bf16.mxu0 %v6759_v19  ;;  %v411_v19 = vrot.slane %v8415_v16, %v410_v17 }
 0x14b   :  { %2558 = vmatpush1.bf16.msra.mxu0 %v6757_v20  ;;  %v6852_v20 = vld [vmem:[%s9424_s1 + $0xa00] ss:$24 sps:$4 sm:$0xff]  }
 0x14c   :  { %2559 = vmatprep.subr.bf16.mxu0 %v6762_v21  ;;  %v6859_v21 = vld [vmem:[%s9424_s1 + $0xa34] ss:$24 sps:$4 sm:$0xff]  }
 0x14f   :  { %2560 = vmatpush1.bf16.msra.mxu0 %v6760_v22 }
 0x150   :  { %2561 = vmatprep.subr.bf16.mxu0 %v6765_v23 }
 0x153   :  { %2562 = vmatpush1.bf16.msra.mxu0 %v6763_v25 }
 0x154   :  { %2563 = vmatprep.subr.bf16.mxu0 %v6768_v27 }
 0x157   :  { %2564 = vmatpush1.bf16.msra.mxu0 %v6766_v28 }
 0x158   :  { %2565 = vmatprep.subr.bf16.mxu0 %v6771_v30  ;;  %v6857_v30 = vld [vmem:[%s9424_s1 + $0xa30] ss:$24 sps:$4 sm:$0xff]  }
 0x15b   :  { %2566 = vmatpush1.bf16.msra.mxu0 %v6769_v31 }
 0x15c   :  { %2567 = vmatprep.subr.bf16.mxu0 %v6774_v32 }
 0x15f   :  { %2568 = vmatpush1.bf16.msra.mxu0 %v6772_v33  ;;  %v6864_v33 = vld [vmem:[%s9424_s1 + $0xa64] ss:$24 sps:$4 sm:$0xff]  }
 0x160   :  { %2569 = vmatprep.subr.bf16.mxu0 %v6777_v34 }
 0x163   :  { %2570 = vmatpush1.bf16.msra.mxu0 %v6775_v35 }
 0x164   :  { %2582 = vmatprep.subr.bf16.mxu0 %v6780_v36  ;;  %v401_v36 = vld [vmem:[%s9424_s1 + $0xa90] sm:$0x33] }
 0x166   :  { %2572 = vmatmul.mubr.bf16.vlgmr.msra.gmra.mrb[4].mxu0 %v7685_v12  ;;  %v6789_v12 = vld [vmem:[%s9424_s1 + $0x6a4] ss:$24 sps:$4 sm:$0xff]  }
 0x167   :  { %2583 = vmatpush1.bf16.msra.mxu0 %v6778_v37  ;;  %2614 = vmatprep.mubr.bf16.mxu0 %v7693_v15  ;;  %v6787_v15 = vld [vmem:[%s9424_s1 + $0x6a0] ss:$24 sps:$4 sm:$0xff]   ;;  %v418_v37 = vsub.s32 3, %v8400_v10 }
 0x168   :  { %2584 = vmatprep.subr.bf16.mxu0 %v6783_v39 }
 0x16b   :  { %2585 = vmatpush1.bf16.msra.mxu0 %v6781_v40 }
 0x16c   :  { %2586 = vmatprep.subr.bf16.mxu0 %v6786_v41 }
 0x16f   :  { %2587 = vmatpush1.bf16.msra.mxu0 %v6784_v42 }
 0x170   :  { %2588 = vmatprep.subr.bf16.mxu0 %v6789_v12  ;;  %v6862_v12 = vld [vmem:[%s9424_s1 + $0xa60] ss:$24 sps:$4 sm:$0xff]  }
 0x173   :  { %2589 = vmatpush1.bf16.msra.mxu0 %v6787_v15 }
 0x174   :  { %2590 = vmatprep.subr.bf16.mxu0 %v6792_v43  ;;  %v5868_v43 = vcombine.high %v401_v36, %v401_v36 }
 0x177   :  { %2591 = vmatpush1.bf16.msra.mxu0 %v6790_v44  ;;  %v5867_v44 = vcombine.low %v401_v36, %v401_v36  ;;  %v7207_v36 = vmov 0  }
 0x178   :  { %2592 = vmatprep.subr.bf16.mxu0 %v6795_v45 }
 0x17b   :  { %2593 = vmatpush1.bf16.msra.mxu0 %v6793_v46  ;;  %v419_v46 = vrot.slane %v8415_v16, %v418_v37 }
 0x17c   :  { %2594 = vmatprep.subr.bf16.mxu0 %v6798_v47 }
 0x17f   :  { %2595 = vmatpush1.bf16.msra.mxu0 %v6796_v48 }
 0x180   :  { %2596 = vmatprep.subr.bf16.mxu0 %v6801_v49  ;;  %v6868_v49 = vld [vmem:[%s9426_s3 + $0x80] sm:$0xff]  }
 0x183   :  { %2597 = vmatpush1.bf16.msra.mxu0 %v6799_v50 }
 0x184   :  { %2598 = vmatprep.subr.bf16.mxu0 %v6804_v51 }
 0x187   :  { %2599 = vmatpush1.bf16.msra.mxu0 %v6802_v52 }
 0x188   :  { %2600 = vmatprep.subr.bf16.mxu0 %v6807_v53 }
 0x18b   :  { %2601 = vmatpush1.bf16.msra.mxu0 %v6805_v54  ;;  %v2147_v54 = vsel %vm2133_vm1, %v5867_v44, 0 }
 0x18c   :  { %2602 = vmatprep.subr.bf16.mxu0 %v6810_v2  ;;  %v6870_v2 = vld [vmem:[%s9426_s3 + $0xc8] sm:$0xff]  }
 0x18f   :  { %2603 = vmatpush1.bf16.msra.mxu0 %v6808_v55 }
 0x190   :  { %2604 = vmatprep.subr.bf16.mxu0 %v6813_v24 }
 0x193   :  { %2605 = vmatpush1.bf16.msra.mxu0 %v6811_v56 }
 0x194   :  { %2606 = vmatprep.subr.bf16.mxu0 %v6816_v57 }
 0x197   :  { %2607 = vmatpush1.bf16.msra.mxu0 %v6814_v58 }
 0x198   :  { %2608 = vmatprep.subr.bf16.mxu0 %v6819_v59  ;;  %v6871_v59 = vld [vmem:[%s9426_s3 + $0x88] sm:$0xff]  }
 0x19b   :  { %2609 = vmatpush1.bf16.msra.mxu0 %v6817_v60 }
 0x19c   :  { %2610 = vmatprep.subr.bf16.mxu0 %v6822_v61 }
 0x19f   :  { %2611 = vmatpush1.bf16.msra.mxu0 %v6820_v62  ;;  %v6872_v62 = vld [vmem:[%s9426_s3 + $0xd0] sm:$0xff]  }
 0x1a0   :  { %2612 = vmatprep.subr.bf16.mxu0 %v6825_v63 }
 0x1a3   :  { %2613 = vmatpush1.bf16.msra.mxu0 %v6823_v0 }
 0x1a4   :  { %2625 = vmatprep.subr.bf16.mxu0 %v6829_v1 }
 0x1a6   :  { %2615 = vmatmul.mubr.bf16.vlgmr.msra.gmra.mrb[4].mxu0 %v7903_v26  ;;  %v6844_v26 = vld [vmem:[%s9424_s1 + $0x9a4] ss:$24 sps:$4 sm:$0xff]  }
 0x1a7   :  { %2626 = vmatpush1.bf16.msra.mxu0 %v6827_v3  ;;  %5874 = vmatprep.mubr.msk.bf16.mxu0 %vm2129_vm0, %v7911_v29  ;;  %v6842_v29 = vld [vmem:[%s9424_s1 + $0x9a0] ss:$24 sps:$4 sm:$0xff]  }
 0x1a8   :  { %2627 = vmatprep.subr.bf16.mxu0 %v6834_v5  ;;  %v6873_v5 = vld [vmem:[%s9426_s3 + $0x90] sm:$0xff]  }
 0x1ab   :  { %2628 = vmatpush1.bf16.msra.mxu0 %v6832_v6 }
 0x1ac   :  { %2629 = vmatprep.subr.bf16.mxu0 %v6839_v7 }
 0x1af   :  { %2630 = vmatpush1.bf16.msra.mxu0 %v6837_v9 }
 0x1b0   :  { %2631 = vmatprep.subr.bf16.mxu0 %v6844_v26  ;;  %v414_v26 = vsub.s32 2, %v8400_v10 }
 0x1b3   :  { %2632 = vmatpush1.bf16.msra.mxu0 %v6842_v29  ;;  %v6876_v29 = vld [vmem:[%s9426_s3 + $0xe0] sm:$0xff]  }
 0x1b4   :  { %2633 = vmatprep.subr.bf16.mxu0 %v6849_v11  ;;  %v6877_v11 = vld [vmem:[%s9426_s3 + $0xa0] sm:$0xff]  }
 0x1b7   :  { %2634 = vmatpush1.bf16.msra.mxu0 %v6847_v14  ;;  %v415_v14 = vrot.slane %v8415_v16, %v414_v26 }
 0x1b8   :  { %2635 = vmatprep.subr.bf16.mxu0 %v6854_v38  ;;  %v6878_v38 = vld [vmem:[%s9426_s3 + $0xe8] sm:$0xff]  }
 0x1b9   :  { %v2315_v22 = vpop.f32.mrb[0].mxu0 }
 0x1ba   :  { %v6269_v23 = vadd.f32 %v2315_v22, %v407_v18  ;;  %v2317_v25 = vpop.f32.mrb[1].mxu0  ;;  %v6881_v22 = vld [vmem:[%s9426_s3 + $0xb0] sm:$0xff]  }
 0x1bb   :  { %v6270_v27 = vadd.f32 %v2317_v25, %v411_v19  ;;  %v2319_v28 = vpop.f32.mrb[2].mxu0  ;;  %2636 = vmatpush1.bf16.msra.mxu0 %v6852_v20 }
 0x1bc   :  { %v6271_v31 = vadd.f32 %v2319_v28, %v407_v18  ;;  %v2321_v32 = vpop.f32.mrb[3].mxu0  ;;  %2637 = vmatprep.subr.bf16.mxu0 %v6859_v21  ;;  %v2668_v39 = vmul.f32 0.01, %v6269_v23  ;;  %v2487_v52 = vpop.f32.mrb[0].mxu1  ;;  %v6879_v18 = vld [vmem:[%s9426_s3 + $0xa8] sm:$0xff]   ;;  %v6880_v21 = vld [vmem:[%s9426_s3 + $0xf0] sm:$0xff]  }
 0x1bd   :  { %v2669_v34 = vmul.f32 0.01, %v6270_v27  ;;  %v6272_v35 = vadd.f32 %v2321_v32, %v411_v19  ;;  %v2489_v55 = vpop.f32.mrb[1].mxu1  ;;  %v6273_v19 = vadd.f32 %v2487_v52, %v415_v14  ;;  %v6883_v28 = vld [vmem:[%s9426_s3 + $0xb8] sm:$0xff]   ;;  %v6892_v52 = vld [vmem:[%s9426_s3 + $0x140] ss:$0 sps:$4 sm:$0xff]  }
 0x1be   :  { %v2674_v40 = vmul.f32 0.01, %v6271_v31  ;;  %v8455_v47 = vmax.f32 %v6269_v23, %v2668_v39  ;;  %v6274_v56 = vadd.f32 %v2489_v55, %v419_v46  ;;  %v2491_v57 = vpop.f32.mrb[2].mxu1 }
 0x1bf   :  { %v8443_v41 = vmax.f32 %v6270_v27, %v2669_v34  ;;  %v2675_v42 = vmul.f32 0.01, %v6272_v35  ;;  %2638 = vmatpush1.bf16.msra.mxu0 %v6857_v30  ;;  %v2493_v58 = vpop.f32.mrb[3].mxu1  ;;  %v6275_v20 = vadd.f32 %v2491_v57, %v415_v14  ;;  %v2670_v23 = vmul.f32 0.01, %v6273_v19  ;;  %v6882_v27 = vld [vmem:[%s9426_s3 + $0xf8] sm:$0xff]  }
 0x1c0   :  { %v8448_v15 = vmax.f32 %v6271_v31, %v2674_v40  ;;  %2639 = vmatprep.subr.bf16.mxu0 %v6864_v33  ;;  %v2671_v60 = vmul.f32 0.01, %v6274_v56  ;;  %v6276_v61 = vadd.f32 %v2493_v58, %v419_v46  ;;  %v2692_v3 = vmul.f32 %v8455_v47, %v8455_v47  ;;  %v6884_v34 = vld [vmem:[%s9426_s3 + $0x100] sm:$0xff]   ;;  %v6885_v40 = vld [vmem:[%s9426_s3 + $0x108] sm:$0xff]   ;;  %v6887_v46 = vld [vmem:[%s9426_s3 + $0x118] sm:$0xff]  }
 0x1c1   :  { %v8450_v45 = vmax.f32 %v6272_v35, %v2675_v42  ;;  %v2693_v50 = vmul.f32 %v8443_v41, %v8443_v41  ;;  %v2676_v25 = vmul.f32 0.01, %v6275_v20  ;;  %v8527_v30 = vmax.f32 %v6273_v19, %v2670_v23 }
 0x1c2   :  { %v2704_v53 = vpack.c.bf16 %v8448_v15, %v8455_v47  ;;  %v2698_v63 = vmul.f32 %v8448_v15, %v8448_v15  ;;  %v8481_v0 = vmax.f32 %v6274_v56, %v2671_v60  ;;  %v2677_v1 = vmul.f32 0.01, %v6276_v61 }
 0x1c3   :  { %2640 = vmatpush1.bf16.msra.mxu0 %v6862_v12  ;;  %v2705_v48 = vpack.c.bf16 %v8450_v45, %v8443_v41  ;;  %v2699_v51 = vmul.f32 %v8450_v45, %v8450_v45  ;;  %v8529_v31 = vmax.f32 %v6275_v20, %v2676_v25  ;;  %v2694_v42 = vmul.f32 %v8527_v30, %v8527_v30 }
 0x1c4   :  { %5873 = vmatprep.subr.msk.bf16.mxu0 %vm2133_vm1, %v5868_v43  ;;  %v8489_v6 = vmax.f32 %v6276_v61, %v2677_v1  ;;  %v2710_v7 = vpack.c.bf16 %v2698_v63, %v2692_v3  ;;  %v2695_v32 = vmul.f32 %v8481_v0, %v8481_v0  ;;  %v6886_v43 = vld [vmem:[%s9426_s3 + $0x110] sm:$0xff]  }
 0x1c5   :  { %3083 = vmatprep.mubr.bf16.mxu1 %v2705_v48  ;;  %v2711_v24 = vpack.c.bf16 %v2699_v51, %v2693_v50  ;;  %v2706_v35 = vpack.c.bf16 %v8529_v31, %v8527_v30  ;;  %v2700_v12 = vmul.f32 %v8529_v31, %v8529_v31  ;;  %v6888_v48 = vld [vmem:[%s9426_s3 + $0x120] sm:$0xff]   ;;  %v6890_v50 = vld [vmem:[%s9426_s3 + $0x130] sm:$0xff]   ;;  %v6891_v51 = vld [vmem:[%s9426_s3 + $0x138] sm:$0xff]  }
 0x1c6   :  { %3084 = vmatmul.mubr.bf16.vlgmr.msra.gmra.mrb[4].mxu1 %v2704_v53  ;;  %v2707_v9 = vpack.c.bf16 %v8489_v6, %v8481_v0  ;;  %v2701_v33 = vmul.f32 %v8489_v6, %v8489_v6  ;;  %v3049_v53 = vsel %vm3047_vm2, %v6892_v52, 0 }
 0x1c7   :  { %6192 = vmatpush3.bf16.msra.mxu1 %v6868_v49  ;;  %2642 = vmatpush1.bf16.msra.mxu0 %v2147_v54  ;;  %v2712_v44 = vpack.c.bf16 %v2700_v12, %v2694_v42  ;;  %v6889_v49 = vld [vmem:[%s9426_s3 + $0x128] sm:$0xff]   ;;  %v422_v54 = vsub.s32 4, %v8400_v10 }
 0x1c8   :  { %3091 = vmatprep.mubr.bf16.mxu1 %v2711_v24  ;;  %6193 = vmatprep.subr.bf16.mxu1 %v6870_v2  ;;  %v2713_v39 = vpack.c.bf16 %v2701_v33, %v2695_v32  ;;  %v426_v2 = vsub.s32 5, %v8400_v10  ;;  %v7167_v10 = vld [vmem:[%s9430_s7 + $0xc0] sm:$0xff]  }
 0x1c9   :  { %v423_v56 = vrot.slane %v8415_v16, %v422_v54 }
 0x1ca   :  { %2658 = vmatmul.mubr.bf16.vlgmr.msra.gmra.mrb[4].mxu0 %v8020_v4  ;;  %v6875_v4 = vld [vmem:[%s9426_s3 + $0x98] sm:$0xff]  }
 0x1cb   :  { %6194 = vmatpush3.bf16.msra.mxu1 %v6871_v59  ;;  %v427_v59 = vrot.slane %v8415_v16, %v426_v2 }
 0x1cc   :  { %6195 = vmatprep.subr.bf16.mxu1 %v6872_v62 }
 0x1ce   :  { %3092 = vmatmul.mubr.bf16.gmra.mrb[8].mxu1 %v2710_v7 }
 0x1cf   :  { %6196 = vmatpush3.bf16.msra.mxu1 %v6873_v5  ;;  %3132 = vmatprep.mubr.bf16.mxu1 %v2707_v9 }
 0x1d0   :  { %6197 = vmatprep.subr.bf16.mxu1 %v6874_v8 }
 0x1d3   :  { %6198 = vmatpush3.bf16.msra.mxu1 %v6875_v4 }
 0x1d4   :  { %6199 = vmatprep.subr.bf16.mxu1 %v6876_v29 }
 0x1d7   :  { %6200 = vmatpush3.bf16.msra.mxu1 %v6877_v11 }
 0x1d8   :  { %6201 = vmatprep.subr.bf16.mxu1 %v6878_v38 }
 0x1db   :  { %6202 = vmatpush3.bf16.msra.mxu1 %v6879_v18 }
 0x1dc   :  { %6203 = vmatprep.subr.bf16.mxu1 %v6880_v21 }
 0x1df   :  { %6204 = vmatpush3.bf16.msra.mxu1 %v6881_v22 }
 0x1e0   :  { %6205 = vmatprep.subr.bf16.mxu1 %v6882_v27 }
 0x1e3   :  { %6206 = vmatpush3.bf16.msra.mxu1 %v6883_v28 }
 0x1e4   :  { %3149 = vmatprep.subr.bf16.mxu1 %v7207_v36 }
 0x1e6   :  { %3133 = vmatmul.mubr.bf16.vlgmr.msra.gmra.mrb[12].mxu1 %v2706_v35 }
 0x1e7   :  { %3140 = vmatprep.mubr.bf16.mxu1 %v2713_v39  ;;  %3150 = vmatpush1.bf16.msra.mxu1 %v6884_v34 }
 0x1e8   :  { %3151 = vmatprep.subr.bf16.mxu1 %v7207_v36 }
 0x1eb   :  { %3152 = vmatpush1.bf16.msra.mxu1 %v6885_v40 }
 0x1ec   :  { %3153 = vmatprep.subr.bf16.mxu1 %v7207_v36 }
 0x1ee   :  { %3141 = vmatmul.mubr.bf16.gmra.mrb[16].mxu1 %v2712_v44 }
 0x1ef   :  { %3154 = vmatpush1.bf16.msra.mxu1 %v6886_v43 }
 0x1f0   :  { %3155 = vmatprep.subr.bf16.mxu1 %v7207_v36 }
 0x1f3   :  { %3156 = vmatpush1.bf16.msra.mxu1 %v6887_v46 }
 0x1f4   :  { %3157 = vmatprep.subr.bf16.mxu1 %v7207_v36 }
 0x1f7   :  { %3158 = vmatpush1.bf16.msra.mxu1 %v6888_v48 }
 0x1f8   :  { %3159 = vmatprep.subr.bf16.mxu1 %v7207_v36 }
 0x1fb   :  { %3160 = vmatpush1.bf16.msra.mxu1 %v6889_v49 }
 0x1fc   :  { %3161 = vmatprep.subr.bf16.mxu1 %v7207_v36 }
 0x1ff   :  { %3162 = vmatpush1.bf16.msra.mxu1 %v6890_v50 }
 0x200   :  { %3163 = vmatprep.subr.bf16.mxu1 %v7207_v36 }
 0x203   :  { %3164 = vmatpush1.bf16.msra.mxu1 %v6891_v51 }
 0x204   :  { %3165 = vmatprep.subr.bf16.mxu1 %v7207_v36 }
 0x207   :  { %3166 = vmatpush1.bf16.msra.mxu1 %v3049_v53 }
 0x299   :  { %v6179_v55 = vpop.f32.mrb[4].mxu1 }
 0x29a   :  { %v6180_v24 = vpop.f32.mrb[5].mxu1 }
 0x29b   :  { %v6181_v57 = vadd.f32 %v6180_v24, %v6179_v55  ;;  %v6182_v58 = vpop.f32.mrb[6].mxu1 }
 0x29c   :  { %v6183_v60 = vpop.f32.mrb[7].mxu1 }
 0x29d   :  { %v6184_v61 = vadd.f32 %v6183_v60, %v6182_v58  ;;  %v2659_v62 = vpop.f32.mrb[4].mxu0 }
 0x29e   :  { %v6277_v63 = vadd.f32 %v2659_v62, %v423_v56  ;;  %v2661_v1 = vpop.f32.mrb[5].mxu0 }
 0x29f   :  { %v6278_v3 = vadd.f32 %v2661_v1, %v427_v59  ;;  %v2663_v5 = vpop.f32.mrb[6].mxu0  ;;  %v6902_v1 = vld [vmem:[%s9429_s5 + $0x8] ss:$16 sps:$4 sm:$0xff]  }
 0x2a0   :  { %v6279_v7 = vadd.f32 %v2663_v5, %v423_v56  ;;  %v2665_v8 = vpop.f32.mrb[7].mxu0  ;;  %v2672_v11 = vmul.f32 0.01, %v6277_v63  ;;  %v6908_v5 = vld [vmem:[%s9429_s5 + $0x28] ss:$16 sps:$4 sm:$0xff]  }
 0x2a1   :  { %v2673_v9 = vmul.f32 0.01, %v6278_v3  ;;  %v6280_v4 = vadd.f32 %v2665_v8, %v427_v59  ;;  %v6185_v29 = vpop.f32.mrb[8].mxu1  ;;  %v3216_v59 = vld [vmem:[%s9428_s4] sm:$0xff]  ;;  %v6916_v8 = vld [vmem:[%s9429_s5 + $0x4c] ss:$16 sps:$4 sm:$0xff]  }
 0x2a2   :  { %v2678_v14 = vmul.f32 0.01, %v6279_v7  ;;  %v6186_v38 = vpop.f32.mrb[9].mxu1  ;;  %v8588_v27 = vmax.f32 %v6277_v63, %v2672_v11  ;;  %v5919_v60 = vcombine.high %v3216_v59, %v3216_v59  ;;  %v5918_v62 = vcombine.low %v3216_v59, %v3216_v59  ;;  %v6928_v11 = vld [vmem:[%s9429_s5 + $0x8c] ss:$16 sps:$4 sm:$0xff]  }
 0x2a3   :  { %v8582_v18 = vmax.f32 %v6278_v3, %v2673_v9  ;;  %v2679_v19 = vmul.f32 0.01, %v6280_v4  ;;  %v6187_v20 = vadd.f32 %v6186_v38, %v6185_v29  ;;  %v6188_v16 = vpop.f32.mrb[10].mxu1  ;;  %v6904_v3 = vld [vmem:[%s9429_s5 + $0xc] ss:$16 sps:$4 sm:$0xff]  }
 0x2a4   :  { %v8584_v21 = vmax.f32 %v6279_v7, %v2678_v14  ;;  %v6189_v22 = vpop.f32.mrb[11].mxu1  ;;  %v2696_v40 = vmul.f32 %v8588_v27, %v8588_v27  ;;  %5924 = vmatprep.subr.msk.bf16.mxu1 %vm3047_vm2, %v5919_v60  ;;  %4585 = vmatprep.subr.bf16.mxu0 %v6904_v3  ;;  %v6910_v7 = vld [vmem:[%s9429_s5 + $0x2c] ss:$16 sps:$4 sm:$0xff]   ;;  %v6914_v9 = vld [vmem:[%s9429_s5 + $0x48] ss:$16 sps:$4 sm:$0xff]  }
 0x2a5   :  { %v8586_v23 = vmax.f32 %v6280_v4, %v2679_v19  ;;  %v6190_v25 = vadd.f32 %v6189_v22, %v6188_v16  ;;  %v2697_v28 = vmul.f32 %v8582_v18, %v8582_v18  ;;  %4586 = vmatpush1.bf16.msra.mxu0 %v6902_v1  ;;  %v6922_v4 = vld [vmem:[%s9429_s5 + $0x6c] ss:$16 sps:$4 sm:$0xff]   ;;  %v6920_v29 = vld [vmem:[%s9429_s5 + $0x68] ss:$16 sps:$4 sm:$0xff]  }
 0x2a6   :  { %v2708_v34 = vpack.c.bf16 %v8584_v21, %v8588_v27  ;;  %v2702_v39 = vmul.f32 %v8584_v21, %v8584_v21  ;;  %4587 = vmatprep.subr.bf16.mxu0 %v6910_v7  ;;  %v6926_v14 = vld [vmem:[%s9429_s5 + $0x88] ss:$16 sps:$4 sm:$0xff]   ;;  %v6934_v38 = vld [vmem:[%s9429_s5 + $0xac] ss:$16 sps:$4 sm:$0xff]  }
 0x2a7   :  { %v2703_v32 = vmul.f32 %v8586_v23, %v8586_v23  ;;  %v2709_v33 = vpack.c.bf16 %v8586_v23, %v8582_v18  ;;  %v6932_v19 = vld [vmem:[%s9429_s5 + $0xa8] ss:$16 sps:$4 sm:$0xff]   ;;  %v6946_v22 = vld [vmem:[%s9429_s5 + $0xec] ss:$16 sps:$4 sm:$0xff]  }
 0x2a8   :  { %v2714_v42 = vpack.c.bf16 %v2702_v39, %v2696_v40  ;;  %v6938_v16 = vld [vmem:[%s9429_s5 + $0xc8] ss:$16 sps:$4 sm:$0xff]   ;;  %v6970_v40 = vld [vmem:[%s9429_s5 + $0x16c] ss:$16 sps:$4 sm:$0xff]  }
 0x2a9   :  { %5916 = vmatprep.mubr.msk.bf16.mxu1 %vm3040_vm3, %v2709_v33  ;;  %v2715_v35 = vpack.c.bf16 %v2703_v32, %v2697_v28  ;;  %4588 = vmatpush1.bf16.msra.mxu0 %v6908_v5  ;;  %v6952_v28 = vld [vmem:[%s9429_s5 + $0x10c] ss:$16 sps:$4 sm:$0xff]   ;;  %v6950_v32 = vld [vmem:[%s9429_s5 + $0x108] ss:$16 sps:$4 sm:$0xff]  }
 0x2aa   :  { %3182 = vmatmul.mubr.bf16.vlgmr.msra.gmra.mrb[20].mxu1 %v2708_v34  ;;  %4589 = vmatprep.subr.bf16.mxu0 %v6916_v8  ;;  %v6958_v33 = vld [vmem:[%s9429_s5 + $0x12c] ss:$16 sps:$4 sm:$0xff]   ;;  %v6956_v34 = vld [vmem:[%s9429_s5 + $0x128] ss:$16 sps:$4 sm:$0xff]  }
 0x2ab   :  { %5917 = vmatprep.mubr.msk.bf16.mxu1 %vm3040_vm3, %v2715_v35  ;;  %v6964_v35 = vld [vmem:[%s9429_s5 + $0x14c] ss:$16 sps:$4 sm:$0xff]   ;;  %v6962_v39 = vld [vmem:[%s9429_s5 + $0x148] ss:$16 sps:$4 sm:$0xff]  }
 0x2ad   :  { %4590 = vmatpush1.bf16.msra.mxu0 %v6914_v9  ;;  %v3218_v9 = vld [vmem:[%s9428_s4 + $0x10] sm:$0xff] }
 0x2ae   :  { %4591 = vmatprep.subr.bf16.mxu0 %v6922_v4 }
 0x2b1   :  { %4592 = vmatpush1.bf16.msra.mxu0 %v6920_v29 }
 0x2b2   :  { %3190 = vmatmul.mubr.bf16.gmra.mrb[24].mxu1 %v2714_v42  ;;  %4593 = vmatprep.subr.bf16.mxu0 %v6928_v11  ;;  %v6968_v42 = vld [vmem:[%s9429_s5 + $0x168] ss:$16 sps:$4 sm:$0xff]  }
 0x2b3   :  { %3290 = vmatprep.mubr.bf16.mxu1 %v7207_v36 }
 0x2b5   :  { %4594 = vmatpush1.bf16.msra.mxu0 %v6926_v14 }
 0x2b6   :  { %4595 = vmatprep.subr.bf16.mxu0 %v6934_v38 }
 0x2b9   :  { %v6207_v12 = vpop.f32.mrb[12].mxu1  ;;  %4596 = vmatpush1.bf16.msra.mxu0 %v6932_v19  ;;  %v5923_v19 = vcombine.high %v3218_v9, %v3218_v9 }
 0x2ba   :  { %v6208_v43 = vpop.f32.mrb[13].mxu1 }
 0x2bb   :  { %v6209_v44 = vadd.f32 %v6208_v43, %v6207_v12  ;;  %v6210_v46 = vpop.f32.mrb[14].mxu1 }
 0x2bc   :  { %v6211_v48 = vpop.f32.mrb[15].mxu1 }
 0x2bd   :  { %v6212_v49 = vadd.f32 %v6211_v48, %v6210_v46  ;;  %v8605_v50 = vadd.f32 %v6209_v44, %v6181_v57  ;;  %v3241_v57 = vsel %vm3047_vm2, %v5918_v62, 0 }
 0x2be   :  { %3259 = vmatpush1.bf16.msra.mxu1 %v3241_v57 }
 0x2bf   :  { %v8607_v51 = vadd.f32 %v6212_v49, %v6184_v61  ;;  %v8621_v61 = vld [vmem:[%s9428_s4 + $0x8] sm:$0xff] }
 0x2c0   :  { %v5921_v63 = vcombine.high %v8621_v61, %v8621_v61  ;;  %v5920_v8 = vcombine.low %v8621_v61, %v8621_v61  ;;  %v5922_v61 = vcombine.low %v3218_v9, %v3218_v9  ;;  %v6986_v9 = vld [vmem:[%s9429_s5 + $0x1c8] ss:$16 sps:$4 sm:$0xff]  }
 0x2c1   :  { %v6213_v52 = vpop.f32.mrb[16].mxu1 }
 0x2c2   :  { %v6214_v53 = vpop.f32.mrb[17].mxu1  ;;  %5927 = vmatprep.subr.msk.bf16.mxu1 %vm3047_vm2, %v5921_v63  ;;  %v3247_v38 = vsel %vm3047_vm2, %v5920_v8, 0  ;;  %v6988_v8 = vld [vmem:[%s9429_s5 + $0x1cc] ss:$16 sps:$4 sm:$0xff]  }
 0x2c3   :  { %v6215_v54 = vadd.f32 %v6214_v53, %v6213_v52  ;;  %v6216_v2 = vpop.f32.mrb[18].mxu1 }
 0x2c4   :  { %v6217_v55 = vpop.f32.mrb[19].mxu1 }
 0x2c5   :  { %v6218_v24 = vadd.f32 %v6217_v55, %v6216_v2  ;;  %v8609_v56 = vadd.f32 %v6215_v54, %v6187_v20  ;;  %v6940_v20 = vld [vmem:[%s9429_s5 + $0xcc] ss:$16 sps:$4 sm:$0xff]  }
 0x2c6   :  { %4597 = vmatprep.subr.bf16.mxu0 %v6940_v20 }
 0x2c7   :  { %v8611_v58 = vadd.f32 %v6218_v24, %v6190_v25  ;;  %4598 = vmatpush1.bf16.msra.mxu0 %v6938_v16  ;;  %v6944_v25 = vld [vmem:[%s9429_s5 + $0xe8] ss:$16 sps:$4 sm:$0xff]   ;;  %v3253_v16 = vsel %vm3047_vm2, %v5922_v61, 0 }
 0x2c8   :  { %4599 = vmatprep.subr.bf16.mxu0 %v6946_v22  ;;  %v6901_v22 = vld [vmem:[%s9429_s5 + $0x4] ss:$16 sps:$4 sm:$0xff]  }
 0x2cb   :  { %4600 = vmatpush1.bf16.msra.mxu0 %v6944_v25  ;;  %v6899_v25 = vld [vmem:[%s9429_s5] ss:$16 sps:$4 sm:$0xff]  }
 0x2cc   :  { %4601 = vmatprep.subr.bf16.mxu0 %v6952_v28  ;;  %v6907_v28 = vld [vmem:[%s9429_s5 + $0x24] ss:$16 sps:$4 sm:$0xff]  }
 0x2cf   :  { %4602 = vmatpush1.bf16.msra.mxu0 %v6950_v32  ;;  %v6905_v32 = vld [vmem:[%s9429_s5 + $0x20] ss:$16 sps:$4 sm:$0xff]  }
 0x2d0   :  { %4603 = vmatprep.subr.bf16.mxu0 %v6958_v33  ;;  %v6913_v33 = vld [vmem:[%s9429_s5 + $0x44] ss:$16 sps:$4 sm:$0xff]  }
 0x2d3   :  { %4604 = vmatpush1.bf16.msra.mxu0 %v6956_v34  ;;  %v6911_v34 = vld [vmem:[%s9429_s5 + $0x40] ss:$16 sps:$4 sm:$0xff]  }
 0x2d4   :  { %4605 = vmatprep.subr.bf16.mxu0 %v6964_v35  ;;  %v6919_v35 = vld [vmem:[%s9429_s5 + $0x64] ss:$16 sps:$4 sm:$0xff]  }
 0x2d7   :  { %4606 = vmatpush1.bf16.msra.mxu0 %v6962_v39  ;;  %v6917_v39 = vld [vmem:[%s9429_s5 + $0x60] ss:$16 sps:$4 sm:$0xff]  }
 0x2d8   :  { %4607 = vmatprep.subr.bf16.mxu0 %v6970_v40  ;;  %v6925_v40 = vld [vmem:[%s9429_s5 + $0x84] ss:$16 sps:$4 sm:$0xff]  }
 0x2db   :  { %4608 = vmatpush1.bf16.msra.mxu0 %v6968_v42  ;;  %v6923_v42 = vld [vmem:[%s9429_s5 + $0x80] ss:$16 sps:$4 sm:$0xff]  }
 0x37d   :  { %v3183_v12 = vpop.f32.mrb[20].mxu1 }
 0x37e   :  { %v3184_v43 = vadd.f32 %v3183_v12, %v8605_v50  ;;  %v3185_v44 = vpop.f32.mrb[21].mxu1  ;;  %v6931_v12 = vld [vmem:[%s9429_s5 + $0xa4] ss:$16 sps:$4 sm:$0xff]  }
 0x37f   :  { %v3186_v46 = vpop.f32.mrb[22].mxu1  ;;  %v6937_v44 = vld [vmem:[%s9429_s5 + $0xc4] ss:$16 sps:$4 sm:$0xff]  }
 0x380   :  { %v3187_v48 = vadd.f32 %v3186_v46, %v8607_v51  ;;  %v3188_v49 = vpop.f32.mrb[23].mxu1  ;;  %v3198_v52 = vmul.f32 0.012345679, %v3184_v43  ;;  %v6929_v43 = vld [vmem:[%s9429_s5 + $0xa0] ss:$16 sps:$4 sm:$0xff]  }
 0x381   :  { %v6935_v46 = vld [vmem:[%s9429_s5 + $0xc0] ss:$16 sps:$4 sm:$0xff]  }
 0x382   :  { %v3199_v54 = vmul.f32 0.012345679, %v3187_v48  ;;  %v3202_v59 = vmul.f32 %v3198_v52, %v3198_v52  ;;  %v3210_v7 = vsub.f32 0.0, %v3198_v52  ;;  %v6943_v48 = vld [vmem:[%s9429_s5 + $0xe4] ss:$16 sps:$4 sm:$0xff]  }
 0x383   :  { %v6941_v49 = vld [vmem:[%s9429_s5 + $0xe0] ss:$16 sps:$4 sm:$0xff]   ;;  %v6949_v52 = vld [vmem:[%s9429_s5 + $0x104] ss:$16 sps:$4 sm:$0xff]  }
 0x384   :  { %v3203_v63 = vmul.f32 %v3199_v54, %v3199_v54  ;;  %v3211_v4 = vsub.f32 0.0, %v3199_v54  ;;  %v6955_v54 = vld [vmem:[%s9429_s5 + $0x124] ss:$16 sps:$4 sm:$0xff]  }
 0x385   :  { %v3191_v53 = vpop.f32.mrb[24].mxu1 }
 0x386   :  { %v3192_v2 = vadd.f32 %v3191_v53, %v8609_v56  ;;  %v3193_v55 = vpop.f32.mrb[25].mxu1  ;;  %v6947_v53 = vld [vmem:[%s9429_s5 + $0x100] ss:$16 sps:$4 sm:$0xff]  }
 0x387   :  { %v3194_v24 = vpop.f32.mrb[26].mxu1  ;;  %v6961_v55 = vld [vmem:[%s9429_s5 + $0x144] ss:$16 sps:$4 sm:$0xff]  }
 0x388   :  { %v3200_v60 = vmul.f32 0.012345679, %v3192_v2  ;;  %v3195_v62 = vadd.f32 %v3194_v24, %v8611_v58  ;;  %v3196_v57 = vpop.f32.mrb[27].mxu1  ;;  %v6953_v2 = vld [vmem:[%s9429_s5 + $0x120] ss:$16 sps:$4 sm:$0xff]  }
 0x389   :  { %v6959_v24 = vld [vmem:[%s9429_s5 + $0x140] ss:$16 sps:$4 sm:$0xff]   ;;  %v6976_v57 = vld [vmem:[%s9429_s5 + $0x18c] ss:$16 sps:$4 sm:$0xff]  }
 0x38a   :  { %v3204_v1 = vsub.f32 %v3200_v60, %v3202_v59  ;;  %v3201_v50 = vmul.f32 0.012345679, %v3195_v62  ;;  %v6967_v59 = vld [vmem:[%s9429_s5 + $0x164] ss:$16 sps:$4 sm:$0xff]   ;;  %v6965_v60 = vld [vmem:[%s9429_s5 + $0x160] ss:$16 sps:$4 sm:$0xff]   ;;  %4609 = vmatprep.subr.bf16.mxu0 %v6976_v57 }
 0x38b   :  { %v6973_v62 = vld [vmem:[%s9429_s5 + $0x184] ss:$16 sps:$4 sm:$0xff]  }
 0x38c   :  { %v3206_v3 = vadd.f32 1e-05, %v3204_v1  ;;  %v3205_v5 = vsub.f32 %v3201_v50, %v3203_v63  ;;  %v6971_v63 = vld [vmem:[%s9429_s5 + $0x180] ss:$16 sps:$4 sm:$0xff]   ;;  %v6974_v1 = vld [vmem:[%s9429_s5 + $0x188] ss:$16 sps:$4 sm:$0xff]  }
 0x38d   :  { %4610 = vmatpush1.bf16.msra.mxu0 %v6974_v1  ;;  %v6979_v50 = vld [vmem:[%s9429_s5 + $0x1a4] ss:$16 sps:$4 sm:$0xff]  }
 0x38e   :  { %7199 = vrsqrt.f32 %v3206_v3  ;;  %v3207_v51 = vadd.f32 1e-05, %v3205_v5  ;;  %v6982_v3 = vld [vmem:[%s9429_s5 + $0x1ac] ss:$16 sps:$4 sm:$0xff]   ;;  %v6977_v5 = vld [vmem:[%s9429_s5 + $0x1a0] ss:$16 sps:$4 sm:$0xff]  }
 0x38f   :  { %4611 = vmatprep.subr.bf16.mxu0 %v6982_v3  ;;  %v7015_v57 = vld [vmem:[%s9429_s5 + $0x264] ss:$16 sps:$4 sm:$0xff]  }
 0x390   :  { %7201 = vrsqrt.f32 %v3207_v51  ;;  %v6980_v51 = vld [vmem:[%s9429_s5 + $0x1a8] ss:$16 sps:$4 sm:$0xff]  }
 0x391   :  { %4612 = vmatpush1.bf16.msra.mxu0 %v6980_v51 }
 0x392   :  { %4613 = vmatprep.subr.bf16.mxu0 %v6988_v8 }
 0x395   :  { %4614 = vmatpush1.bf16.msra.mxu0 %v6986_v9  ;;  %v7016_v9 = vld [vmem:[%s9429_s5 + $0x268] ss:$16 sps:$4 sm:$0xff]  }
 0x398   :  { %v7200_v56 = vpop.eup %7199 }
 0x399   :  { %v3212_v58 = vmul.f32 %v7200_v56, %v3210_v7  ;;  %v6985_v7 = vld [vmem:[%s9429_s5 + $0x1c4] ss:$16 sps:$4 sm:$0xff]  }
 0x39a   :  { %v7202_v29 = vpop.eup %7201 }
 0x39b   :  { %v3214_v11 = vpack.c.bf16 %v7202_v29, %v7200_v56  ;;  %v3213_v14 = vmul.f32 %v7202_v29, %v3211_v4  ;;  %v6983_v56 = vld [vmem:[%s9429_s5 + $0x1c0] ss:$16 sps:$4 sm:$0xff]   ;;  %v6991_v4 = vld [vmem:[%s9429_s5 + $0x1e4] ss:$16 sps:$4 sm:$0xff]  }
 0x39c   :  { %v6989_v29 = vld [vmem:[%s9429_s5 + $0x1e0] ss:$16 sps:$4 sm:$0xff]  }
 0x39d   :  { %5925 = vmatmul.mubr.msk.bf16.vlgmr.msra.gmra.mrb[28].mxu1 %vm3040_vm3, %v3214_v11  ;;  %v3215_v20 = vpack.c.bf16 %v3213_v14, %v3212_v58  ;;  %v6994_v58 = vld [vmem:[%s9429_s5 + $0x1ec] ss:$16 sps:$4 sm:$0xff]   ;;  %v6997_v14 = vld [vmem:[%s9429_s5 + $0x204] ss:$16 sps:$4 sm:$0xff]  }
 0x39e   :  { %3300 = vmatprep.mubr.bf16.mxu1 %v7207_v36  ;;  %3312 = vmatpush1.bf16.msra.mxu1 %v3247_v38  ;;  %v7000_v38 = vld [vmem:[%s9429_s5 + $0x20c] ss:$16 sps:$4 sm:$0xff]  }
 0x39f   :  { %5930 = vmatprep.subr.msk.bf16.mxu1 %vm3047_vm2, %v5923_v19  ;;  %4615 = vmatprep.subr.bf16.mxu0 %v6994_v58 }
 0x3a5   :  { %5926 = vmatmul.mubr.msk.bf16.gmra.mrb[32].mxu1 %vm3040_vm3, %v3215_v20 }
 0x3a6   :  { %3343 = vmatprep.mubr.bf16.mxu1 %v7207_v36 }
 0x3ad   :  { %5928 = vmatmul.mubr.msk.bf16.vlgmr.msra.gmra.mrb[36].mxu1 %vm3040_vm3, %v3214_v11 }
 0x3ae   :  { %3353 = vmatprep.mubr.bf16.mxu1 %v7207_v36  ;;  %3365 = vmatpush1.bf16.msra.mxu1 %v3253_v16 }
 0x3af   :  { %4456 = vmatprep.subr.bf16.mxu1 %v6901_v22 }
 0x3b5   :  { %5929 = vmatmul.mubr.msk.bf16.gmra.mrb[40].mxu1 %vm3040_vm3, %v3215_v20 }
 0x3b6   :  { %3396 = vmatprep.mubr.bf16.mxu1 %v7207_v36 }
 0x3bd   :  { %5931 = vmatmul.mubr.msk.bf16.vlgmr.msra.gmra.mrb[44].mxu1 %vm3040_vm3, %v3214_v11  ;;  %v6992_v11 = vld [vmem:[%s9429_s5 + $0x1e8] ss:$16 sps:$4 sm:$0xff]  }
 0x3be   :  { %3406 = vmatprep.mubr.bf16.mxu1 %v7207_v36  ;;  %4457 = vmatpush1.bf16.msra.mxu1 %v6899_v25 }
 0x3bf   :  { %4458 = vmatprep.subr.bf16.mxu1 %v6907_v28  ;;  %4616 = vmatpush1.bf16.msra.mxu0 %v6992_v11 }
 0x3c0   :  { %4628 = vmatprep.subr.bf16.mxu0 %v7000_v38  ;;  %v7022_v38 = vld [vmem:[%s9429_s5 + $0x288] ss:$16 sps:$4 sm:$0xff]  }
 0x3c2   :  { %4459 = vmatpush1.bf16.msra.mxu1 %v6905_v32 }
 0x3c3   :  { %4460 = vmatprep.subr.bf16.mxu1 %v6913_v33 }
 0x3c5   :  { %5932 = vmatmul.mubr.msk.bf16.gmra.mrb[48].mxu1 %vm3040_vm3, %v3215_v20 }
 0x3c6   :  { %4461 = vmatpush1.bf16.msra.mxu1 %v6911_v34 }
 0x3c7   :  { %4462 = vmatprep.subr.bf16.mxu1 %v6919_v35 }
 0x3ca   :  { %4463 = vmatpush1.bf16.msra.mxu1 %v6917_v39 }
 0x3cb   :  { %4464 = vmatprep.subr.bf16.mxu1 %v6925_v40 }
 0x3ce   :  { %4465 = vmatpush1.bf16.msra.mxu1 %v6923_v42 }
 0x3cf   :  { %4466 = vmatprep.subr.bf16.mxu1 %v6931_v12 }
 0x3d2   :  { %4467 = vmatpush1.bf16.msra.mxu1 %v6929_v43 }
 0x3d3   :  { %4468 = vmatprep.subr.bf16.mxu1 %v6937_v44 }
 0x3d6   :  { %4469 = vmatpush1.bf16.msra.mxu1 %v6935_v46 }
 0x3d7   :  { %4470 = vmatprep.subr.bf16.mxu1 %v6943_v48 }
 0x3da   :  { %4471 = vmatpush1.bf16.msra.mxu1 %v6941_v49 }
 0x3db   :  { %4472 = vmatprep.subr.bf16.mxu1 %v6949_v52 }
 0x3de   :  { %4473 = vmatpush1.bf16.msra.mxu1 %v6947_v53  ;;  %v7001_v53 = vld [vmem:[%s9429_s5 + $0x220] ss:$16 sps:$4 sm:$0xff]  }
 0x3df   :  { %4474 = vmatprep.subr.bf16.mxu1 %v6955_v54  ;;  %v7004_v54 = vld [vmem:[%s9429_s5 + $0x228] ss:$16 sps:$4 sm:$0xff]  }
 0x3e2   :  { %4475 = vmatpush1.bf16.msra.mxu1 %v6953_v2 }
 0x3e3   :  { %4476 = vmatprep.subr.bf16.mxu1 %v6961_v55  ;;  %v7009_v55 = vld [vmem:[%s9429_s5 + $0x244] ss:$16 sps:$4 sm:$0xff]  }
 0x3e6   :  { %4477 = vmatpush1.bf16.msra.mxu1 %v6959_v24  ;;  %v7012_v24 = vld [vmem:[%s9429_s5 + $0x24c] ss:$16 sps:$4 sm:$0xff]  }
 0x3e7   :  { %4478 = vmatprep.subr.bf16.mxu1 %v6967_v59  ;;  %v7007_v59 = vld [vmem:[%s9429_s5 + $0x240] ss:$16 sps:$4 sm:$0xff]  }
 0x3ea   :  { %4479 = vmatpush1.bf16.msra.mxu1 %v6965_v60  ;;  %v7010_v60 = vld [vmem:[%s9429_s5 + $0x248] ss:$16 sps:$4 sm:$0xff]  }
 0x3eb   :  { %4480 = vmatprep.subr.bf16.mxu1 %v6973_v62 }
 0x3ee   :  { %4481 = vmatpush1.bf16.msra.mxu1 %v6971_v63  ;;  %v7018_v63 = vld [vmem:[%s9429_s5 + $0x26c] ss:$16 sps:$4 sm:$0xff]  }
 0x3ef   :  { %4482 = vmatprep.subr.bf16.mxu1 %v6979_v50 }
 0x3f2   :  { %4483 = vmatpush1.bf16.msra.mxu1 %v6977_v5 }
 0x3f3   :  { %4484 = vmatprep.subr.bf16.mxu1 %v6985_v7 }
 0x3f6   :  { %4485 = vmatpush1.bf16.msra.mxu1 %v6983_v56  ;;  %v7013_v56 = vld [vmem:[%s9429_s5 + $0x260] ss:$16 sps:$4 sm:$0xff]  }
 0x3f7   :  { %4486 = vmatprep.subr.bf16.mxu1 %v6991_v4 }
 0x3fa   :  { %4487 = vmatpush1.bf16.msra.mxu1 %v6989_v29 }
 0x3fb   :  { %4499 = vmatprep.subr.bf16.mxu1 %v6997_v14  ;;  %v7019_v14 = vld [vmem:[%s9429_s5 + $0x280] ss:$16 sps:$4 sm:$0xff]  }
 0x470   :  { %v3292_v19 = vpop.f32.mrb[28].mxu1 }
 0x471   :  { %v3294_v20 = vpop.f32.mrb[29].mxu1  ;;  %v3417_v22 = vmul.f32 %v3292_v19, %v8455_v47  ;;  %v6995_v47 = vld [vmem:[%s9429_s5 + $0x200] ss:$16 sps:$4 sm:$0xff]   ;;  %v7027_v19 = vld [vmem:[%s9429_s5 + $0x2a4] ss:$16 sps:$4 sm:$0xff]  }
 0x472   :  { %v3296_v61 = vpop.f32.mrb[30].mxu1  ;;  %v3418_v25 = vmul.f32 %v3294_v20, %v8443_v41  ;;  %v6998_v41 = vld [vmem:[%s9429_s5 + $0x208] ss:$16 sps:$4 sm:$0xff]   ;;  %v7030_v20 = vld [vmem:[%s9429_s5 + $0x2ac] ss:$16 sps:$4 sm:$0xff]  }
 0x473   :  { %v3298_v16 = vpop.f32.mrb[31].mxu1  ;;  %v3423_v32 = vmul.f32 %v3296_v61, %v8448_v15  ;;  %v7003_v15 = vld [vmem:[%s9429_s5 + $0x224] ss:$16 sps:$4 sm:$0xff]  }
 0x474   :  { %v3424_v35 = vmul.f32 %v3298_v16, %v8450_v45  ;;  %v7006_v45 = vld [vmem:[%s9429_s5 + $0x22c] ss:$16 sps:$4 sm:$0xff]  }
 0x478   :  { %v3302_v28 = vpop.f32.mrb[32].mxu1 }
 0x479   :  { %v3429_v33 = vadd.f32 %v3417_v22, %v3302_v28  ;;  %v3304_v34 = vpop.f32.mrb[33].mxu1  ;;  %v7028_v28 = vld [vmem:[%s9429_s5 + $0x2a8] ss:$16 sps:$4 sm:$0xff]  }
 0x47a   :  { %v3430_v39 = vadd.f32 %v3418_v25, %v3304_v34  ;;  %v3306_v40 = vpop.f32.mrb[34].mxu1  ;;  %v7025_v25 = vld [vmem:[%s9429_s5 + $0x2a0] ss:$16 sps:$4 sm:$0xff]   ;;  %v7036_v34 = vld [vmem:[%s9429_s5 + $0x2cc] ss:$16 sps:$4 sm:$0xff]  }
 0x47b   :  { %v3435_v42 = vadd.f32 %v3423_v32, %v3306_v40  ;;  %v3308_v12 = vpop.f32.mrb[35].mxu1 }
 0x47c   :  { %v3436_v43 = vadd.f32 %v3424_v35, %v3308_v12  ;;  %v7031_v35 = vld [vmem:[%s9429_s5 + $0x2c0] ss:$16 sps:$4 sm:$0xff]   ;;  %v7042_v12 = vld [vmem:[%s9429_s5 + $0x2ec] ss:$16 sps:$4 sm:$0xff]  }
 0x47d   :  { %v3441_v44 = vpack.c.bf16 %v3435_v42, %v3429_v33  ;;  %v7033_v33 = vld [vmem:[%s9429_s5 + $0x2c4] ss:$16 sps:$4 sm:$0xff]  }
 0x47e   :  { %v3442_v46 = vpack.c.bf16 %v3436_v43, %v3430_v39  ;;  %v7034_v39 = vld [vmem:[%s9429_s5 + $0x2c8] ss:$16 sps:$4 sm:$0xff]   ;;  %v7039_v42 = vld [vmem:[%s9429_s5 + $0x2e4] ss:$16 sps:$4 sm:$0xff]  }
 0x480   :  { %v3345_v48 = vpop.f32.mrb[36].mxu1  ;;  %4488 = vmatprep.mubr.bf16.mxu1 %v3442_v46  ;;  %4617 = vmatprep.mubr.bf16.mxu0 %v3442_v46 }
 0x481   :  { %v3347_v49 = vpop.f32.mrb[37].mxu1  ;;  %4489 = vmatmul.mubr.bf16.vlgmr.msra.gmra.mrb[52].mxu1 %v3441_v44  ;;  %4618 = vmatmul.mubr.bf16.vlgmr.msra.gmra.mrb[8].mxu0 %v3441_v44  ;;  %v3419_v62 = vmul.f32 %v3345_v48, %v8527_v30  ;;  %v7037_v48 = vld [vmem:[%s9429_s5 + $0x2e0] ss:$16 sps:$4 sm:$0xff]  }
 0x482   :  { %4500 = vmatpush1.bf16.msra.mxu1 %v6995_v47  ;;  %4629 = vmatpush1.bf16.msra.mxu0 %v6998_v41  ;;  %v3349_v52 = vpop.f32.mrb[38].mxu1  ;;  %v3420_v1 = vmul.f32 %v3347_v49, %v8481_v0  ;;  %v7040_v49 = vld [vmem:[%s9429_s5 + $0x2e8] ss:$16 sps:$4 sm:$0xff]  }
 0x483   :  { %v3351_v2 = vpop.f32.mrb[39].mxu1  ;;  %4501 = vmatprep.subr.bf16.mxu1 %v7003_v15  ;;  %4630 = vmatprep.subr.bf16.mxu0 %v7006_v45  ;;  %v3425_v3 = vmul.f32 %v3349_v52, %v8529_v31  ;;  %v7024_v31 = vld [vmem:[%s9429_s5 + $0x28c] ss:$16 sps:$4 sm:$0xff]  }
 0x484   :  { %v3426_v7 = vmul.f32 %v3351_v2, %v8489_v6  ;;  %v7021_v6 = vld [vmem:[%s9429_s5 + $0x284] ss:$16 sps:$4 sm:$0xff]  }
 0x486   :  { %4502 = vmatpush1.bf16.msra.mxu1 %v7001_v53  ;;  %4631 = vmatpush1.bf16.msra.mxu0 %v7004_v54 }
 0x487   :  { %4503 = vmatprep.subr.bf16.mxu1 %v7009_v55  ;;  %4632 = vmatprep.subr.bf16.mxu0 %v7012_v24  ;;  %v7043_v55 = vld [vmem:[%s9429_s5 + $0x300] ss:$16 sps:$4 sm:$0xff]   ;;  %v7046_v24 = vld [vmem:[%s9429_s5 + $0x308] ss:$16 sps:$4 sm:$0xff]  }
 0x488   :  { %v3355_v50 = vpop.f32.mrb[40].mxu1 }
 0x489   :  { %v3431_v5 = vadd.f32 %v3419_v62, %v3355_v50  ;;  %v3357_v51 = vpop.f32.mrb[41].mxu1  ;;  %v7049_v62 = vld [vmem:[%s9429_s5 + $0x320] ss:$16 sps:$4 sm:$0xff]  }
 0x48a   :  { %v3432_v30 = vadd.f32 %v3420_v1, %v3357_v51  ;;  %4504 = vmatpush1.bf16.msra.mxu1 %v7007_v59  ;;  %4633 = vmatpush1.bf16.msra.mxu0 %v7010_v60  ;;  %v3359_v8 = vpop.f32.mrb[42].mxu1  ;;  %v7051_v59 = vld [vmem:[%s9429_s5 + $0x324] ss:$16 sps:$4 sm:$0xff]   ;;  %v7054_v60 = vld [vmem:[%s9429_s5 + $0x32c] ss:$16 sps:$4 sm:$0xff]  }
 0x48b   :  { %v3437_v0 = vadd.f32 %v3425_v3, %v3359_v8  ;;  %v3361_v4 = vpop.f32.mrb[43].mxu1  ;;  %4505 = vmatprep.subr.bf16.mxu1 %v7015_v57  ;;  %4634 = vmatprep.subr.bf16.mxu0 %v7018_v63  ;;  %v7052_v57 = vld [vmem:[%s9429_s5 + $0x328] ss:$16 sps:$4 sm:$0xff]   ;;  %v7057_v63 = vld [vmem:[%s9429_s5 + $0x344] ss:$16 sps:$4 sm:$0xff]  }
 0x48c   :  { %v3438_v58 = vadd.f32 %v3426_v7, %v3361_v4  ;;  %v7060_v1 = vld [vmem:[%s9429_s5 + $0x34c] ss:$16 sps:$4 sm:$0xff]   ;;  %v7055_v50 = vld [vmem:[%s9429_s5 + $0x340] ss:$16 sps:$4 sm:$0xff]   ;;  %v7058_v3 = vld [vmem:[%s9429_s5 + $0x348] ss:$16 sps:$4 sm:$0xff]  }
 0x48d   :  { %v8903_v29 = vpack.c.bf16 %v3437_v0, %v3431_v5  ;;  %v7063_v5 = vld [vmem:[%s9429_s5 + $0x364] ss:$16 sps:$4 sm:$0xff]   ;;  %v7066_v51 = vld [vmem:[%s9429_s5 + $0x36c] ss:$16 sps:$4 sm:$0xff]   ;;  %v7061_v7 = vld [vmem:[%s9429_s5 + $0x360] ss:$16 sps:$4 sm:$0xff]  }
 0x48e   :  { %v3444_v11 = vpack.c.bf16 %v3438_v58, %v3432_v30  ;;  %4506 = vmatpush1.bf16.msra.mxu1 %v7013_v56  ;;  %4635 = vmatpush1.bf16.msra.mxu0 %v7016_v9  ;;  %v7064_v30 = vld [vmem:[%s9429_s5 + $0x368] ss:$16 sps:$4 sm:$0xff]   ;;  %v7069_v8 = vld [vmem:[%s9429_s5 + $0x384] ss:$16 sps:$4 sm:$0xff]   ;;  %v7072_v56 = vld [vmem:[%s9429_s5 + $0x38c] ss:$16 sps:$4 sm:$0xff]  }
 0x48f   :  { %4507 = vmatprep.subr.bf16.mxu1 %v7021_v6  ;;  %4636 = vmatprep.subr.bf16.mxu0 %v7024_v31  ;;  %v7067_v9 = vld [vmem:[%s9429_s5 + $0x380] ss:$16 sps:$4 sm:$0xff]   ;;  %v7070_v0 = vld [vmem:[%s9429_s5 + $0x388] ss:$16 sps:$4 sm:$0xff]   ;;  %v7075_v4 = vld [vmem:[%s9429_s5 + $0x3a4] ss:$16 sps:$4 sm:$0xff]  }
 0x490   :  { %v3398_v61 = vpop.f32.mrb[44].mxu1  ;;  %4531 = vmatprep.mubr.bf16.mxu1 %v3444_v11  ;;  %4660 = vmatprep.mubr.bf16.mxu0 %v3444_v11  ;;  %v7078_v6 = vld [vmem:[%s9429_s5 + $0x3ac] ss:$16 sps:$4 sm:$0xff]   ;;  %v7073_v31 = vld [vmem:[%s9429_s5 + $0x3a0] ss:$16 sps:$4 sm:$0xff]  }
 0x491   :  { %v3400_v16 = vpop.f32.mrb[45].mxu1  ;;  %v3421_v40 = vmul.f32 %v3398_v61, %v8588_v27  ;;  %v7076_v58 = vld [vmem:[%s9429_s5 + $0x3a8] ss:$16 sps:$4 sm:$0xff]   ;;  %v7081_v11 = vld [vmem:[%s9429_s5 + $0x3c4] ss:$16 sps:$4 sm:$0xff]  }
 0x492   :  { %4508 = vmatpush1.bf16.msra.mxu1 %v7019_v14  ;;  %4637 = vmatpush1.bf16.msra.mxu0 %v7022_v38  ;;  %v3402_v22 = vpop.f32.mrb[46].mxu1  ;;  %v3422_v43 = vmul.f32 %v3400_v16, %v8582_v18  ;;  %v7084_v14 = vld [vmem:[%s9429_s5 + $0x3cc] ss:$16 sps:$4 sm:$0xff]   ;;  %v7079_v38 = vld [vmem:[%s9429_s5 + $0x3c0] ss:$16 sps:$4 sm:$0xff]  }
 0x493   :  { %v3404_v32 = vpop.f32.mrb[47].mxu1  ;;  %4509 = vmatprep.subr.bf16.mxu1 %v7027_v19  ;;  %4638 = vmatprep.subr.bf16.mxu0 %v7030_v20  ;;  %v3427_v46 = vmul.f32 %v3402_v22, %v8584_v21  ;;  %v7045_v21 = vld [vmem:[%s9429_s5 + $0x304] ss:$16 sps:$4 sm:$0xff]   ;;  %v7082_v19 = vld [vmem:[%s9429_s5 + $0x3c8] ss:$16 sps:$4 sm:$0xff]  }
 0x494   :  { %v3428_v15 = vmul.f32 %v3404_v32, %v8586_v23  ;;  %v7048_v23 = vld [vmem:[%s9429_s5 + $0x30c] ss:$16 sps:$4 sm:$0xff]   ;;  %v7087_v20 = vld [vmem:[%s9429_s5 + $0x3e4] ss:$16 sps:$4 sm:$0xff]   ;;  %v7085_v16 = vld [vmem:[%s9429_s5 + $0x3e0] ss:$16 sps:$4 sm:$0xff]  }
 0x495   :  { %v7090_v61 = vld [vmem:[%s9429_s5 + $0x3ec] ss:$16 sps:$4 sm:$0xff]   ;;  %v7088_v22 = vld [vmem:[%s9429_s5 + $0x3e8] ss:$16 sps:$4 sm:$0xff]   ;;  %v7091_v32 = vld [vmem:[%s9429_s5 + $0x400] ss:$16 sps:$4 sm:$0xff]  }
 0x496   :  { %4510 = vmatpush1.bf16.msra.mxu1 %v7025_v25  ;;  %4639 = vmatpush1.bf16.msra.mxu0 %v7028_v28  ;;  %v7093_v25 = vld [vmem:[%s9429_s5 + $0x404] ss:$16 sps:$4 sm:$0xff]   ;;  %v7096_v28 = vld [vmem:[%s9429_s5 + $0x40c] ss:$16 sps:$4 sm:$0xff]  }
 0x497   :  { %4511 = vmatprep.subr.bf16.mxu1 %v7033_v33  ;;  %4640 = vmatprep.subr.bf16.mxu0 %v7036_v34  ;;  %v7094_v33 = vld [vmem:[%s9429_s5 + $0x408] ss:$16 sps:$4 sm:$0xff]   ;;  %v7099_v34 = vld [vmem:[%s9429_s5 + $0x424] ss:$16 sps:$4 sm:$0xff]  }
 0x498   :  { %v3408_v44 = vpop.f32.mrb[48].mxu1 }
 0x499   :  { %v3433_v47 = vadd.f32 %v3421_v40, %v3408_v44  ;;  %v3410_v41 = vpop.f32.mrb[49].mxu1  ;;  %v7100_v40 = vld [vmem:[%s9429_s5 + $0x428] ss:$16 sps:$4 sm:$0xff]   ;;  %v7111_v44 = vld [vmem:[%s9429_s5 + $0x464] ss:$16 sps:$4 sm:$0xff]  }
 0x49a   :  { %v3434_v27 = vadd.f32 %v3422_v43, %v3410_v41  ;;  %4512 = vmatpush1.bf16.msra.mxu1 %v7031_v35  ;;  %4641 = vmatpush1.bf16.msra.mxu0 %v7034_v39  ;;  %v3412_v45 = vpop.f32.mrb[50].mxu1  ;;  %v7102_v35 = vld [vmem:[%s9429_s5 + $0x42c] ss:$16 sps:$4 sm:$0xff]   ;;  %v7097_v39 = vld [vmem:[%s9429_s5 + $0x420] ss:$16 sps:$4 sm:$0xff]  }
 0x49b   :  { %v3439_v18 = vadd.f32 %v3427_v46, %v3412_v45  ;;  %v3414_v52 = vpop.f32.mrb[51].mxu1  ;;  %4513 = vmatprep.subr.bf16.mxu1 %v7039_v42  ;;  %4642 = vmatprep.subr.bf16.mxu0 %v7042_v12  ;;  %v7108_v42 = vld [vmem:[%s9429_s5 + $0x44c] ss:$16 sps:$4 sm:$0xff]   ;;  %v7103_v12 = vld [vmem:[%s9429_s5 + $0x440] ss:$16 sps:$4 sm:$0xff]  }
 0x49c   :  { %v3440_v53 = vadd.f32 %v3428_v15, %v3414_v52  ;;  %v7106_v43 = vld [vmem:[%s9429_s5 + $0x448] ss:$16 sps:$4 sm:$0xff]   ;;  %v7114_v46 = vld [vmem:[%s9429_s5 + $0x46c] ss:$16 sps:$4 sm:$0xff]   ;;  %v7117_v15 = vld [vmem:[%s9429_s5 + $0x484] ss:$16 sps:$4 sm:$0xff]  }
 0x49d   :  { %v8957_v54 = vpack.c.bf16 %v3439_v18, %v3433_v47  ;;  %v7109_v47 = vld [vmem:[%s9429_s5 + $0x460] ss:$16 sps:$4 sm:$0xff]   ;;  %v7112_v41 = vld [vmem:[%s9429_s5 + $0x468] ss:$16 sps:$4 sm:$0xff]   ;;  %v7126_v18 = vld [vmem:[%s9429_s5 + $0x4ac] ss:$16 sps:$4 sm:$0xff]  }
 0x49e   :  { %v8959_v2 = vpack.c.bf16 %v3440_v53, %v3434_v27  ;;  %4514 = vmatpush1.bf16.msra.mxu1 %v7037_v48  ;;  %4643 = vmatpush1.bf16.msra.mxu0 %v7040_v49  ;;  %v7120_v27 = vld [vmem:[%s9429_s5 + $0x48c] ss:$16 sps:$4 sm:$0xff]   ;;  %v7115_v45 = vld [vmem:[%s9429_s5 + $0x480] ss:$16 sps:$4 sm:$0xff]   ;;  %v7118_v48 = vld [vmem:[%s9429_s5 + $0x488] ss:$16 sps:$4 sm:$0xff]  }
 0x49f   :  { %4515 = vmatprep.subr.bf16.mxu1 %v7045_v21  ;;  %4644 = vmatprep.subr.bf16.mxu0 %v7048_v23  ;;  %v7123_v49 = vld [vmem:[%s9429_s5 + $0x4a4] ss:$16 sps:$4 sm:$0xff]   ;;  %v7121_v52 = vld [vmem:[%s9429_s5 + $0x4a0] ss:$16 sps:$4 sm:$0xff]   ;;  %v7124_v21 = vld [vmem:[%s9429_s5 + $0x4a8] ss:$16 sps:$4 sm:$0xff]  }
 0x4a0   :  { %v7129_v23 = vld [vmem:[%s9429_s5 + $0x4c4] ss:$16 sps:$4 sm:$0xff]   ;;  %v7132_v53 = vld [vmem:[%s9429_s5 + $0x4cc] ss:$16 sps:$4 sm:$0xff]  }
 0x4a2   :  { %4516 = vmatpush1.bf16.msra.mxu1 %v7043_v55  ;;  %4645 = vmatpush1.bf16.msra.mxu0 %v7046_v24  ;;  %v7130_v55 = vld [vmem:[%s9429_s5 + $0x4c8] ss:$16 sps:$4 sm:$0xff]   ;;  %v7135_v24 = vld [vmem:[%s9429_s5 + $0x4e4] ss:$16 sps:$4 sm:$0xff]  }
 0x4a3   :  { %4517 = vmatprep.subr.bf16.mxu1 %v7051_v59  ;;  %4646 = vmatprep.subr.bf16.mxu0 %v7054_v60  ;;  %v7138_v59 = vld [vmem:[%s9429_s5 + $0x4ec] ss:$16 sps:$4 sm:$0xff]   ;;  %v3607_v60 = vld [vmem:[%s9429_s5 + $0x500] sm:$0xff] }
 0x4a6   :  { %4518 = vmatpush1.bf16.msra.mxu1 %v7049_v62  ;;  %4647 = vmatpush1.bf16.msra.mxu0 %v7052_v57  ;;  %v3608_v62 = vld [vmem:[%s9429_s5 + $0x508] sm:$0xff]  ;;  %v7133_v57 = vld [vmem:[%s9429_s5 + $0x4e0] ss:$16 sps:$4 sm:$0xff]  }
 0x4a7   :  { %4519 = vmatprep.subr.bf16.mxu1 %v7057_v63  ;;  %4648 = vmatprep.subr.bf16.mxu0 %v7060_v1  ;;  %v7136_v63 = vld [vmem:[%s9429_s5 + $0x4e8] ss:$16 sps:$4 sm:$0xff]   ;;  %v6094_v1 = vcombine.high %v3607_v60, %v3607_v60 }
 0x4aa   :  { %4520 = vmatpush1.bf16.msra.mxu1 %v7055_v50  ;;  %4649 = vmatpush1.bf16.msra.mxu0 %v7058_v3  ;;  %v6093_v50 = vcombine.low %v3607_v60, %v3607_v60  ;;  %v6096_v3 = vcombine.high %v3608_v62, %v3608_v62 }
 0x4ab   :  { %4521 = vmatprep.subr.bf16.mxu1 %v7063_v5  ;;  %4650 = vmatprep.subr.bf16.mxu0 %v7066_v51  ;;  %v6095_v5 = vcombine.low %v3608_v62, %v3608_v62 }
 0x4ac   :  { %v4445_v51 = vsel %vm3047_vm2, %v6093_v50, 0 }
 0x4ae   :  { %4522 = vmatpush1.bf16.msra.mxu1 %v7061_v7  ;;  %4651 = vmatpush1.bf16.msra.mxu0 %v7064_v30  ;;  %v7143_v7 = vld [vmem:[%s9430_s7 + $0x40] sm:$0xff]   ;;  %v4451_v30 = vsel %vm3047_vm2, %v6095_v5, 0  ;;  %v7162_v5 = vld [vmem:[%s9430_s7 + $0x98] sm:$0xff]  }
 0x4af   :  { %4523 = vmatprep.subr.bf16.mxu1 %v7069_v8  ;;  %4652 = vmatprep.subr.bf16.mxu0 %v7072_v56  ;;  %v7144_v8 = vld [vmem:[%s9430_s7] sm:$0xff]   ;;  %v7145_v56 = vld [vmem:[%s9430_s7 + $0x48] sm:$0xff]  }
 0x4b2   :  { %4524 = vmatpush1.bf16.msra.mxu1 %v7067_v9  ;;  %4653 = vmatpush1.bf16.msra.mxu0 %v7070_v0  ;;  %v7146_v9 = vld [vmem:[%s9430_s7 + $0x8] sm:$0xff]   ;;  %v7147_v0 = vld [vmem:[%s9430_s7 + $0x50] sm:$0xff]  }
 0x4b3   :  { %4525 = vmatprep.subr.bf16.mxu1 %v7075_v4  ;;  %4654 = vmatprep.subr.bf16.mxu0 %v7078_v6  ;;  %v7148_v4 = vld [vmem:[%s9430_s7 + $0x10] sm:$0xff]   ;;  %v7150_v6 = vld [vmem:[%s9430_s7 + $0x18] sm:$0xff]  }
 0x4b6   :  { %4526 = vmatpush1.bf16.msra.mxu1 %v7073_v31  ;;  %4655 = vmatpush1.bf16.msra.mxu0 %v7076_v58  ;;  %v7151_v31 = vld [vmem:[%s9430_s7 + $0x60] sm:$0xff]  }
 0x4b7   :  { %4527 = vmatprep.subr.bf16.mxu1 %v7081_v11  ;;  %4656 = vmatprep.subr.bf16.mxu0 %v7084_v14  ;;  %v7152_v58 = vld [vmem:[%s9430_s7 + $0x20] sm:$0xff]   ;;  %v7153_v11 = vld [vmem:[%s9430_s7 + $0x68] sm:$0xff]  }
 0x4b8   :  { %v7154_v14 = vld [vmem:[%s9430_s7 + $0x28] sm:$0xff]  }
 0x4ba   :  { %4528 = vmatpush1.bf16.msra.mxu1 %v7079_v38  ;;  %4657 = vmatpush1.bf16.msra.mxu0 %v7082_v19  ;;  %v7155_v38 = vld [vmem:[%s9430_s7 + $0x70] sm:$0xff]  }
 0x4bb   :  { %4529 = vmatprep.subr.bf16.mxu1 %v7087_v20  ;;  %4658 = vmatprep.subr.bf16.mxu0 %v7090_v61  ;;  %v7156_v19 = vld [vmem:[%s9430_s7 + $0x30] sm:$0xff]   ;;  %v7157_v20 = vld [vmem:[%s9430_s7 + $0x78] sm:$0xff]  }
 0x4bc   :  { %v7158_v61 = vld [vmem:[%s9430_s7 + $0x38] sm:$0xff]  }
 0x4be   :  { %4530 = vmatpush1.bf16.msra.mxu1 %v7085_v16  ;;  %4659 = vmatpush1.bf16.msra.mxu0 %v7088_v22  ;;  %v3609_v16 = vld [vmem:[%s9431_s6] sm:$0xf] }
 0x4bf   :  { %4542 = vmatprep.subr.bf16.mxu1 %v7093_v25  ;;  %4671 = vmatprep.subr.bf16.mxu0 %v7096_v28  ;;  %v3614_v22 = vrot.slane %v3609_v16, %v406_v13  ;;  %v3618_v25 = vrot.slane %v3609_v16, %v410_v17  ;;  %v3626_v13 = vrot.slane %v3609_v16, %v418_v37 }
 0x4c1   :  { %4532 = vmatmul.mubr.bf16.vlgmr.msra.gmra.mrb[52].mxu1 %v8903_v29  ;;  %4661 = vmatmul.mubr.bf16.vlgmr.msra.gmra.mrb[8].mxu0 %v8903_v29  ;;  %v7105_v29 = vld [vmem:[%s9429_s5 + $0x444] ss:$16 sps:$4 sm:$0xff]  }
 0x4c2   :  { %4543 = vmatpush1.bf16.msra.mxu1 %v7091_v32  ;;  %6098 = vmatprep.mubr.msk.bf16.mxu1 %vm3040_vm3, %v8959_v2 }
 0x4c3   :  { %4672 = vmatpush1.bf16.msra.mxu0 %v7094_v33  ;;  %6100 = vmatprep.mubr.msk.bf16.mxu0 %vm3040_vm3, %v8959_v2  ;;  %v7127_v2 = vld [vmem:[%s9429_s5 + $0x4c0] ss:$16 sps:$4 sm:$0xff]  }
 0x4c4   :  { %4544 = vmatprep.subr.bf16.mxu1 %v7099_v34  ;;  %4673 = vmatprep.subr.bf16.mxu0 %v7102_v35 }
 0x4c6   :  { %4545 = vmatpush1.bf16.msra.mxu1 %v7097_v39 }
 0x4c7   :  { %4674 = vmatpush1.bf16.msra.mxu0 %v7100_v40  ;;  %4546 = vmatprep.subr.bf16.mxu1 %v7105_v29 }
 0x4c8   :  { %4675 = vmatprep.subr.bf16.mxu0 %v7108_v42 }
 0x4ca   :  { %4547 = vmatpush1.bf16.msra.mxu1 %v7103_v12 }
 0x4cb   :  { %4676 = vmatpush1.bf16.msra.mxu0 %v7106_v43  ;;  %4548 = vmatprep.subr.bf16.mxu1 %v7111_v44 }
 0x4cc   :  { %4677 = vmatprep.subr.bf16.mxu0 %v7114_v46 }
 0x4ce   :  { %4549 = vmatpush1.bf16.msra.mxu1 %v7109_v47 }
 0x4cf   :  { %4678 = vmatpush1.bf16.msra.mxu0 %v7112_v41  ;;  %4550 = vmatprep.subr.bf16.mxu1 %v7117_v15 }
 0x4d0   :  { %4679 = vmatprep.subr.bf16.mxu0 %v7120_v27 }
 0x4d2   :  { %4551 = vmatpush1.bf16.msra.mxu1 %v7115_v45 }
 0x4d3   :  { %4680 = vmatpush1.bf16.msra.mxu0 %v7118_v48  ;;  %4552 = vmatprep.subr.bf16.mxu1 %v7123_v49 }
 0x4d4   :  { %4681 = vmatprep.subr.bf16.mxu0 %v7126_v18 }
 0x4d6   :  { %4553 = vmatpush1.bf16.msra.mxu1 %v7121_v52 }
 0x4d7   :  { %4682 = vmatpush1.bf16.msra.mxu0 %v7124_v21  ;;  %4554 = vmatprep.subr.bf16.mxu1 %v7129_v23  ;;  %v7159_v21 = vld [vmem:[%s9430_s7 + $0x80] sm:$0xff]  }
 0x4d8   :  { %4683 = vmatprep.subr.bf16.mxu0 %v7132_v53 }
 0x4da   :  { %4555 = vmatpush1.bf16.msra.mxu1 %v7127_v2 }
 0x4db   :  { %4684 = vmatpush1.bf16.msra.mxu0 %v7130_v55  ;;  %4556 = vmatprep.subr.bf16.mxu1 %v7135_v24 }
 0x4dc   :  { %4685 = vmatprep.subr.bf16.mxu0 %v7138_v59  ;;  %v7160_v59 = vld [vmem:[%s9430_s7 + $0x88] sm:$0xff]  }
 0x4de   :  { %4557 = vmatpush1.bf16.msra.mxu1 %v7133_v57 }
 0x4df   :  { %4686 = vmatpush1.bf16.msra.mxu0 %v7136_v63  ;;  %6097 = vmatprep.subr.msk.bf16.mxu1 %vm3047_vm2, %v6094_v1  ;;  %v7161_v1 = vld [vmem:[%s9430_s7 + $0x90] sm:$0xff]  }
 0x4e0   :  { %6099 = vmatprep.subr.msk.bf16.mxu0 %vm3047_vm2, %v6096_v3 }
 0x4e2   :  { %4559 = vmatpush1.bf16.msra.mxu1 %v4445_v51  ;;  %v7163_v51 = vld [vmem:[%s9430_s7 + $0xa0] sm:$0xff]  }
 0x4e3   :  { %4688 = vmatpush1.bf16.msra.mxu0 %v4451_v30  ;;  %6219 = vmatprep.subr.bf16.mxu1 %v7143_v7  ;;  %v7164_v7 = vld [vmem:[%s9430_s7 + $0xa8] sm:$0xff]   ;;  %v3622_v30 = vrot.slane %v3609_v16, %v414_v26  ;;  %v7168_v16 = vld [vmem:[%s9432_s8] ss:$16 sps:$4 sm:$0xff]  }
 0x4e5   :  { %4575 = vmatmul.mubr.bf16.vlgmr.msra.gmra.mrb[52].mxu1 %v8957_v54 }
 0x4e6   :  { %4704 = vmatmul.mubr.bf16.vlgmr.msra.gmra.mrb[8].mxu0 %v8957_v54  ;;  %6220 = vmatpush3.bf16.msra.mxu1 %v7144_v8  ;;  %v7149_v54 = vld [vmem:[%s9430_s7 + $0x58] sm:$0xff]   ;;  %v7165_v8 = vld [vmem:[%s9430_s7 + $0xb0] sm:$0xff]  }
 0x4e7   :  { %6221 = vmatprep.subr.bf16.mxu1 %v7145_v56  ;;  %5184 = vmatprep.mubr.bf16.mxu0 %v7207_v36 }
 0x4ea   :  { %6222 = vmatpush3.bf16.msra.mxu1 %v7146_v9 }
 0x4eb   :  { %6223 = vmatprep.subr.bf16.mxu1 %v7147_v0  ;;  %v7166_v0 = vld [vmem:[%s9430_s7 + $0xb8] sm:$0xff]  }
 0x4ee   :  { %6224 = vmatpush3.bf16.msra.mxu1 %v7148_v4 }
 0x4ef   :  { %6225 = vmatprep.subr.bf16.mxu1 %v7149_v54 }
 0x4f2   :  { %6226 = vmatpush3.bf16.msra.mxu1 %v7150_v6 }
 0x4f3   :  { %6227 = vmatprep.subr.bf16.mxu1 %v7151_v31 }
 0x4f6   :  { %6228 = vmatpush3.bf16.msra.mxu1 %v7152_v58 }
 0x4f7   :  { %6229 = vmatprep.subr.bf16.mxu1 %v7153_v11 }
 0x4fa   :  { %6230 = vmatpush3.bf16.msra.mxu1 %v7154_v14 }
 0x4fb   :  { %6231 = vmatprep.subr.bf16.mxu1 %v7155_v38 }
 0x4fe   :  { %6232 = vmatpush3.bf16.msra.mxu1 %v7156_v19 }
 0x4ff   :  { %6233 = vmatprep.subr.bf16.mxu1 %v7157_v20 }
 0x502   :  { %6234 = vmatpush3.bf16.msra.mxu1 %v7158_v61  ;;  %v7170_v61 = vld [vmem:[%s9432_s8 + $0x4] ss:$16 sps:$4 sm:$0xff]  }
 0x503   :  { %5002 = vmatprep.subr.bf16.mxu1 %v7207_v36 }
 0x5b8   :  { %v4576_v28 = vpop.f32.mrb[52].mxu1 }
 0x5b9   :  { %v6281_v32 = vadd.f32 %v4576_v28, %v3614_v22  ;;  %v4705_v33 = vpop.f32.mrb[8].mxu0  ;;  %v4578_v34 = vpop.f32.mrb[53].mxu1  ;;  %v7175_v28 = vld [vmem:[%s9433_s9 + $0x40] sm:$0xff]  }
 0x5ba   :  { %v6282_v35 = vadd.f32 %v4578_v34, %v3618_v25  ;;  %v4707_v39 = vpop.f32.mrb[9].mxu0  ;;  %v4580_v40 = vpop.f32.mrb[54].mxu1  ;;  %v6285_v9 = vadd.f32 %v4705_v33, %v3622_v30 }
 0x5bb   :  { %v6283_v29 = vadd.f32 %v4580_v40, %v3614_v22  ;;  %v4709_v42 = vpop.f32.mrb[10].mxu0  ;;  %v4582_v12 = vpop.f32.mrb[55].mxu1  ;;  %v4714_v47 = vmul.f32 0.01, %v6281_v32  ;;  %v6286_v18 = vadd.f32 %v4707_v39, %v3626_v13  ;;  %v7171_v22 = vld [vmem:[%s9432_s8 + $0x8] ss:$16 sps:$4 sm:$0xff]  }
 0x5bc   :  { %v4715_v43 = vmul.f32 0.01, %v6282_v35  ;;  %v6284_v44 = vadd.f32 %v4582_v12, %v3618_v25  ;;  %v4711_v46 = vpop.f32.mrb[11].mxu0  ;;  %v6287_v56 = vadd.f32 %v4709_v42, %v3622_v30  ;;  %v4716_v54 = vmul.f32 0.01, %v6285_v9 }
 0x5bd   :  { %v4718_v41 = vmul.f32 0.01, %v6283_v29  ;;  %v6288_v48 = vadd.f32 %v4711_v46, %v3626_v13  ;;  %v9230_v49 = vmax.f32 %v6281_v32, %v4714_v47  ;;  %v4717_v24 = vmul.f32 0.01, %v6286_v18  ;;  %v7173_v25 = vld [vmem:[%s9432_s8 + $0xc] ss:$16 sps:$4 sm:$0xff]  }
 0x5be   :  { %v9222_v15 = vmax.f32 %v6282_v35, %v4715_v43  ;;  %v4719_v17 = vmul.f32 0.01, %v6284_v44  ;;  %v4720_v4 = vmul.f32 0.01, %v6287_v56  ;;  %v9292_v31 = vmax.f32 %v6285_v9, %v4716_v54  ;;  %5152 = vmatprep.subr.bf16.mxu0 %v7173_v25  ;;  %v7174_v54 = vld [vmem:[%s9433_s9 + $0x80] sm:$0xff]  }
 0x5bf   :  { %v9226_v27 = vmax.f32 %v6283_v29, %v4718_v41  ;;  %v4721_v2 = vmul.f32 0.01, %v6288_v48  ;;  %v4730_v57 = vmul.f32 %v9230_v49, %v9230_v49  ;;  %v9253_v63 = vmax.f32 %v6286_v18, %v4717_v24  ;;  %5153 = vmatpush1.bf16.msra.mxu0 %v7171_v22  ;;  %v7185_v22 = vld [vmem:[%s9433_s9 + $0x18] sm:$0xff]   ;;  %v7186_v25 = vld [vmem:[%s9433_s9 + $0xa0] sm:$0xff]  }
 0x5c0   :  { %v9228_v45 = vmax.f32 %v6284_v44, %v4719_v17  ;;  %v4731_v23 = vmul.f32 %v9222_v15, %v9222_v15  ;;  %v9287_v26 = vmax.f32 %v6287_v56, %v4720_v4  ;;  %v4732_v19 = vmul.f32 %v9292_v31, %v9292_v31  ;;  %5476 = vmatprep.subr.bf16.mxu0 %v7207_v36 }
 0x5c1   :  { %v4738_v53 = vpack.c.bf16 %v9226_v27, %v9230_v49  ;;  %v4734_v60 = vmul.f32 %v9226_v27, %v9226_v27  ;;  %v9249_v62 = vmax.f32 %v6288_v48, %v4721_v2  ;;  %v4733_v58 = vmul.f32 %v9253_v63, %v9253_v63 }
 0x5c2   :  { %v4739_v52 = vpack.c.bf16 %v9228_v45, %v9222_v15  ;;  %v4735_v37 = vmul.f32 %v9228_v45, %v9228_v45  ;;  %v4740_v11 = vpack.c.bf16 %v9287_v26, %v9292_v31  ;;  %v4736_v38 = vmul.f32 %v9287_v26, %v9287_v26 }
 0x5c3   :  { %v4742_v50 = vpack.c.bf16 %v4734_v60, %v4730_v57  ;;  %v4741_v3 = vpack.c.bf16 %v9249_v62, %v9253_v63  ;;  %v4737_v6 = vmul.f32 %v9249_v62, %v9249_v62 }
 0x5c4   :  { %4985 = vmatprep.mubr.bf16.mxu1 %v4739_v52  ;;  %v4743_v55 = vpack.c.bf16 %v4735_v37, %v4731_v23  ;;  %v4744_v20 = vpack.c.bf16 %v4736_v38, %v4732_v19  ;;  %v7181_v38 = vld [vmem:[%s9433_s9 + $0x50] sm:$0xff]  }
 0x5c5   :  { %4986 = vmatmul.mubr.bf16.vlgmr.msra.gmra.mrb[56].mxu1 %v4738_v53  ;;  %v4745_v14 = vpack.c.bf16 %v4737_v6, %v4733_v58  ;;  %v7178_v6 = vld [vmem:[%s9433_s9 + $0x48] sm:$0xff]   ;;  %v7180_v19 = vld [vmem:[%s9433_s9 + $0x90] sm:$0xff]  }
 0x5c6   :  { %5003 = vmatpush1.bf16.msra.mxu1 %v7159_v21  ;;  %4993 = vmatprep.mubr.bf16.mxu1 %v4743_v55 }
 0x5c7   :  { %5004 = vmatprep.subr.bf16.mxu1 %v7207_v36 }
 0x5ca   :  { %5005 = vmatpush1.bf16.msra.mxu1 %v7160_v59 }
 0x5cb   :  { %5006 = vmatprep.subr.bf16.mxu1 %v7207_v36 }
 0x5cd   :  { %4994 = vmatmul.mubr.bf16.gmra.mrb[60].mxu1 %v4742_v50 }
 0x5ce   :  { %5007 = vmatpush1.bf16.msra.mxu1 %v7161_v1  ;;  %6126 = vmatprep.mubr.msk.bf16.mxu1 %vm4946_vm4, %v4741_v3 }
 0x5cf   :  { %5008 = vmatprep.subr.bf16.mxu1 %v7207_v36 }
 0x5d2   :  { %5009 = vmatpush1.bf16.msra.mxu1 %v7162_v5 }
 0x5d3   :  { %5010 = vmatprep.subr.bf16.mxu1 %v7207_v36 }
 0x5d6   :  { %5011 = vmatpush1.bf16.msra.mxu1 %v7163_v51 }
 0x5d7   :  { %5012 = vmatprep.subr.bf16.mxu1 %v7207_v36 }
 0x5da   :  { %5013 = vmatpush1.bf16.msra.mxu1 %v7164_v7 }
 0x5db   :  { %5014 = vmatprep.subr.bf16.mxu1 %v7207_v36 }
 0x5de   :  { %5015 = vmatpush1.bf16.msra.mxu1 %v7165_v8 }
 0x5df   :  { %5016 = vmatprep.subr.bf16.mxu1 %v7207_v36 }
 0x5e2   :  { %5017 = vmatpush1.bf16.msra.mxu1 %v7166_v0 }
 0x5e3   :  { %5018 = vmatprep.subr.bf16.mxu1 %v7207_v36 }
 0x5e6   :  { %5019 = vmatpush1.bf16.msra.mxu1 %v7167_v10  ;;  %v7176_v10 = vld [vmem:[%s9433_s9] sm:$0xff]  }
 0x5e7   :  { %5099 = vmatprep.subr.bf16.mxu1 %v7170_v61  ;;  %v7184_v61 = vld [vmem:[%s9433_s9 + $0x58] sm:$0xff]  }
 0x5e9   :  { %5035 = vmatmul.mubr.bf16.vlgmr.msra.gmra.mrb[64].mxu1 %v4740_v11  ;;  %v7177_v11 = vld [vmem:[%s9433_s9 + $0x88] sm:$0xff]  }
 0x5ea   :  { %6127 = vmatprep.mubr.msk.bf16.mxu1 %vm4946_vm4, %v4745_v14  ;;  %5100 = vmatpush1.bf16.msra.mxu1 %v7168_v16  ;;  %v7179_v14 = vld [vmem:[%s9433_s9 + $0x8] sm:$0xff]   ;;  %v7183_v16 = vld [vmem:[%s9433_s9 + $0x98] sm:$0xff]  }
 0x5eb   :  { %6247 = vmatprep.subr.bf16.mxu1 %v7175_v28  ;;  %v7187_v28 = vld [vmem:[%s9433_s9 + $0x60] sm:$0xff]  }
 0x5f1   :  { %5043 = vmatmul.mubr.bf16.gmra.mrb[68].mxu1 %v4744_v20  ;;  %v7182_v20 = vld [vmem:[%s9433_s9 + $0x10] sm:$0xff]  }
 0x5f2   :  { %5131 = vmatprep.mubr.bf16.mxu1 %v7207_v36 }
 0x698   :  { %v6235_v32 = vpop.f32.mrb[56].mxu1 }
 0x699   :  { %v6236_v33 = vpop.f32.mrb[57].mxu1 }
 0x69a   :  { %v6237_v34 = vadd.f32 %v6236_v33, %v6235_v32  ;;  %v6238_v35 = vpop.f32.mrb[58].mxu1  ;;  %v7188_v32 = vld [vmem:[%s9433_s9 + $0x20] sm:$0xff]   ;;  %v7189_v33 = vld [vmem:[%s9433_s9 + $0xa8] sm:$0xff]  }
 0x69b   :  { %v6239_v39 = vpop.f32.mrb[59].mxu1 }
 0x69c   :  { %v6240_v40 = vadd.f32 %v6239_v39, %v6238_v35  ;;  %v7191_v35 = vld [vmem:[%s9433_s9 + $0x28] sm:$0xff]   ;;  %v7192_v39 = vld [vmem:[%s9433_s9 + $0xb0] sm:$0xff]  }
 0x6a0   :  { %v6241_v29 = vpop.f32.mrb[60].mxu1 }
 0x6a1   :  { %v6242_v42 = vpop.f32.mrb[61].mxu1 }
 0x6a2   :  { %v6243_v12 = vadd.f32 %v6242_v42, %v6241_v29  ;;  %v6244_v43 = vpop.f32.mrb[62].mxu1  ;;  %v7194_v29 = vld [vmem:[%s9433_s9 + $0x30] sm:$0xff]   ;;  %v7195_v42 = vld [vmem:[%s9433_s9 + $0xb8] sm:$0xff]  }
 0x6a3   :  { %v6245_v44 = vpop.f32.mrb[63].mxu1 }
 0x6a4   :  { %v6246_v46 = vadd.f32 %v6245_v44, %v6244_v43  ;;  %v7197_v43 = vld [vmem:[%s9433_s9 + $0x38] sm:$0xff]   ;;  %v7198_v44 = vld [vmem:[%s9433_s9 + $0xc0] sm:$0xff]  }
 0x6bc   :  { %v5036_v47 = vpop.f32.mrb[64].mxu1 }
 0x6bd   :  { %v5037_v41 = vadd.f32 %v6237_v34, %v5036_v47  ;;  %v5038_v13 = vpop.f32.mrb[65].mxu1  ;;  %v7190_v34 = vld [vmem:[%s9433_s9 + $0x68] sm:$0xff]  }
 0x6be   :  { %v5039_v17 = vpop.f32.mrb[66].mxu1 }
 0x6bf   :  { %v5040_v48 = vadd.f32 %v6240_v40, %v5039_v17  ;;  %v5041_v18 = vpop.f32.mrb[67].mxu1  ;;  %v5051_v52 = vmul.f32 0.04, %v5037_v41  ;;  %v7193_v40 = vld [vmem:[%s9433_s9 + $0x70] sm:$0xff]  }
 0x6c1   :  { %v5052_v23 = vmul.f32 0.04, %v5040_v48  ;;  %v5055_v55 = vmul.f32 %v5051_v52, %v5051_v52  ;;  %v5063_v7 = vsub.f32 0.0, %v5051_v52 }
 0x6c3   :  { %v5056_v57 = vmul.f32 %v5052_v23, %v5052_v23  ;;  %v5064_v8 = vsub.f32 0.0, %v5052_v23 }
 0x6c4   :  { %v5044_v21 = vpop.f32.mrb[68].mxu1 }
 0x6c5   :  { %v5045_v37 = vadd.f32 %v6243_v12, %v5044_v21  ;;  %v5046_v53 = vpop.f32.mrb[69].mxu1  ;;  %v7196_v12 = vld [vmem:[%s9433_s9 + $0x78] sm:$0xff]  }
 0x6c6   :  { %v5047_v2 = vpop.f32.mrb[70].mxu1 }
 0x6c7   :  { %v5053_v24 = vmul.f32 0.04, %v5045_v37  ;;  %v5048_v59 = vadd.f32 %v6246_v46, %v5047_v2  ;;  %v5049_v60 = vpop.f32.mrb[71].mxu1 }
 0x6c9   :  { %v5057_v1 = vsub.f32 %v5053_v24, %v5055_v55  ;;  %v5054_v50 = vmul.f32 0.04, %v5048_v59 }
 0x6cb   :  { %v5059_v3 = vadd.f32 1e-05, %v5057_v1  ;;  %v5058_v5 = vsub.f32 %v5054_v50, %v5056_v57 }
 0x6cd   :  { %7203 = vrsqrt.f32 %v5059_v3  ;;  %v5060_v51 = vadd.f32 1e-05, %v5058_v5 }
 0x6cf   :  { %7205 = vrsqrt.f32 %v5060_v51 }
 0x6d7   :  { %v7204_v30 = vpop.eup %7203 }
 0x6d8   :  { %v5065_v56 = vmul.f32 %v7204_v30, %v5063_v7 }
 0x6d9   :  { %v7206_v9 = vpop.eup %7205 }
 0x6da   :  { %v5067_v0 = vpack.c.bf16 %v7206_v9, %v7204_v30  ;;  %v5066_v4 = vmul.f32 %v7206_v9, %v5064_v8 }
 0x6dc   :  { %6132 = vmatmul.mubr.msk.bf16.vlgmr.msra.gmra.mrb[72].mxu1 %vm4946_vm4, %v5067_v0  ;;  %6134 = vmatmul.mubr.msk.bf16.vlgmr.msra.gmra.mrb[12].mxu0 %vm4946_vm4, %v5067_v0  ;;  %v5068_v58 = vpack.c.bf16 %v5066_v4, %v5065_v56  ;;  %v6136_v4 = vld [vmem:[%s9434_s10] ss:$0 sm:$0xff] }
 0x6dd   :  { %5141 = vmatprep.mubr.bf16.mxu1 %v7207_v36  ;;  %5194 = vmatprep.mubr.bf16.mxu0 %v7207_v36 }
 0x6de   :  { %5477 = vmatpush1.bf16.msra.mxu0 %v7174_v54  ;;  %6248 = vmatpush3.bf16.msra.mxu1 %v7176_v10 }
 0x6df   :  { %5478 = vmatprep.subr.bf16.mxu0 %v7207_v36  ;;  %6249 = vmatprep.subr.bf16.mxu1 %v7178_v6 }
 0x6e2   :  { %5479 = vmatpush1.bf16.msra.mxu0 %v7177_v11  ;;  %6250 = vmatpush3.bf16.msra.mxu1 %v7179_v14 }
 0x6e3   :  { %5480 = vmatprep.subr.bf16.mxu0 %v7207_v36  ;;  %6251 = vmatprep.subr.bf16.mxu1 %v7181_v38 }
 0x6e4   :  { %6133 = vmatmul.mubr.msk.bf16.gmra.mrb[76].mxu1 %vm4946_vm4, %v5068_v58  ;;  %6135 = vmatmul.mubr.msk.bf16.gmra.mrb[16].mxu0 %vm4946_vm4, %v5068_v58 }
 0x6e6   :  { %5481 = vmatpush1.bf16.msra.mxu0 %v7180_v19  ;;  %6252 = vmatpush3.bf16.msra.mxu1 %v7182_v20 }
 0x6e7   :  { %5482 = vmatprep.subr.bf16.mxu0 %v7207_v36  ;;  %6253 = vmatprep.subr.bf16.mxu1 %v7184_v61 }
 0x6ea   :  { %5483 = vmatpush1.bf16.msra.mxu0 %v7183_v16  ;;  %6254 = vmatpush3.bf16.msra.mxu1 %v7185_v22 }
 0x6eb   :  { %5484 = vmatprep.subr.bf16.mxu0 %v7207_v36  ;;  %6255 = vmatprep.subr.bf16.mxu1 %v7187_v28 }
 0x6ee   :  { %5485 = vmatpush1.bf16.msra.mxu0 %v7186_v25  ;;  %6256 = vmatpush3.bf16.msra.mxu1 %v7188_v32 }
 0x6ef   :  { %5486 = vmatprep.subr.bf16.mxu0 %v7207_v36  ;;  %6257 = vmatprep.subr.bf16.mxu1 %v7190_v34 }
 0x6f2   :  { %5487 = vmatpush1.bf16.msra.mxu0 %v7189_v33  ;;  %6258 = vmatpush3.bf16.msra.mxu1 %v7191_v35 }
 0x6f3   :  { %5488 = vmatprep.subr.bf16.mxu0 %v7207_v36  ;;  %6259 = vmatprep.subr.bf16.mxu1 %v7193_v40 }
 0x6f6   :  { %5489 = vmatpush1.bf16.msra.mxu0 %v7192_v39  ;;  %6260 = vmatpush3.bf16.msra.mxu1 %v7194_v29 }
 0x6f7   :  { %5490 = vmatprep.subr.bf16.mxu0 %v7207_v36  ;;  %6261 = vmatprep.subr.bf16.mxu1 %v7196_v12 }
 0x6fa   :  { %5491 = vmatpush1.bf16.msra.mxu0 %v7195_v42  ;;  %6262 = vmatpush3.bf16.msra.mxu1 %v7197_v43 }
 0x6fb   :  { %5492 = vmatprep.subr.bf16.mxu0 %v7207_v36 }
 0x6fe   :  { %5493 = vmatpush1.bf16.msra.mxu0 %v7198_v44 }
 0x7af   :  { %v5133_v46 = vpop.f32.mrb[72].mxu1  ;;  %v5186_v47 = vpop.f32.mrb[12].mxu0 }
 0x7b0   :  { %v5135_v41 = vpop.f32.mrb[73].mxu1  ;;  %v5188_v13 = vpop.f32.mrb[13].mxu0  ;;  %v5205_v36 = vmul.f32 %v5133_v46, %v9230_v49  ;;  %v5207_v21 = vmul.f32 %v5186_v47, %v9292_v31 }
 0x7b1   :  { %v5137_v17 = vpop.f32.mrb[74].mxu1  ;;  %v5190_v48 = vpop.f32.mrb[14].mxu0  ;;  %v5206_v23 = vmul.f32 %v5135_v41, %v9222_v15  ;;  %v5208_v37 = vmul.f32 %v5188_v13, %v9253_v63 }
 0x7b2   :  { %v5139_v18 = vpop.f32.mrb[75].mxu1  ;;  %v5192_v52 = vpop.f32.mrb[15].mxu0  ;;  %v5209_v55 = vmul.f32 %v5137_v17, %v9226_v27  ;;  %v5211_v24 = vmul.f32 %v5190_v48, %v9287_v26 }
 0x7b3   :  { %v5210_v50 = vmul.f32 %v5139_v18, %v9228_v45  ;;  %v5212_v49 = vmul.f32 %v5192_v52, %v9249_v62 }
 0x7b7   :  { %v5143_v53 = vpop.f32.mrb[76].mxu1  ;;  %v5196_v2 = vpop.f32.mrb[16].mxu0 }
 0x7b8   :  { %v5213_v59 = vadd.f32 %v5205_v36, %v5143_v53  ;;  %v5215_v60 = vadd.f32 %v5207_v21, %v5196_v2  ;;  %v5145_v57 = vpop.f32.mrb[77].mxu1  ;;  %v5198_v1 = vpop.f32.mrb[17].mxu0 }
 0x7b9   :  { %v5214_v3 = vadd.f32 %v5206_v23, %v5145_v57  ;;  %v5216_v31 = vadd.f32 %v5208_v37, %v5198_v1  ;;  %v5147_v5 = vpop.f32.mrb[78].mxu1  ;;  %v5200_v15 = vpop.f32.mrb[18].mxu0 }
 0x7ba   :  { %v5217_v51 = vadd.f32 %v5209_v55, %v5147_v5  ;;  %v5219_v63 = vadd.f32 %v5211_v24, %v5200_v15  ;;  %v5149_v7 = vpop.f32.mrb[79].mxu1  ;;  %v5202_v30 = vpop.f32.mrb[19].mxu0 }
 0x7bb   :  { %v5218_v8 = vadd.f32 %v5210_v50, %v5149_v7  ;;  %v5220_v27 = vadd.f32 %v5212_v49, %v5202_v30 }
 0x7bc   :  { %v5221_v56 = vpack.c.bf16 %v5217_v51, %v5213_v59  ;;  %v5223_v26 = vpack.c.bf16 %v5219_v63, %v5215_v60 }
 0x7bd   :  { %v5222_v9 = vpack.c.bf16 %v5218_v8, %v5214_v3  ;;  %v5224_v0 = vpack.c.bf16 %v5220_v27, %v5216_v31 }
 0x7bf   :  { %5467 = vmatprep.mubr.bf16.mxu1 %v5222_v9  ;;  %6162 = vmatprep.mubr.msk.bf16.mxu0 %vm4946_vm4, %v5224_v0 }
 0x7c0   :  { %5468 = vmatmul.mubr.bf16.vlgmr.msra.gmra.mrb[80].mxu1 %v5221_v56  ;;  %5509 = vmatmul.mubr.bf16.vlgmr.msra.gmra.mrb[20].mxu0 %v5223_v26 }
 0x893   :  { %v6263_v45 = vpop.f32.mrb[80].mxu1  ;;  %v5510_v62 = vpop.f32.mrb[20].mxu0 }
 0x894   :  { %v6264_v54 = vpop.f32.mrb[81].mxu1  ;;  %v5512_v10 = vpop.f32.mrb[21].mxu0 }
 0x895   :  { %v6265_v6 = vadd.f32 %v6264_v54, %v6263_v45  ;;  %v6266_v58 = vpop.f32.mrb[82].mxu1  ;;  %v5513_v11 = vpop.f32.mrb[22].mxu0 }
 0x896   :  { %v6267_v14 = vpop.f32.mrb[83].mxu1  ;;  %v5515_v38 = vpop.f32.mrb[23].mxu0 }
 0x897   :  { %v5470_v19 = vadd.f32 %v6265_v6, %v6136_v4  ;;  %v6268_v20 = vadd.f32 %v6267_v14, %v6266_v58 }
 0x899   :  { %v5511_v61 = vadd.f32 %v5510_v62, %v5470_v19  ;;  %v5473_v16 = vadd.f32 %v6268_v20, %v6136_v4 }
 0x89b   :  { %v5517_v22 = vmul.f32 0.01, %v5511_v61  ;;  %v5514_v25 = vadd.f32 %v5513_v11, %v5473_v16 }
 0x89d   :  { %v5519_v28 = vmax.f32 %v5511_v61, %v5517_v22  ;;  %v5518_v32 = vmul.f32 0.01, %v5514_v25 }
 0x89f   :  { %5521 = vst [vmem:[%s9435_s11] sm:$0xff] %v5519_v28  ;;  %v5520_v33 = vmax.f32 %v5514_v25, %v5518_v32 }
 0x8a1   :  { %5522 = vst [vmem:[%s9435_s11 + $0x8] sm:$0xff] %v5520_v33 }

</bundles_post_ra>
